<compile_context>
chip_gen: v7x
topology: tpu7x:2x2x1
jax: 0.10.0
libtpu: 0.0.40
codegen_flags: <defaults>
</compile_context>

<pallas_src>
import functools

import jax
import jax.numpy as jnp
from jax.experimental import pallas as pl
from jax.experimental.pallas import tpu as pltpu


def _round_up(x, m):
    return ((x + m - 1) // m) * m


def _gru_fc_kernel(x_ref, w_ih_ref, w_hh_ref, b_gx_ref, b_hn_ref,
                   w_fc_ref, b_fc_ref, y_ref, gx_ref, h_all_ref,
                   *, apply_softmax):
    """One grid point = one batch tile.

    x_ref     : (TB*S, E)   bf16   embedded tokens (row = b*S + t)
    w_ih_ref  : (E, 3*Hp)   bf16   gate order [r | z | n], each padded to Hp
    w_hh_ref  : (Hp, 3*Hp)  bf16
    b_gx_ref  : (1, 3*Hp)   f32    b_ih + b_hh folded for r/z; b_in for n
    b_hn_ref  : (1, Hp)     f32    b_hn (applied inside r * (.))
    w_fc_ref  : (Hp, Vp)    bf16
    b_fc_ref  : (1, Vp)     f32    padded columns = -1e9 (softmax mask)
    y_ref     : (TB*S, Vp)  f32
    gx_ref    : (TB, S, 3*Hp) f32  scratch (hoisted input projection)
    h_all_ref : (TB, S, Hp)   f32  scratch (per-step hidden states)
    """
    TB, S, Hp = h_all_ref.shape

    # (1) Input projection for all timesteps at once — one MXU matmul.
    gx = jnp.dot(x_ref[...], w_ih_ref[...],
                 preferred_element_type=jnp.float32) + b_gx_ref[...]
    gx_ref[...] = gx.reshape(TB, S, 3 * Hp)

    w_hh = w_hh_ref[...]                  # (Hp, 3Hp) bf16, VMEM-resident
    b_hn = b_hn_ref[...]                  # (1, Hp)   f32

    # (2) Recurrence: only the h-dependent matmul + gate math per step.
    #     h is an SSA loop-carried value (no per-step VMEM round trip).
    #     (For large S, switch this static unroll to lax.fori_loop(unroll=4..8).)
    h = jnp.zeros((TB, Hp), jnp.float32)
    for t in range(S):
        gh = jnp.dot(h.astype(jnp.bfloat16), w_hh,
                     preferred_element_type=jnp.float32)        # (TB, 3Hp)
        gx_t = gx_ref[:, t, :]                                  # (TB, 3Hp)
        # Lane-aligned gate slices (Hp is a multiple of 128).
        r = jax.nn.sigmoid(gx_t[:, 0:Hp] + gh[:, 0:Hp])
        z = jax.nn.sigmoid(gx_t[:, Hp:2 * Hp] + gh[:, Hp:2 * Hp])
        n = jnp.tanh(gx_t[:, 2 * Hp:] + r * (gh[:, 2 * Hp:] + b_hn))
        h = (1.0 - z) * n + z * h
        h_all_ref[:, t, :] = h

    # TODO(synk): reference applies F.dropout(p=0.5, training=True) before fc;
    # omitted (identity) for a deterministic kernel.

    # (3) FC (+ optional softmax) for all timesteps at once; single
    #     lane-dense full-width store.
    h_all = h_all_ref[...].reshape(TB * S, Hp).astype(jnp.bfloat16)
    logits = jnp.dot(h_all, w_fc_ref[...],
                     preferred_element_type=jnp.float32) + b_fc_ref[...]
    if apply_softmax:
        logits = jax.nn.softmax(logits, axis=-1)   # padded cols ~ exp(-1e9) = 0
    y_ref[...] = logits.astype(y_ref.dtype)


def surname_generation_forward(x_in, params, apply_softmax=False):
    """Equivalent of SurnameGenerationModel.forward(x_in, apply_softmax)."""
    emb = params["embedding"]                       # (V, E), row 0 zeroed
    w_ih, w_hh = params["w_ih"], params["w_hh"]     # (E, 3H), (H, 3H)
    b_ih, b_hh = params["b_ih"], params["b_hh"]     # (1, 3H), (1, 3H)
    w_fc, b_fc = params["w_fc"], params["b_fc"]     # (H, V), (1, V)

    B, S = x_in.shape
    E = emb.shape[1]
    H = w_hh.shape[0]
    V = w_fc.shape[1]
    Hp = _round_up(H, 128)
    Vp = _round_up(V, 128)

    # Embedding gather (glue) -> bf16 matmul operands, flattened to (B*S, E).
    x_emb = jnp.take(emb, x_in, axis=0).reshape(B * S, E).astype(jnp.bfloat16)

    # ---- pad weights so each GRU gate / the FC output owns full 128 lanes ----
    def pad_gates(w, out_rows):
        rows = w.shape[0]
        out = jnp.zeros((out_rows, 3 * Hp), jnp.float32)
        for g in range(3):
            out = out.at[:rows, g * Hp:g * Hp + H].set(w[:, g * H:(g + 1) * H])
        return out

    w_ih_p = pad_gates(w_ih, E).astype(jnp.bfloat16)          # (E, 3Hp)
    w_hh_p = pad_gates(w_hh, Hp).astype(jnp.bfloat16)         # (Hp, 3Hp)

    b_rz = b_ih + b_hh                                        # folded for r/z
    b_gx = jnp.zeros((1, 3 * Hp), jnp.float32)
    b_gx = b_gx.at[:, 0:H].set(b_rz[:, 0:H])
    b_gx = b_gx.at[:, Hp:Hp + H].set(b_rz[:, H:2 * H])
    b_gx = b_gx.at[:, 2 * Hp:2 * Hp + H].set(b_ih[:, 2 * H:3 * H])
    b_hn_p = jnp.zeros((1, Hp), jnp.float32).at[:, 0:H].set(b_hh[:, 2 * H:3 * H])

    w_fc_p = jnp.zeros((Hp, Vp), jnp.float32).at[:H, :V].set(w_fc)
    w_fc_p = w_fc_p.astype(jnp.bfloat16)
    b_fc_p = jnp.full((1, Vp), -1e9, jnp.float32).at[:, :V].set(b_fc)

    # ---- grid: tile the batch; weights stay resident (constant index_map) ----
    TB = B if B <= 8 else 8
    assert B % TB == 0, "batch must be divisible by the batch tile"
    nb = B // TB

    kernel = functools.partial(_gru_fc_kernel, apply_softmax=apply_softmax)

    y_pad = pl.pallas_call(
        kernel,
        out_shape=jax.ShapeDtypeStruct((B * S, Vp), jnp.float32),
        grid_spec=pltpu.PrefetchScalarGridSpec(
            num_scalar_prefetch=0,
            grid=(nb,),
            in_specs=[
                pl.BlockSpec((TB * S, E), lambda i: (i, 0)),      # x (bf16)
                pl.BlockSpec((E, 3 * Hp), lambda i: (0, 0)),      # w_ih
                pl.BlockSpec((Hp, 3 * Hp), lambda i: (0, 0)),     # w_hh
                pl.BlockSpec((1, 3 * Hp), lambda i: (0, 0)),      # b_gx
                pl.BlockSpec((1, Hp), lambda i: (0, 0)),          # b_hn
                pl.BlockSpec((Hp, Vp), lambda i: (0, 0)),         # w_fc
                pl.BlockSpec((1, Vp), lambda i: (0, 0)),          # b_fc
            ],
            out_specs=pl.BlockSpec((TB * S, Vp), lambda i: (i, 0)),
            scratch_shapes=[
                pltpu.VMEM((TB, S, 3 * Hp), jnp.float32),         # gx scratch
                pltpu.VMEM((TB, S, Hp), jnp.float32),             # h_t scratch
            ],
        ),
        compiler_params=pltpu.CompilerParams(
            dimension_semantics=("parallel",)),
    )(x_emb, w_ih_p, w_hh_p, b_gx, b_hn_p, w_fc_p, b_fc_p)

    return y_pad[:, :V].reshape(B, S, V)


def init_params(key, char_vocab_size, char_embedding_size, rnn_hidden_size,
                padding_idx=0):
    """Deterministic parameter init matching the module's shapes (f32)."""
    V, E, H = char_vocab_size, char_embedding_size, rnn_hidden_size
    k_emb, k_wih, k_whh, k_bih, k_bhh, k_wfc, k_bfc = jax.random.split(key, 7)

    embedding = jax.random.normal(k_emb, (V, E), jnp.float32)
    embedding = embedding.at[padding_idx].set(0.0)

    bound = 1.0 / jnp.sqrt(jnp.float32(H))
    w_ih = jax.random.uniform(k_wih, (E, 3 * H), jnp.float32, -bound, bound)
    w_hh = jax.random.uniform(k_whh, (H, 3 * H), jnp.float32, -bound, bound)
    b_ih = jax.random.uniform(k_bih, (1, 3 * H), jnp.float32, -bound, bound)
    b_hh = jax.random.uniform(k_bhh, (1, 3 * H), jnp.float32, -bound, bound)
    w_fc = jax.random.uniform(k_wfc, (H, V), jnp.float32, -bound, bound)
    b_fc = jax.random.uniform(k_bfc, (1, V), jnp.float32, -bound, bound)

    return dict(embedding=embedding, w_ih=w_ih, w_hh=w_hh,
                b_ih=b_ih, b_hh=b_hh, w_fc=w_fc, b_fc=b_fc)


def _reference_forward(x_in, params, apply_softmax=False):
    """Pure-JAX f32 reference with PyTorch GRU semantics (no dropout)."""
    emb = params["embedding"]
    x = jnp.take(emb, x_in, axis=0)                       # (B, S, E)
    H = params["w_hh"].shape[0]
    w_ih, w_hh = params["w_ih"], params["w_hh"]
    b_ih, b_hh = params["b_ih"][0], params["b_hh"][0]
    B, S, _ = x.shape
    h = jnp.zeros((B, H), jnp.float32)
    outs = []
    for t in range(S):
        gx = x[:, t, :] @ w_ih + b_ih
        gh = h @ w_hh + b_hh
        r = jax.nn.sigmoid(gx[:, :H] + gh[:, :H])
        z = jax.nn.sigmoid(gx[:, H:2 * H] + gh[:, H:2 * H])
        n = jnp.tanh(gx[:, 2 * H:] + r * gh[:, 2 * H:])
        h = (1.0 - z) * n + z * h
        outs.append(h)
    hs = jnp.stack(outs, axis=1)                          # (B, S, H)
    logits = hs @ params["w_fc"] + params["b_fc"][0]
    if apply_softmax:
        logits = jax.nn.softmax(logits, axis=-1)
    return logits


if __name__ == "__main__":
    CHAR_VOCAB_SIZE = 30
    CHAR_EMBEDDING_SIZE = 32
    RNN_HIDDEN_SIZE = 32
    BATCH = 4
    SEQ = 8

    key = jax.random.PRNGKey(0)
    k_params, k_tokens = jax.random.split(key)

    params = init_params(k_params, CHAR_VOCAB_SIZE, CHAR_EMBEDDING_SIZE,
                         RNN_HIDDEN_SIZE)
    x_in = jax.random.randint(k_tokens, (BATCH, SEQ), 0, CHAR_VOCAB_SIZE,
                              dtype=jnp.int32)

    # Logits path
    y = surname_generation_forward(x_in, params, apply_softmax=False)
    y = jax.block_until_ready(y)
    assert y.shape == (BATCH, SEQ, CHAR_VOCAB_SIZE)
    y_ref = _reference_forward(x_in, params, apply_softmax=False)
    assert bool(jnp.allclose(y, y_ref, atol=5e-2, rtol=5e-2)), "logits mismatch"

    # Softmax path
    y_sm = surname_generation_forward(x_in, params, apply_softmax=True)
    y_sm = jax.block_until_ready(y_sm)
    assert y_sm.shape == (BATCH, SEQ, CHAR_VOCAB_SIZE)
    assert bool(jnp.allclose(y_sm.sum(-1), 1.0, atol=1e-3)), "softmax not normalized"
    y_sm_ref = _reference_forward(x_in, params, apply_softmax=True)
    assert bool(jnp.allclose(y_sm, y_sm_ref, atol=5e-2, rtol=5e-2)), "softmax mismatch"

    print("KERNEL_OK")
</pallas_src>

<mosaic_0001>
module attributes {stable_mosaic.version = 11 : i64} {
  func.func @_gru_fc_kernel(%arg0: i32, %arg1: memref<32x32xbf16, #tpu.memory_space<vmem>>, %arg2: memref<32x384xbf16, #tpu.memory_space<vmem>>, %arg3: memref<128x384xbf16, #tpu.memory_space<vmem>>, %arg4: memref<1x384xf32, #tpu.memory_space<vmem>>, %arg5: memref<1x128xf32, #tpu.memory_space<vmem>>, %arg6: memref<128x128xbf16, #tpu.memory_space<vmem>>, %arg7: memref<1x128xf32, #tpu.memory_space<vmem>>, %arg8: memref<32x128xf32, #tpu.memory_space<vmem>>, %arg9: memref<4x8x384xf32, #tpu.memory_space<vmem>>, %arg10: memref<4x8x128xf32, #tpu.memory_space<vmem>>) attributes {dimension_semantics = [#tpu.dimension_semantics<parallel>], iteration_bounds = array<i64: 1>, scalar_prefetch = 0 : i64, scratch_operands = 2 : i64, tpu.core_type = #tpu.core_type<tc>, window_params = [{transform_indices = @transform_0, window_bounds = array<i64: 32, 32>}, {pipeline_mode = #tpu.pipeline_mode<synchronous>, transform_indices = @transform_1, window_bounds = array<i64: 32, 384>}, {pipeline_mode = #tpu.pipeline_mode<synchronous>, transform_indices = @transform_2, window_bounds = array<i64: 128, 384>}, {pipeline_mode = #tpu.pipeline_mode<synchronous>, transform_indices = @transform_3, window_bounds = array<i64: 1, 384>}, {pipeline_mode = #tpu.pipeline_mode<synchronous>, transform_indices = @transform_4, window_bounds = array<i64: 1, 128>}, {pipeline_mode = #tpu.pipeline_mode<synchronous>, transform_indices = @transform_5, window_bounds = array<i64: 128, 128>}, {pipeline_mode = #tpu.pipeline_mode<synchronous>, transform_indices = @transform_6, window_bounds = array<i64: 1, 128>}, {transform_indices = @transform_7, window_bounds = array<i64: 32, 128>}]} {
    %c0 = arith.constant 0 : index
    %c0_0 = arith.constant 0 : index
    %0 = vector.load %arg1[%c0, %c0_0] : memref<32x32xbf16, #tpu.memory_space<vmem>>, vector<32x32xbf16>
    %c0_1 = arith.constant 0 : index
    %c0_2 = arith.constant 0 : index
    %1 = vector.load %arg2[%c0_1, %c0_2] : memref<32x384xbf16, #tpu.memory_space<vmem>>, vector<32x384xbf16>
    %cst = arith.constant dense<0.000000e+00> : vector<32x384xf32>
    %2 = tpu.matmul %0, %1, %cst {dimension_numbers = #tpu.dot_dimension_numbers<[1], [0], [0], [1], [0, 0, 1, 1], [], []>} : vector<32x32xbf16>, vector<32x384xbf16>, vector<32x384xf32> -> vector<32x384xf32>
    %c0_3 = arith.constant 0 : index
    %c0_4 = arith.constant 0 : index
    %3 = vector.load %arg4[%c0_3, %c0_4] : memref<1x384xf32, #tpu.memory_space<vmem>>, vector<1x384xf32>
    %4 = vector.broadcast %3 : vector<1x384xf32> to vector<32x384xf32>
    %5 = arith.addf %2, %4 : vector<32x384xf32>
    %6 = vector.shape_cast %5 : vector<32x384xf32> to vector<4x8x384xf32>
    %c0_5 = arith.constant 0 : index
    %c0_6 = arith.constant 0 : index
    %c0_7 = arith.constant 0 : index
    %7 = vector.load %arg9[%c0_5, %c0_6, %c0_7] : memref<4x8x384xf32, #tpu.memory_space<vmem>>, vector<4x8x384xf32>
    tpu.vector_store %arg9[%c0_5, %c0_6, %c0_7], %6 {strides = array<i32>} : memref<4x8x384xf32, #tpu.memory_space<vmem>>, vector<4x8x384xf32>,
    %c0_8 = arith.constant 0 : index
    %c0_9 = arith.constant 0 : index
    %8 = vector.load %arg3[%c0_8, %c0_9] : memref<128x384xbf16, #tpu.memory_space<vmem>>, vector<128x384xbf16>
    %c0_10 = arith.constant 0 : index
    %c0_11 = arith.constant 0 : index
    %9 = vector.load %arg5[%c0_10, %c0_11] : memref<1x128xf32, #tpu.memory_space<vmem>>, vector<1x128xf32>
    %cst_12 = arith.constant 0.000000e+00 : f32
    %10 = vector.broadcast %cst_12 : f32 to vector<4x128xf32>
    %11 = arith.truncf %10 : vector<4x128xf32> to vector<4x128xbf16>
    %cst_13 = arith.constant dense<0.000000e+00> : vector<4x384xf32>
    %12 = tpu.matmul %11, %8, %cst_13 {dimension_numbers = #tpu.dot_dimension_numbers<[1], [0], [0], [1], [0, 0, 1, 1], [], []>} : vector<4x128xbf16>, vector<128x384xbf16>, vector<4x384xf32> -> vector<4x384xf32>
    %c0_14 = arith.constant 0 : index
    %c0_15 = arith.constant 0 : index
    %c0_16 = arith.constant 0 : index
    %13 = vector.load %arg9[%c0_14, %c0_15, %c0_16] : memref<4x8x384xf32, #tpu.memory_space<vmem>>, vector<4x1x384xf32>
    %14 = vector.shape_cast %13 : vector<4x1x384xf32> to vector<4x384xf32>
    %15 = vector.extract_strided_slice %14 {offsets = [0, 0], sizes = [4, 128], strides = [1, 1]} : vector<4x384xf32> to vector<4x128xf32>
    %16 = vector.extract_strided_slice %12 {offsets = [0, 0], sizes = [4, 128], strides = [1, 1]} : vector<4x384xf32> to vector<4x128xf32>
    %17 = arith.addf %15, %16 : vector<4x128xf32>
    %18 = arith.negf %17 : vector<4x128xf32>
    %19 = math.exp %18 : vector<4x128xf32>
    %cst_17 = arith.constant 1.000000e+00 : f32
    %20 = vector.broadcast %cst_17 : f32 to vector<4x128xf32>
    %21 = arith.addf %20, %19 : vector<4x128xf32>
    %22 = arith.divf %20, %21 : vector<4x128xf32>
    %23 = vector.extract_strided_slice %14 {offsets = [0, 128], sizes = [4, 128], strides = [1, 1]} : vector<4x384xf32> to vector<4x128xf32>
    %24 = vector.extract_strided_slice %12 {offsets = [0, 128], sizes = [4, 128], strides = [1, 1]} : vector<4x384xf32> to vector<4x128xf32>
    %25 = arith.addf %23, %24 : vector<4x128xf32>
    %26 = arith.negf %25 : vector<4x128xf32>
    %27 = math.exp %26 : vector<4x128xf32>
    %cst_18 = arith.constant 1.000000e+00 : f32
    %28 = vector.broadcast %cst_18 : f32 to vector<4x128xf32>
    %29 = arith.addf %28, %27 : vector<4x128xf32>
    %30 = arith.divf %28, %29 : vector<4x128xf32>
    %31 = vector.extract_strided_slice %14 {offsets = [0, 256], sizes = [4, 128], strides = [1, 1]} : vector<4x384xf32> to vector<4x128xf32>
    %32 = vector.extract_strided_slice %12 {offsets = [0, 256], sizes = [4, 128], strides = [1, 1]} : vector<4x384xf32> to vector<4x128xf32>
    %33 = vector.broadcast %9 : vector<1x128xf32> to vector<4x128xf32>
    %34 = arith.addf %32, %33 : vector<4x128xf32>
    %35 = arith.mulf %22, %34 : vector<4x128xf32>
    %36 = arith.addf %31, %35 : vector<4x128xf32>
    %37 = math.tanh %36 : vector<4x128xf32>
    %cst_19 = arith.constant 1.000000e+00 : f32
    %38 = vector.broadcast %cst_19 : f32 to vector<4x128xf32>
    %39 = arith.subf %38, %30 : vector<4x128xf32>
    %40 = arith.mulf %39, %37 : vector<4x128xf32>
    %41 = arith.mulf %30, %10 : vector<4x128xf32>
    %42 = arith.addf %40, %41 : vector<4x128xf32>
    %c0_20 = arith.constant 0 : index
    %c0_21 = arith.constant 0 : index
    %c0_22 = arith.constant 0 : index
    %43 = vector.load %arg10[%c0_20, %c0_21, %c0_22] : memref<4x8x128xf32, #tpu.memory_space<vmem>>, vector<4x1x128xf32>
    %44 = vector.shape_cast %43 : vector<4x1x128xf32> to vector<4x128xf32>
    %45 = vector.shape_cast %42 : vector<4x128xf32> to vector<4x1x128xf32>
    tpu.vector_store %arg10[%c0_20, %c0_21, %c0_22], %45 {strides = array<i32>} : memref<4x8x128xf32, #tpu.memory_space<vmem>>, vector<4x1x128xf32>,
    %46 = arith.truncf %42 : vector<4x128xf32> to vector<4x128xbf16>
    %cst_23 = arith.constant dense<0.000000e+00> : vector<4x384xf32>
    %47 = tpu.matmul %46, %8, %cst_23 {dimension_numbers = #tpu.dot_dimension_numbers<[1], [0], [0], [1], [0, 0, 1, 1], [], []>} : vector<4x128xbf16>, vector<128x384xbf16>, vector<4x384xf32> -> vector<4x384xf32>
    %c0_24 = arith.constant 0 : index
    %c1 = arith.constant 1 : index
    %c0_25 = arith.constant 0 : index
    %48 = vector.load %arg9[%c0_24, %c1, %c0_25] : memref<4x8x384xf32, #tpu.memory_space<vmem>>, vector<4x1x384xf32>
    %49 = vector.shape_cast %48 : vector<4x1x384xf32> to vector<4x384xf32>
    %50 = vector.extract_strided_slice %49 {offsets = [0, 0], sizes = [4, 128], strides = [1, 1]} : vector<4x384xf32> to vector<4x128xf32>
    %51 = vector.extract_strided_slice %47 {offsets = [0, 0], sizes = [4, 128], strides = [1, 1]} : vector<4x384xf32> to vector<4x128xf32>
    %52 = arith.addf %50, %51 : vector<4x128xf32>
    %53 = arith.negf %52 : vector<4x128xf32>
    %54 = math.exp %53 : vector<4x128xf32>
    %cst_26 = arith.constant 1.000000e+00 : f32
    %55 = vector.broadcast %cst_26 : f32 to vector<4x128xf32>
    %56 = arith.addf %55, %54 : vector<4x128xf32>
    %57 = arith.divf %55, %56 : vector<4x128xf32>
    %58 = vector.extract_strided_slice %49 {offsets = [0, 128], sizes = [4, 128], strides = [1, 1]} : vector<4x384xf32> to vector<4x128xf32>
    %59 = vector.extract_strided_slice %47 {offsets = [0, 128], sizes = [4, 128], strides = [1, 1]} : vector<4x384xf32> to vector<4x128xf32>
    %60 = arith.addf %58, %59 : vector<4x128xf32>
    %61 = arith.negf %60 : vector<4x128xf32>
    %62 = math.exp %61 : vector<4x128xf32>
    %cst_27 = arith.constant 1.000000e+00 : f32
    %63 = vector.broadcast %cst_27 : f32 to vector<4x128xf32>
    %64 = arith.addf %63, %62 : vector<4x128xf32>
    %65 = arith.divf %63, %64 : vector<4x128xf32>
    %66 = vector.extract_strided_slice %49 {offsets = [0, 256], sizes = [4, 128], strides = [1, 1]} : vector<4x384xf32> to vector<4x128xf32>
    %67 = vector.extract_strided_slice %47 {offsets = [0, 256], sizes = [4, 128], strides = [1, 1]} : vector<4x384xf32> to vector<4x128xf32>
    %68 = vector.broadcast %9 : vector<1x128xf32> to vector<4x128xf32>
    %69 = arith.addf %67, %68 : vector<4x128xf32>
    %70 = arith.mulf %57, %69 : vector<4x128xf32>
    %71 = arith.addf %66, %70 : vector<4x128xf32>
    %72 = math.tanh %71 : vector<4x128xf32>
    %cst_28 = arith.constant 1.000000e+00 : f32
    %73 = vector.broadcast %cst_28 : f32 to vector<4x128xf32>
    %74 = arith.subf %73, %65 : vector<4x128xf32>
    %75 = arith.mulf %74, %72 : vector<4x128xf32>
    %76 = arith.mulf %65, %42 : vector<4x128xf32>
    %77 = arith.addf %75, %76 : vector<4x128xf32>
    %c0_29 = arith.constant 0 : index
    %c1_30 = arith.constant 1 : index
    %c0_31 = arith.constant 0 : index
    %78 = vector.load %arg10[%c0_29, %c1_30, %c0_31] : memref<4x8x128xf32, #tpu.memory_space<vmem>>, vector<4x1x128xf32>
    %79 = vector.shape_cast %78 : vector<4x1x128xf32> to vector<4x128xf32>
    %80 = vector.shape_cast %77 : vector<4x128xf32> to vector<4x1x128xf32>
    tpu.vector_store %arg10[%c0_29, %c1_30, %c0_31], %80 {strides = array<i32>} : memref<4x8x128xf32, #tpu.memory_space<vmem>>, vector<4x1x128xf32>,
    %81 = arith.truncf %77 : vector<4x128xf32> to vector<4x128xbf16>
    %cst_32 = arith.constant dense<0.000000e+00> : vector<4x384xf32>
    %82 = tpu.matmul %81, %8, %cst_32 {dimension_numbers = #tpu.dot_dimension_numbers<[1], [0], [0], [1], [0, 0, 1, 1], [], []>} : vector<4x128xbf16>, vector<128x384xbf16>, vector<4x384xf32> -> vector<4x384xf32>
    %c0_33 = arith.constant 0 : index
    %c2 = arith.constant 2 : index
    %c0_34 = arith.constant 0 : index
    %83 = vector.load %arg9[%c0_33, %c2, %c0_34] : memref<4x8x384xf32, #tpu.memory_space<vmem>>, vector<4x1x384xf32>
    %84 = vector.shape_cast %83 : vector<4x1x384xf32> to vector<4x384xf32>
    %85 = vector.extract_strided_slice %84 {offsets = [0, 0], sizes = [4, 128], strides = [1, 1]} : vector<4x384xf32> to vector<4x128xf32>
    %86 = vector.extract_strided_slice %82 {offsets = [0, 0], sizes = [4, 128], strides = [1, 1]} : vector<4x384xf32> to vector<4x128xf32>
    %87 = arith.addf %85, %86 : vector<4x128xf32>
    %88 = arith.negf %87 : vector<4x128xf32>
    %89 = math.exp %88 : vector<4x128xf32>
    %cst_35 = arith.constant 1.000000e+00 : f32
    %90 = vector.broadcast %cst_35 : f32 to vector<4x128xf32>
    %91 = arith.addf %90, %89 : vector<4x128xf32>
    %92 = arith.divf %90, %91 : vector<4x128xf32>
    %93 = vector.extract_strided_slice %84 {offsets = [0, 128], sizes = [4, 128], strides = [1, 1]} : vector<4x384xf32> to vector<4x128xf32>
    %94 = vector.extract_strided_slice %82 {offsets = [0, 128], sizes = [4, 128], strides = [1, 1]} : vector<4x384xf32> to vector<4x128xf32>
    %95 = arith.addf %93, %94 : vector<4x128xf32>
    %96 = arith.negf %95 : vector<4x128xf32>
    %97 = math.exp %96 : vector<4x128xf32>
    %cst_36 = arith.constant 1.000000e+00 : f32
    %98 = vector.broadcast %cst_36 : f32 to vector<4x128xf32>
    %99 = arith.addf %98, %97 : vector<4x128xf32>
    %100 = arith.divf %98, %99 : vector<4x128xf32>
    %101 = vector.extract_strided_slice %84 {offsets = [0, 256], sizes = [4, 128], strides = [1, 1]} : vector<4x384xf32> to vector<4x128xf32>
    %102 = vector.extract_strided_slice %82 {offsets = [0, 256], sizes = [4, 128], strides = [1, 1]} : vector<4x384xf32> to vector<4x128xf32>
    %103 = vector.broadcast %9 : vector<1x128xf32> to vector<4x128xf32>
    %104 = arith.addf %102, %103 : vector<4x128xf32>
    %105 = arith.mulf %92, %104 : vector<4x128xf32>
    %106 = arith.addf %101, %105 : vector<4x128xf32>
    %107 = math.tanh %106 : vector<4x128xf32>
    %cst_37 = arith.constant 1.000000e+00 : f32
    %108 = vector.broadcast %cst_37 : f32 to vector<4x128xf32>
    %109 = arith.subf %108, %100 : vector<4x128xf32>
    %110 = arith.mulf %109, %107 : vector<4x128xf32>
    %111 = arith.mulf %100, %77 : vector<4x128xf32>
    %112 = arith.addf %110, %111 : vector<4x128xf32>
    %c0_38 = arith.constant 0 : index
    %c2_39 = arith.constant 2 : index
    %c0_40 = arith.constant 0 : index
    %113 = vector.load %arg10[%c0_38, %c2_39, %c0_40] : memref<4x8x128xf32, #tpu.memory_space<vmem>>, vector<4x1x128xf32>
    %114 = vector.shape_cast %113 : vector<4x1x128xf32> to vector<4x128xf32>
    %115 = vector.shape_cast %112 : vector<4x128xf32> to vector<4x1x128xf32>
    tpu.vector_store %arg10[%c0_38, %c2_39, %c0_40], %115 {strides = array<i32>} : memref<4x8x128xf32, #tpu.memory_space<vmem>>, vector<4x1x128xf32>,
    %116 = arith.truncf %112 : vector<4x128xf32> to vector<4x128xbf16>
    %cst_41 = arith.constant dense<0.000000e+00> : vector<4x384xf32>
    %117 = tpu.matmul %116, %8, %cst_41 {dimension_numbers = #tpu.dot_dimension_numbers<[1], [0], [0], [1], [0, 0, 1, 1], [], []>} : vector<4x128xbf16>, vector<128x384xbf16>, vector<4x384xf32> -> vector<4x384xf32>
    %c0_42 = arith.constant 0 : index
    %c3 = arith.constant 3 : index
    %c0_43 = arith.constant 0 : index
    %118 = vector.load %arg9[%c0_42, %c3, %c0_43] : memref<4x8x384xf32, #tpu.memory_space<vmem>>, vector<4x1x384xf32>
    %119 = vector.shape_cast %118 : vector<4x1x384xf32> to vector<4x384xf32>
    %120 = vector.extract_strided_slice %119 {offsets = [0, 0], sizes = [4, 128], strides = [1, 1]} : vector<4x384xf32> to vector<4x128xf32>
    %121 = vector.extract_strided_slice %117 {offsets = [0, 0], sizes = [4, 128], strides = [1, 1]} : vector<4x384xf32> to vector<4x128xf32>
    %122 = arith.addf %120, %121 : vector<4x128xf32>
    %123 = arith.negf %122 : vector<4x128xf32>
    %124 = math.exp %123 : vector<4x128xf32>
    %cst_44 = arith.constant 1.000000e+00 : f32
    %125 = vector.broadcast %cst_44 : f32 to vector<4x128xf32>
    %126 = arith.addf %125, %124 : vector<4x128xf32>
    %127 = arith.divf %125, %126 : vector<4x128xf32>
    %128 = vector.extract_strided_slice %119 {offsets = [0, 128], sizes = [4, 128], strides = [1, 1]} : vector<4x384xf32> to vector<4x128xf32>
    %129 = vector.extract_strided_slice %117 {offsets = [0, 128], sizes = [4, 128], strides = [1, 1]} : vector<4x384xf32> to vector<4x128xf32>
    %130 = arith.addf %128, %129 : vector<4x128xf32>
    %131 = arith.negf %130 : vector<4x128xf32>
    %132 = math.exp %131 : vector<4x128xf32>
    %cst_45 = arith.constant 1.000000e+00 : f32
    %133 = vector.broadcast %cst_45 : f32 to vector<4x128xf32>
    %134 = arith.addf %133, %132 : vector<4x128xf32>
    %135 = arith.divf %133, %134 : vector<4x128xf32>
    %136 = vector.extract_strided_slice %119 {offsets = [0, 256], sizes = [4, 128], strides = [1, 1]} : vector<4x384xf32> to vector<4x128xf32>
    %137 = vector.extract_strided_slice %117 {offsets = [0, 256], sizes = [4, 128], strides = [1, 1]} : vector<4x384xf32> to vector<4x128xf32>
    %138 = vector.broadcast %9 : vector<1x128xf32> to vector<4x128xf32>
    %139 = arith.addf %137, %138 : vector<4x128xf32>
    %140 = arith.mulf %127, %139 : vector<4x128xf32>
    %141 = arith.addf %136, %140 : vector<4x128xf32>
    %142 = math.tanh %141 : vector<4x128xf32>
    %cst_46 = arith.constant 1.000000e+00 : f32
    %143 = vector.broadcast %cst_46 : f32 to vector<4x128xf32>
    %144 = arith.subf %143, %135 : vector<4x128xf32>
    %145 = arith.mulf %144, %142 : vector<4x128xf32>
    %146 = arith.mulf %135, %112 : vector<4x128xf32>
    %147 = arith.addf %145, %146 : vector<4x128xf32>
    %c0_47 = arith.constant 0 : index
    %c3_48 = arith.constant 3 : index
    %c0_49 = arith.constant 0 : index
    %148 = vector.load %arg10[%c0_47, %c3_48, %c0_49] : memref<4x8x128xf32, #tpu.memory_space<vmem>>, vector<4x1x128xf32>
    %149 = vector.shape_cast %148 : vector<4x1x128xf32> to vector<4x128xf32>
    %150 = vector.shape_cast %147 : vector<4x128xf32> to vector<4x1x128xf32>
    tpu.vector_store %arg10[%c0_47, %c3_48, %c0_49], %150 {strides = array<i32>} : memref<4x8x128xf32, #tpu.memory_space<vmem>>, vector<4x1x128xf32>,
    %151 = arith.truncf %147 : vector<4x128xf32> to vector<4x128xbf16>
    %cst_50 = arith.constant dense<0.000000e+00> : vector<4x384xf32>
    %152 = tpu.matmul %151, %8, %cst_50 {dimension_numbers = #tpu.dot_dimension_numbers<[1], [0], [0], [1], [0, 0, 1, 1], [], []>} : vector<4x128xbf16>, vector<128x384xbf16>, vector<4x384xf32> -> vector<4x384xf32>
    %c0_51 = arith.constant 0 : index
    %c4 = arith.constant 4 : index
    %c0_52 = arith.constant 0 : index
    %153 = vector.load %arg9[%c0_51, %c4, %c0_52] : memref<4x8x384xf32, #tpu.memory_space<vmem>>, vector<4x1x384xf32>
    %154 = vector.shape_cast %153 : vector<4x1x384xf32> to vector<4x384xf32>
    %155 = vector.extract_strided_slice %154 {offsets = [0, 0], sizes = [4, 128], strides = [1, 1]} : vector<4x384xf32> to vector<4x128xf32>
    %156 = vector.extract_strided_slice %152 {offsets = [0, 0], sizes = [4, 128], strides = [1, 1]} : vector<4x384xf32> to vector<4x128xf32>
    %157 = arith.addf %155, %156 : vector<4x128xf32>
    %158 = arith.negf %157 : vector<4x128xf32>
    %159 = math.exp %158 : vector<4x128xf32>
    %cst_53 = arith.constant 1.000000e+00 : f32
    %160 = vector.broadcast %cst_53 : f32 to vector<4x128xf32>
    %161 = arith.addf %160, %159 : vector<4x128xf32>
    %162 = arith.divf %160, %161 : vector<4x128xf32>
    %163 = vector.extract_strided_slice %154 {offsets = [0, 128], sizes = [4, 128], strides = [1, 1]} : vector<4x384xf32> to vector<4x128xf32>
    %164 = vector.extract_strided_slice %152 {offsets = [0, 128], sizes = [4, 128], strides = [1, 1]} : vector<4x384xf32> to vector<4x128xf32>
    %165 = arith.addf %163, %164 : vector<4x128xf32>
    %166 = arith.negf %165 : vector<4x128xf32>
    %167 = math.exp %166 : vector<4x128xf32>
    %cst_54 = arith.constant 1.000000e+00 : f32
    %168 = vector.broadcast %cst_54 : f32 to vector<4x128xf32>
    %169 = arith.addf %168, %167 : vector<4x128xf32>
    %170 = arith.divf %168, %169 : vector<4x128xf32>
    %171 = vector.extract_strided_slice %154 {offsets = [0, 256], sizes = [4, 128], strides = [1, 1]} : vector<4x384xf32> to vector<4x128xf32>
    %172 = vector.extract_strided_slice %152 {offsets = [0, 256], sizes = [4, 128], strides = [1, 1]} : vector<4x384xf32> to vector<4x128xf32>
    %173 = vector.broadcast %9 : vector<1x128xf32> to vector<4x128xf32>
    %174 = arith.addf %172, %173 : vector<4x128xf32>
    %175 = arith.mulf %162, %174 : vector<4x128xf32>
    %176 = arith.addf %171, %175 : vector<4x128xf32>
    %177 = math.tanh %176 : vector<4x128xf32>
    %cst_55 = arith.constant 1.000000e+00 : f32
    %178 = vector.broadcast %cst_55 : f32 to vector<4x128xf32>
    %179 = arith.subf %178, %170 : vector<4x128xf32>
    %180 = arith.mulf %179, %177 : vector<4x128xf32>
    %181 = arith.mulf %170, %147 : vector<4x128xf32>
    %182 = arith.addf %180, %181 : vector<4x128xf32>
    %c0_56 = arith.constant 0 : index
    %c4_57 = arith.constant 4 : index
    %c0_58 = arith.constant 0 : index
    %183 = vector.load %arg10[%c0_56, %c4_57, %c0_58] : memref<4x8x128xf32, #tpu.memory_space<vmem>>, vector<4x1x128xf32>
    %184 = vector.shape_cast %183 : vector<4x1x128xf32> to vector<4x128xf32>
    %185 = vector.shape_cast %182 : vector<4x128xf32> to vector<4x1x128xf32>
    tpu.vector_store %arg10[%c0_56, %c4_57, %c0_58], %185 {strides = array<i32>} : memref<4x8x128xf32, #tpu.memory_space<vmem>>, vector<4x1x128xf32>,
    %186 = arith.truncf %182 : vector<4x128xf32> to vector<4x128xbf16>
    %cst_59 = arith.constant dense<0.000000e+00> : vector<4x384xf32>
    %187 = tpu.matmul %186, %8, %cst_59 {dimension_numbers = #tpu.dot_dimension_numbers<[1], [0], [0], [1], [0, 0, 1, 1], [], []>} : vector<4x128xbf16>, vector<128x384xbf16>, vector<4x384xf32> -> vector<4x384xf32>
    %c0_60 = arith.constant 0 : index
    %c5 = arith.constant 5 : index
    %c0_61 = arith.constant 0 : index
    %188 = vector.load %arg9[%c0_60, %c5, %c0_61] : memref<4x8x384xf32, #tpu.memory_space<vmem>>, vector<4x1x384xf32>
    %189 = vector.shape_cast %188 : vector<4x1x384xf32> to vector<4x384xf32>
    %190 = vector.extract_strided_slice %189 {offsets = [0, 0], sizes = [4, 128], strides = [1, 1]} : vector<4x384xf32> to vector<4x128xf32>
    %191 = vector.extract_strided_slice %187 {offsets = [0, 0], sizes = [4, 128], strides = [1, 1]} : vector<4x384xf32> to vector<4x128xf32>
    %192 = arith.addf %190, %191 : vector<4x128xf32>
    %193 = arith.negf %192 : vector<4x128xf32>
    %194 = math.exp %193 : vector<4x128xf32>
    %cst_62 = arith.constant 1.000000e+00 : f32
    %195 = vector.broadcast %cst_62 : f32 to vector<4x128xf32>
    %196 = arith.addf %195, %194 : vector<4x128xf32>
    %197 = arith.divf %195, %196 : vector<4x128xf32>
    %198 = vector.extract_strided_slice %189 {offsets = [0, 128], sizes = [4, 128], strides = [1, 1]} : vector<4x384xf32> to vector<4x128xf32>
    %199 = vector.extract_strided_slice %187 {offsets = [0, 128], sizes = [4, 128], strides = [1, 1]} : vector<4x384xf32> to vector<4x128xf32>
    %200 = arith.addf %198, %199 : vector<4x128xf32>
    %201 = arith.negf %200 : vector<4x128xf32>
    %202 = math.exp %201 : vector<4x128xf32>
    %cst_63 = arith.constant 1.000000e+00 : f32
    %203 = vector.broadcast %cst_63 : f32 to vector<4x128xf32>
    %204 = arith.addf %203, %202 : vector<4x128xf32>
    %205 = arith.divf %203, %204 : vector<4x128xf32>
    %206 = vector.extract_strided_slice %189 {offsets = [0, 256], sizes = [4, 128], strides = [1, 1]} : vector<4x384xf32> to vector<4x128xf32>
    %207 = vector.extract_strided_slice %187 {offsets = [0, 256], sizes = [4, 128], strides = [1, 1]} : vector<4x384xf32> to vector<4x128xf32>
    %208 = vector.broadcast %9 : vector<1x128xf32> to vector<4x128xf32>
    %209 = arith.addf %207, %208 : vector<4x128xf32>
    %210 = arith.mulf %197, %209 : vector<4x128xf32>
    %211 = arith.addf %206, %210 : vector<4x128xf32>
    %212 = math.tanh %211 : vector<4x128xf32>
    %cst_64 = arith.constant 1.000000e+00 : f32
    %213 = vector.broadcast %cst_64 : f32 to vector<4x128xf32>
    %214 = arith.subf %213, %205 : vector<4x128xf32>
    %215 = arith.mulf %214, %212 : vector<4x128xf32>
    %216 = arith.mulf %205, %182 : vector<4x128xf32>
    %217 = arith.addf %215, %216 : vector<4x128xf32>
    %c0_65 = arith.constant 0 : index
    %c5_66 = arith.constant 5 : index
    %c0_67 = arith.constant 0 : index
    %218 = vector.load %arg10[%c0_65, %c5_66, %c0_67] : memref<4x8x128xf32, #tpu.memory_space<vmem>>, vector<4x1x128xf32>
    %219 = vector.shape_cast %218 : vector<4x1x128xf32> to vector<4x128xf32>
    %220 = vector.shape_cast %217 : vector<4x128xf32> to vector<4x1x128xf32>
    tpu.vector_store %arg10[%c0_65, %c5_66, %c0_67], %220 {strides = array<i32>} : memref<4x8x128xf32, #tpu.memory_space<vmem>>, vector<4x1x128xf32>,
    %221 = arith.truncf %217 : vector<4x128xf32> to vector<4x128xbf16>
    %cst_68 = arith.constant dense<0.000000e+00> : vector<4x384xf32>
    %222 = tpu.matmul %221, %8, %cst_68 {dimension_numbers = #tpu.dot_dimension_numbers<[1], [0], [0], [1], [0, 0, 1, 1], [], []>} : vector<4x128xbf16>, vector<128x384xbf16>, vector<4x384xf32> -> vector<4x384xf32>
    %c0_69 = arith.constant 0 : index
    %c6 = arith.constant 6 : index
    %c0_70 = arith.constant 0 : index
    %223 = vector.load %arg9[%c0_69, %c6, %c0_70] : memref<4x8x384xf32, #tpu.memory_space<vmem>>, vector<4x1x384xf32>
    %224 = vector.shape_cast %223 : vector<4x1x384xf32> to vector<4x384xf32>
    %225 = vector.extract_strided_slice %224 {offsets = [0, 0], sizes = [4, 128], strides = [1, 1]} : vector<4x384xf32> to vector<4x128xf32>
    %226 = vector.extract_strided_slice %222 {offsets = [0, 0], sizes = [4, 128], strides = [1, 1]} : vector<4x384xf32> to vector<4x128xf32>
    %227 = arith.addf %225, %226 : vector<4x128xf32>
    %228 = arith.negf %227 : vector<4x128xf32>
    %229 = math.exp %228 : vector<4x128xf32>
    %cst_71 = arith.constant 1.000000e+00 : f32
    %230 = vector.broadcast %cst_71 : f32 to vector<4x128xf32>
    %231 = arith.addf %230, %229 : vector<4x128xf32>
    %232 = arith.divf %230, %231 : vector<4x128xf32>
    %233 = vector.extract_strided_slice %224 {offsets = [0, 128], sizes = [4, 128], strides = [1, 1]} : vector<4x384xf32> to vector<4x128xf32>
    %234 = vector.extract_strided_slice %222 {offsets = [0, 128], sizes = [4, 128], strides = [1, 1]} : vector<4x384xf32> to vector<4x128xf32>
    %235 = arith.addf %233, %234 : vector<4x128xf32>
    %236 = arith.negf %235 : vector<4x128xf32>
    %237 = math.exp %236 : vector<4x128xf32>
    %cst_72 = arith.constant 1.000000e+00 : f32
    %238 = vector.broadcast %cst_72 : f32 to vector<4x128xf32>
    %239 = arith.addf %238, %237 : vector<4x128xf32>
    %240 = arith.divf %238, %239 : vector<4x128xf32>
    %241 = vector.extract_strided_slice %224 {offsets = [0, 256], sizes = [4, 128], strides = [1, 1]} : vector<4x384xf32> to vector<4x128xf32>
    %242 = vector.extract_strided_slice %222 {offsets = [0, 256], sizes = [4, 128], strides = [1, 1]} : vector<4x384xf32> to vector<4x128xf32>
    %243 = vector.broadcast %9 : vector<1x128xf32> to vector<4x128xf32>
    %244 = arith.addf %242, %243 : vector<4x128xf32>
    %245 = arith.mulf %232, %244 : vector<4x128xf32>
    %246 = arith.addf %241, %245 : vector<4x128xf32>
    %247 = math.tanh %246 : vector<4x128xf32>
    %cst_73 = arith.constant 1.000000e+00 : f32
    %248 = vector.broadcast %cst_73 : f32 to vector<4x128xf32>
    %249 = arith.subf %248, %240 : vector<4x128xf32>
    %250 = arith.mulf %249, %247 : vector<4x128xf32>
    %251 = arith.mulf %240, %217 : vector<4x128xf32>
    %252 = arith.addf %250, %251 : vector<4x128xf32>
    %c0_74 = arith.constant 0 : index
    %c6_75 = arith.constant 6 : index
    %c0_76 = arith.constant 0 : index
    %253 = vector.load %arg10[%c0_74, %c6_75, %c0_76] : memref<4x8x128xf32, #tpu.memory_space<vmem>>, vector<4x1x128xf32>
    %254 = vector.shape_cast %253 : vector<4x1x128xf32> to vector<4x128xf32>
    %255 = vector.shape_cast %252 : vector<4x128xf32> to vector<4x1x128xf32>
    tpu.vector_store %arg10[%c0_74, %c6_75, %c0_76], %255 {strides = array<i32>} : memref<4x8x128xf32, #tpu.memory_space<vmem>>, vector<4x1x128xf32>,
    %256 = arith.truncf %252 : vector<4x128xf32> to vector<4x128xbf16>
    %cst_77 = arith.constant dense<0.000000e+00> : vector<4x384xf32>
    %257 = tpu.matmul %256, %8, %cst_77 {dimension_numbers = #tpu.dot_dimension_numbers<[1], [0], [0], [1], [0, 0, 1, 1], [], []>} : vector<4x128xbf16>, vector<128x384xbf16>, vector<4x384xf32> -> vector<4x384xf32>
    %c0_78 = arith.constant 0 : index
    %c7 = arith.constant 7 : index
    %c0_79 = arith.constant 0 : index
    %258 = vector.load %arg9[%c0_78, %c7, %c0_79] : memref<4x8x384xf32, #tpu.memory_space<vmem>>, vector<4x1x384xf32>
    %259 = vector.shape_cast %258 : vector<4x1x384xf32> to vector<4x384xf32>
    %260 = vector.extract_strided_slice %259 {offsets = [0, 0], sizes = [4, 128], strides = [1, 1]} : vector<4x384xf32> to vector<4x128xf32>
    %261 = vector.extract_strided_slice %257 {offsets = [0, 0], sizes = [4, 128], strides = [1, 1]} : vector<4x384xf32> to vector<4x128xf32>
    %262 = arith.addf %260, %261 : vector<4x128xf32>
    %263 = arith.negf %262 : vector<4x128xf32>
    %264 = math.exp %263 : vector<4x128xf32>
    %cst_80 = arith.constant 1.000000e+00 : f32
    %265 = vector.broadcast %cst_80 : f32 to vector<4x128xf32>
    %266 = arith.addf %265, %264 : vector<4x128xf32>
    %267 = arith.divf %265, %266 : vector<4x128xf32>
    %268 = vector.extract_strided_slice %259 {offsets = [0, 128], sizes = [4, 128], strides = [1, 1]} : vector<4x384xf32> to vector<4x128xf32>
    %269 = vector.extract_strided_slice %257 {offsets = [0, 128], sizes = [4, 128], strides = [1, 1]} : vector<4x384xf32> to vector<4x128xf32>
    %270 = arith.addf %268, %269 : vector<4x128xf32>
    %271 = arith.negf %270 : vector<4x128xf32>
    %272 = math.exp %271 : vector<4x128xf32>
    %cst_81 = arith.constant 1.000000e+00 : f32
    %273 = vector.broadcast %cst_81 : f32 to vector<4x128xf32>
    %274 = arith.addf %273, %272 : vector<4x128xf32>
    %275 = arith.divf %273, %274 : vector<4x128xf32>
    %276 = vector.extract_strided_slice %259 {offsets = [0, 256], sizes = [4, 128], strides = [1, 1]} : vector<4x384xf32> to vector<4x128xf32>
    %277 = vector.extract_strided_slice %257 {offsets = [0, 256], sizes = [4, 128], strides = [1, 1]} : vector<4x384xf32> to vector<4x128xf32>
    %278 = vector.broadcast %9 : vector<1x128xf32> to vector<4x128xf32>
    %279 = arith.addf %277, %278 : vector<4x128xf32>
    %280 = arith.mulf %267, %279 : vector<4x128xf32>
    %281 = arith.addf %276, %280 : vector<4x128xf32>
    %282 = math.tanh %281 : vector<4x128xf32>
    %cst_82 = arith.constant 1.000000e+00 : f32
    %283 = vector.broadcast %cst_82 : f32 to vector<4x128xf32>
    %284 = arith.subf %283, %275 : vector<4x128xf32>
    %285 = arith.mulf %284, %282 : vector<4x128xf32>
    %286 = arith.mulf %275, %252 : vector<4x128xf32>
    %287 = arith.addf %285, %286 : vector<4x128xf32>
    %c0_83 = arith.constant 0 : index
    %c7_84 = arith.constant 7 : index
    %c0_85 = arith.constant 0 : index
    %288 = vector.load %arg10[%c0_83, %c7_84, %c0_85] : memref<4x8x128xf32, #tpu.memory_space<vmem>>, vector<4x1x128xf32>
    %289 = vector.shape_cast %288 : vector<4x1x128xf32> to vector<4x128xf32>
    %290 = vector.shape_cast %287 : vector<4x128xf32> to vector<4x1x128xf32>
    tpu.vector_store %arg10[%c0_83, %c7_84, %c0_85], %290 {strides = array<i32>} : memref<4x8x128xf32, #tpu.memory_space<vmem>>, vector<4x1x128xf32>,
    %c0_86 = arith.constant 0 : index
    %c0_87 = arith.constant 0 : index
    %c0_88 = arith.constant 0 : index
    %291 = vector.load %arg10[%c0_86, %c0_87, %c0_88] : memref<4x8x128xf32, #tpu.memory_space<vmem>>, vector<4x8x128xf32>
    %292 = vector.shape_cast %291 : vector<4x8x128xf32> to vector<32x128xf32>
    %293 = arith.truncf %292 : vector<32x128xf32> to vector<32x128xbf16>
    %c0_89 = arith.constant 0 : index
    %c0_90 = arith.constant 0 : index
    %294 = vector.load %arg6[%c0_89, %c0_90] : memref<128x128xbf16, #tpu.memory_space<vmem>>, vector<128x128xbf16>
    %cst_91 = arith.constant dense<0.000000e+00> : vector<32x128xf32>
    %295 = tpu.matmul %293, %294, %cst_91 {dimension_numbers = #tpu.dot_dimension_numbers<[1], [0], [0], [1], [0, 0, 1, 1], [], []>} : vector<32x128xbf16>, vector<128x128xbf16>, vector<32x128xf32> -> vector<32x128xf32>
    %c0_92 = arith.constant 0 : index
    %c0_93 = arith.constant 0 : index
    %296 = vector.load %arg7[%c0_92, %c0_93] : memref<1x128xf32, #tpu.memory_space<vmem>>, vector<1x128xf32>
    %297 = vector.broadcast %296 : vector<1x128xf32> to vector<32x128xf32>
    %298 = arith.addf %295, %297 : vector<32x128xf32>
    %c0_94 = arith.constant 0 : index
    %c0_95 = arith.constant 0 : index
    %299 = vector.load %arg8[%c0_94, %c0_95] : memref<32x128xf32, #tpu.memory_space<vmem>>, vector<32x128xf32>
    tpu.vector_store %arg8[%c0_94, %c0_95], %298 {strides = array<i32>} : memref<32x128xf32, #tpu.memory_space<vmem>>, vector<32x128xf32>,
    return
  }
  func.func @transform_0(%arg0: i32) -> (i32, i32) {
    %c0_i32 = arith.constant 0 : i32
    %c0_i32_0 = arith.constant 0 : i32
    return %arg0, %c0_i32 : i32, i32
  }
  func.func @transform_1(%arg0: i32) -> (i32, i32) {
    %c0_i32 = arith.constant 0 : i32
    %c0_i32_0 = arith.constant 0 : i32
    %c0_i32_1 = arith.constant 0 : i32
    return %c0_i32, %c0_i32_0 : i32, i32
  }
  func.func @transform_2(%arg0: i32) -> (i32, i32) {
    %c0_i32 = arith.constant 0 : i32
    %c0_i32_0 = arith.constant 0 : i32
    %c0_i32_1 = arith.constant 0 : i32
    return %c0_i32, %c0_i32_0 : i32, i32
  }
  func.func @transform_3(%arg0: i32) -> (i32, i32) {
    %c0_i32 = arith.constant 0 : i32
    %c0_i32_0 = arith.constant 0 : i32
    %c0_i32_1 = arith.constant 0 : i32
    return %c0_i32, %c0_i32_0 : i32, i32
  }
  func.func @transform_4(%arg0: i32) -> (i32, i32) {
    %c0_i32 = arith.constant 0 : i32
    %c0_i32_0 = arith.constant 0 : i32
    %c0_i32_1 = arith.constant 0 : i32
    return %c0_i32, %c0_i32_0 : i32, i32
  }
  func.func @transform_5(%arg0: i32) -> (i32, i32) {
    %c0_i32 = arith.constant 0 : i32
    %c0_i32_0 = arith.constant 0 : i32
    %c0_i32_1 = arith.constant 0 : i32
    return %c0_i32, %c0_i32_0 : i32, i32
  }
  func.func @transform_6(%arg0: i32) -> (i32, i32) {
    %c0_i32 = arith.constant 0 : i32
    %c0_i32_0 = arith.constant 0 : i32
    %c0_i32_1 = arith.constant 0 : i32
    return %c0_i32, %c0_i32_0 : i32, i32
  }
  func.func @transform_7(%arg0: i32) -> (i32, i32) {
    %c0_i32 = arith.constant 0 : i32
    %c0_i32_0 = arith.constant 0 : i32
    return %arg0, %c0_i32 : i32, i32
  }
}

</mosaic_0001>

<bundles_post_ra>
// kernel: tpu_custom_call.1
= control target key start
LH: loop header
LB: loop body
LE: loop exit
PB: predicated region body
PF: predicated region fallthrough
CT: control target
= control target key end

     0   :  { %12 = vsyncpa [#allocation5], 0  ;;  %s4926_s0 = inlined_call_operand.hbm [shape: bf16[32,32], index: 0, kind: input, shape index: {}]   ;;  %s4927_s1 = inlined_call_operand.hbm [shape: bf16[32,384], index: 1, kind: input, shape index: {}]   ;;  %s4928_s2 = inlined_call_operand.hbm [shape: bf16[128,384], index: 2, kind: input, shape index: {}]   ;;  %s4929_s3 = inlined_call_operand.vmem [shape: f32[1,384], index: 3, kind: input, shape index: {}]   ;;  %s4930_s4 = inlined_call_operand.vmem [shape: f32[1,128], index: 4, kind: input, shape index: {}]   ;;  %s4931_s5 = inlined_call_operand.hbm [shape: bf16[128,128], index: 5, kind: input, shape index: {}]   ;;  %s4932_s6 = inlined_call_operand.vmem [shape: f32[1,128], index: 6, kind: input, shape index: {}]   ;;  %s4933_s7 = inlined_call_operand.hbm [shape: f32[32,128], index: 7, kind: output, shape index: {}]  }
   0x1   :  { %13 = vsyncpa [#allocation8], 0 }
   0x2   :  { %14 = vsyncpa [#allocation11], 0 }
   0x3   :  { %15 = vsyncpa [#allocation6], 0  ;;  %s3950_s24 = smov [#allocation7]   ;;  %s3832_s28 = scalar_lea.hbm %s4927_s1, 768 }
   0x4   :  { %s33_s25 = sshll.u32 %s3950_s24, 4  ;;  %p3833_p0 = scmp.ne.s32.totalorder %s4927_s1, %s3832_s28  ;;  %s34_s25 = int_to_ptr.vmem [resolvable:$true] %s33_s25 }
   0x5   :  { %p3836_p1 = scmp.lt.u32.totalorder %s3832_s28, %s4927_s1 }
   0x7   :  { %p3838_p2 = pnand %p3836_p1, %p3833_p0 }
   0x9   :  { %3841 = shalt.err (!%p3838_p2)
}
   0xa   :  { %s3842_s10 = scalar_lea.vmem %s34_s25, 768  ;;  %p3847_p4 = scmp.lt.s32.totalorder %s34_s25, %s34_s25 }
   0xb   :  { %p3843_p3 = scmp.ne.s32.totalorder %s34_s25, %s3842_s10  ;;  %p3848_p5 = scmp.lt.s32.totalorder %s3842_s10, %s3842_s10 }
   0xd   :  { %p3849_p6 = por %p3848_p5, %p3847_p4 }
   0xf   :  { %p3850_p7 = pnand %p3849_p6, %p3843_p3 }
  0x11   :  { %3853 = shalt.err (!%p3850_p7)
}
  0x12   :  { %s3951_s11 = smov 192   ;;  %s3952_s12 = smov 12  }
  0x13   :  { %39 = dma.hbm_to_vmem [thread:$0]  %s4927_s1, 768, %s34_s25, [#allocation8], %s3951_s11, %s3951_s11, %s3952_s12  }
  0x14   :  { %s3953_s15 = smov [#allocation4]   ;;  %s3854_s19 = scalar_lea.hbm %s4926_s0, 256 }
  0x15   :  { %s21_s16 = sshll.u32 %s3953_s15, 4  ;;  %p3855_p8 = scmp.ne.s32.totalorder %s4926_s0, %s3854_s19  ;;  %s22_s16 = int_to_ptr.vmem [resolvable:$true] %s21_s16 }
  0x16   :  { %p3858_p9 = scmp.lt.u32.totalorder %s3854_s19, %s4926_s0 }
  0x18   :  { %p3860_p10 = pnand %p3858_p9, %p3855_p8 }
  0x1a   :  { %3863 = shalt.err (!%p3860_p10)
}
  0x1b   :  { %s3864_s24 = scalar_lea.vmem %s22_s16, 256  ;;  %p3869_p12 = scmp.lt.s32.totalorder %s22_s16, %s22_s16 }
  0x1c   :  { %p3865_p11 = scmp.ne.s32.totalorder %s22_s16, %s3864_s24  ;;  %p3870_p13 = scmp.lt.s32.totalorder %s3864_s24, %s3864_s24 }
  0x1e   :  { %p3871_p0 = por %p3870_p13, %p3869_p12 }
  0x20   :  { %p3872_p1 = pnand %p3871_p0, %p3865_p11 }
  0x22   :  { %3875 = shalt.err (!%p3872_p1)
}
  0x23   :  { %s3954_s1 = smov 64   ;;  %s3955_s25 = smov 4  }
  0x24   :  { %27 = dma.hbm_to_vmem [thread:$0]  %s4926_s0, 256, %s22_s16, [#allocation5], %s3954_s1, %s3954_s1, %s3955_s25  }
  0x25   :  { %s3956_s28 = smov [#allocation9]   ;;  %s3957_s30 = smov [#allocation10]  }
  0x26   :  { %s45_s29 = sshll.u32 %s3956_s28, 4  ;;  %s61_s8 = sshll.u32 %s3957_s30, 4  ;;  %s46_s29 = int_to_ptr.vmem [resolvable:$true] %s45_s29  ;;  %s4035_s8 = int_to_ptr.vmem [resolvable:$true] %s61_s8 }
  0x27   :  { %s3876_s13 = scalar_lea.hbm %s4928_s2, 3072 }
  0x28   :  { %p3877_p2 = scmp.ne.s32.totalorder %s4928_s2, %s3876_s13  ;;  %p3880_p3 = scmp.lt.u32.totalorder %s3876_s13, %s4928_s2 }
  0x2a   :  { %p3882_p4 = pnand %p3880_p3, %p3877_p2 }
  0x2c   :  { %3885 = shalt.err (!%p3882_p4)
}
  0x2d   :  { %s3886_s0 = scalar_lea.vmem %s46_s29, 3072  ;;  %p3891_p6 = scmp.lt.s32.totalorder %s46_s29, %s46_s29 }
  0x2e   :  { %p3887_p5 = scmp.ne.s32.totalorder %s46_s29, %s3886_s0  ;;  %p3892_p7 = scmp.lt.s32.totalorder %s3886_s0, %s3886_s0 }
  0x30   :  { %p3893_p8 = por %p3892_p7, %p3891_p6 }
  0x32   :  { %p3894_p9 = pnand %p3893_p8, %p3887_p5 }
  0x34   :  { %3897 = shalt.err (!%p3894_p9)
}
  0x35   :  { %51 = dma.hbm_to_vmem [thread:$0]  %s4928_s2, 3072, %s46_s29, [#allocation8], %s3951_s11, %s3951_s11, %s3952_s12  }
  0x36   :  { %s3898_s22 = scalar_lea.hbm %s4931_s5, 1024 }
  0x37   :  { %p3899_p10 = scmp.ne.s32.totalorder %s4931_s5, %s3898_s22  ;;  %p3902_p11 = scmp.lt.u32.totalorder %s3898_s22, %s4931_s5 }
  0x39   :  { %p3904_p12 = pnand %p3902_p11, %p3899_p10 }
  0x3b   :  { %3907 = shalt.err (!%p3904_p12)
}
  0x3c   :  { %s3908_s28 = scalar_lea.vmem %s4035_s8, 1024  ;;  %p3913_p0 = scmp.lt.s32.totalorder %s4035_s8, %s4035_s8 }
  0x3d   :  { %p3909_p13 = scmp.ne.s32.totalorder %s4035_s8, %s3908_s28  ;;  %p3914_p1 = scmp.lt.s32.totalorder %s3908_s28, %s3908_s28 }
  0x3f   :  { %p3915_p2 = por %p3914_p1, %p3913_p0 }
  0x41   :  { %p3916_p3 = pnand %p3915_p2, %p3909_p13 }
  0x43   :  { %3919 = shalt.err (!%p3916_p3)
}
  0x44   :  { %67 = dma.hbm_to_vmem [thread:$0]  %s4931_s5, 1024, %s4035_s8, [#allocation11], %s3954_s1, %s3954_s1, %s3955_s25  }
  0x45   :  { %3942 = dma.done.wait [#allocation5], 256  }
  0x46   :  { %3943 = vsyncadd [#allocation5], 4294967040 }
  0x47   :  { %3944 = dma.done.wait [#allocation8], 3840  }
  0x48   :  { %3945 = vsyncadd [#allocation8], 4294963456 }
  0x49   :  { %3946 = dma.done.wait [#allocation11], 1024  }
  0x4a   :  { %3947 = vsyncadd [#allocation11], 4294966272  ;;  %v3958_v0 = vmov 0   ;;  %v3412_v1 = vld [vmem:[#allocation7 + $0x4] ss:$12 sps:$4 sm:$0xff]   ;;  %vm154_vm0 = vcmask 261120   ;;  %v97_v34 = vlaneseq }
  0x4b   :  { %193 = vmatprep.mubr.bf16.mxu1 %v3958_v0  ;;  %468 = vmatprep.mubr.bf16.mxu0 %v3958_v0  ;;  %v4074_v2 = vld [vmem:[#allocation9 + $0x4] ss:$12 sps:$4 sm:$0xff]   ;;  %v4076_v4 = vld [vmem:[#allocation9] ss:$12 sps:$4 sm:$0xff]   ;;  %v4080_v6 = vld [vmem:[#allocation9 + $0x1c] ss:$12 sps:$4 sm:$0xff]  }
  0x4c   :  { %161 = vmatprep.subr.bf16.mxu1 %v3412_v1  ;;  %v3416_v3 = vld [vmem:[#allocation7] ss:$12 sps:$4 sm:$0xff]   ;;  %436 = vmatprep.subr.bf16.mxu0 %v4074_v2  ;;  %v3418_v5 = vld [vmem:[#allocation7 + $0x1c] ss:$12 sps:$4 sm:$0xff]   ;;  %v3422_v7 = vld [vmem:[#allocation7 + $0x18] ss:$12 sps:$4 sm:$0xff]  }
  0x4d   :  { %162 = vmatpush1.bf16.msra.mxu1 %v3416_v3  ;;  %437 = vmatpush1.bf16.msra.mxu0 %v4076_v4  ;;  %v4082_v8 = vld [vmem:[#allocation9 + $0x18] ss:$12 sps:$4 sm:$0xff]   ;;  %v4086_v11 = vld [vmem:[#allocation9 + $0x34] ss:$12 sps:$4 sm:$0xff]   ;;  %v4088_v12 = vld [vmem:[#allocation9 + $0x30] ss:$12 sps:$4 sm:$0xff]  }
  0x4e   :  { %163 = vmatprep.subr.bf16.mxu1 %v3418_v5  ;;  %438 = vmatprep.subr.bf16.mxu0 %v4080_v6  ;;  %v3424_v9 = vld [vmem:[#allocation4] sm:$0xff]   ;;  %v4090_v13 = vld [vmem:[#allocation9 + $0x4c] ss:$12 sps:$4 sm:$0xff]   ;;  %v3433_v14 = vld [vmem:[#allocation7 + $0x20] ss:$12 sps:$4 sm:$0xff]   ;;  %v3959_v20 = vmov 0.0  }
  0x4f   :  { %v3425_v10 = vld [vmem:[#allocation7 + $0x8] ss:$12 sps:$4 sm:$0xff]   ;;  %v4095_v15 = vld [vmem:[#allocation9 + $0x48] ss:$12 sps:$4 sm:$0xff]   ;;  %v4102_v18 = vld [vmem:[#allocation9 + $0x60] ss:$12 sps:$4 sm:$0xff]  }
  0x50   :  { %v4099_v16 = vld [vmem:[#allocation9 + $0x64] ss:$12 sps:$4 sm:$0xff]   ;;  %v3432_v17 = vld [vmem:[#allocation4 + $0x8] sm:$0xff]   ;;  %v4114_v22 = vld [vmem:[#allocation9 + $0x94] ss:$12 sps:$4 sm:$0xff]   ;;  %vm3960_vm1 = vmmov 0  }
  0x51   :  { %164 = vmatpush1.bf16.msra.mxu1 %v3422_v7  ;;  %439 = vmatpush1.bf16.msra.mxu0 %v4082_v8  ;;  %v4105_v19 = vld [vmem:[#allocation9 + $0x7c] ss:$12 sps:$4 sm:$0xff]   ;;  %v4110_v21 = vld [vmem:[#allocation9 + $0x78] ss:$12 sps:$4 sm:$0xff]   ;;  %v4124_v26 = vld [vmem:[#allocation9 + $0x20] ss:$12 sps:$4 sm:$0xff]  }
  0x52   :  { %3209 = vmatprep.subr.bf16.mxu1 %v3425_v10  ;;  %440 = vmatprep.subr.bf16.mxu0 %v4086_v11  ;;  %v4116_v23 = vld [vmem:[#allocation9 + $0x8] ss:$12 sps:$4 sm:$0xff]   ;;  %v4119_v24 = vld [vmem:[#allocation9 + $0x90] ss:$12 sps:$4 sm:$0xff]   ;;  %v4122_v25 = vld [vmem:[#allocation9 + $0xac] ss:$12 sps:$4 sm:$0xff]  }
  0x53   :  { %v4126_v27 = vld [vmem:[#allocation9 + $0xa8] ss:$12 sps:$4 sm:$0xff]   ;;  %v4137_v28 = vld [vmem:[#allocation9 + $0x38] ss:$12 sps:$4 sm:$0xff]   ;;  %v4143_v29 = vld [vmem:[#allocation9 + $0x50] ss:$12 sps:$4 sm:$0xff]  }
  0x54   :  { %3021 = vmatmul.mubr.msk.bf16.vlgmr.msra.gmra.mrb[0].mxu1 %vm154_vm0, %v3424_v9  ;;  %v4150_v30 = vld [vmem:[#allocation9 + $0x68] ss:$12 sps:$4 sm:$0xff]   ;;  %v4156_v31 = vld [vmem:[#allocation9 + $0x80] ss:$12 sps:$4 sm:$0xff]   ;;  %v4162_v32 = vld [vmem:[#allocation9 + $0x98] ss:$12 sps:$4 sm:$0xff]  }
  0x55   :  { %3210 = vmatpush3.bf16.msra.mxu1 %v3425_v10  ;;  %441 = vmatpush1.bf16.msra.mxu0 %v4088_v12  ;;  %v4168_v33 = vld [vmem:[#allocation9 + $0xb0] ss:$12 sps:$4 sm:$0xff]   ;;  %v98_v35 = vshrl.u32 %v97_v34, 7  ;;  %v95_v37 = vld [vmem:[%s4929_s3] sm:$0x7]  ;;  %vm739_vm2 = vcmask 1041409  }
  0x56   :  { %442 = vmatprep.subr.bf16.mxu0 %v4090_v13  ;;  %203 = vmatprep.mubr.bf16.mxu1 %v3958_v0  ;;  %v3961_v58 = vmov 1966171168   ;;  %vm742_vm3 = vcmask 1042434   ;;  %vm745_vm4 = vcmask 1043459   ;;  %s3962_s10 = smov [#allocation12]  }
  0x57   :  { %3211 = vmatprep.subr.bf16.mxu1 %v3433_v14  ;;  %v99_v36 = vsub.s32 0, %v98_v35  ;;  %v103_v38 = vsub.s32 1, %v98_v35  ;;  %v107_v52 = vsub.s32 2, %v98_v35  ;;  %v526_v59 = vunpack.c.l.s4 %v3961_v58  ;;  %s2999_s13 = sshll.u32 %s3962_s10, 4  ;;  %s3000_s13 = int_to_ptr.vmem [resolvable:$true] %s2999_s13 }
  0x58   :  { %s3920_s14 = scalar_lea.vmem %s3000_s13, 512  ;;  %p3925_p5 = scmp.lt.s32.totalorder %s3000_s13, %s3000_s13 }
  0x59   :  { %443 = vmatpush1.bf16.msra.mxu0 %v4095_v15  ;;  %3212 = vmatpush3.bf16.msra.mxu1 %v3433_v14  ;;  %v100_v39 = vrot.slane %v95_v37, %v99_v36  ;;  %v104_v40 = vrot.slane %v95_v37, %v103_v38  ;;  %v108_v60 = vrot.slane %v95_v37, %v107_v52  ;;  %v527_v62 = vunpack.c.0.s8 %v526_v59  ;;  %p3921_p4 = scmp.ne.s32.totalorder %s3000_s13, %s3920_s14  ;;  %p3926_p6 = scmp.lt.s32.totalorder %s3920_s14, %s3920_s14 }
  0x5a   :  { %444 = vmatprep.subr.bf16.mxu0 %v4099_v16  ;;  %3217 = vmatprep.subr.bf16.mxu1 %v3959_v20 }
  0x5b   :  { %v4203_v14 = vsub.s32 %v527_v62, %v98_v35  ;;  %p3927_p7 = por %p3926_p6, %p3925_p5 }
  0x5c   :  { %3022 = vmatmul.mubr.msk.bf16.gmra.mrb[4].mxu1 %vm154_vm0, %v3432_v17 }
  0x5d   :  { %445 = vmatpush1.bf16.msra.mxu0 %v4102_v18  ;;  %3213 = vmatprep.mubr.msk.bf16.mxu1 %vm154_vm0, %v3424_v9  ;;  %p3928_p8 = pnand %p3927_p7, %p3921_p4 }
  0x5e   :  { %446 = vmatprep.subr.bf16.mxu0 %v4105_v19 }
  0x61   :  { %447 = vmatpush1.bf16.msra.mxu0 %v4110_v21 }
  0x62   :  { %448 = vmatprep.subr.bf16.mxu0 %v4114_v22 }
  0x64   :  { %3214 = vmatmul.mubr.msk.bf16.vlgmr.msra.gmra.mrb[8].mxu1 %vm154_vm0, %v3432_v17 }
  0x65   :  { %3218 = vmatpush3.bf16.msra.mxu1 %v4116_v23  ;;  %449 = vmatpush1.bf16.msra.mxu0 %v4119_v24 }
  0x66   :  { %3219 = vmatprep.subr.bf16.mxu1 %v3959_v20  ;;  %450 = vmatprep.subr.bf16.mxu0 %v4122_v25 }
  0x67   :  { %3233 = vmatprep.mubr.msk.bf16.mxu1 %vm3960_vm1, %v3959_v20 }
  0x69   :  { %3220 = vmatpush3.bf16.msra.mxu1 %v4124_v26  ;;  %451 = vmatpush1.bf16.msra.mxu0 %v4126_v27 }
  0x6a   :  { %3221 = vmatprep.subr.bf16.mxu1 %v3959_v20  ;;  %749 = vmatprep.subr.bf16.mxu0 %v4074_v2 }
  0x6c   :  { %469 = vmatmul.mubr.bf16.vlgmr.msra.gmra.mrb[0].mxu0 %v3958_v0 }
  0x6d   :  { %3222 = vmatpush3.bf16.msra.mxu1 %v4137_v28  ;;  %750 = vmatpush1.bf16.msra.mxu0 %v4076_v4 }
  0x6e   :  { %3223 = vmatprep.subr.bf16.mxu1 %v3959_v20  ;;  %751 = vmatprep.subr.bf16.mxu0 %v4080_v6 }
  0x6f   :  { %781 = vmatprep.mubr.bf16.mxu0 %v3958_v0 }
  0x71   :  { %3224 = vmatpush3.bf16.msra.mxu1 %v4143_v29  ;;  %752 = vmatpush1.bf16.msra.mxu0 %v4082_v8 }
  0x72   :  { %3225 = vmatprep.subr.bf16.mxu1 %v3959_v20  ;;  %753 = vmatprep.subr.bf16.mxu0 %v4086_v11 }
  0x75   :  { %3226 = vmatpush3.bf16.msra.mxu1 %v4150_v30  ;;  %754 = vmatpush1.bf16.msra.mxu0 %v4088_v12 }
  0x76   :  { %3227 = vmatprep.subr.bf16.mxu1 %v3959_v20  ;;  %755 = vmatprep.subr.bf16.mxu0 %v4090_v13 }
  0x79   :  { %3228 = vmatpush3.bf16.msra.mxu1 %v4156_v31  ;;  %756 = vmatpush1.bf16.msra.mxu0 %v4095_v15 }
  0x7a   :  { %3229 = vmatprep.subr.bf16.mxu1 %v3959_v20  ;;  %757 = vmatprep.subr.bf16.mxu0 %v4099_v16 }
  0x7d   :  { %3230 = vmatpush3.bf16.msra.mxu1 %v4162_v32  ;;  %758 = vmatpush1.bf16.msra.mxu0 %v4102_v18 }
  0x7e   :  { %3231 = vmatprep.subr.bf16.mxu1 %v3959_v20  ;;  %759 = vmatprep.subr.bf16.mxu0 %v4105_v19 }
  0x81   :  { %3232 = vmatpush3.bf16.msra.mxu1 %v4168_v33  ;;  %760 = vmatpush1.bf16.msra.mxu0 %v4110_v21 }
  0x82   :  { %3237 = vmatprep.subr.bf16.mxu1 %v3959_v20  ;;  %761 = vmatprep.subr.bf16.mxu0 %v4114_v22 }
  0x84   :  { %3234 = vmatmul.mubr.bf16.vlgmr.msra.gmra.mrb[12].mxu1 %v3958_v0 }
  0x85   :  { %3238 = vmatpush3.bf16.msra.mxu1 %v4116_v23  ;;  %762 = vmatpush1.bf16.msra.mxu0 %v4119_v24 }
  0x86   :  { %3239 = vmatprep.subr.bf16.mxu1 %v3959_v20  ;;  %763 = vmatprep.subr.bf16.mxu0 %v4122_v25 }
  0x87   :  { %3253 = vmatprep.mubr.msk.bf16.mxu1 %vm3960_vm1, %v3959_v20 }
  0x89   :  { %3240 = vmatpush3.bf16.msra.mxu1 %v4124_v26  ;;  %764 = vmatpush1.bf16.msra.mxu0 %v4126_v27 }
  0x8a   :  { %3241 = vmatprep.subr.bf16.mxu1 %v3959_v20  ;;  %1054 = vmatprep.subr.bf16.mxu0 %v4074_v2 }
  0x8d   :  { %3242 = vmatpush3.bf16.msra.mxu1 %v4137_v28 }
  0x8e   :  { %3243 = vmatprep.subr.bf16.mxu1 %v3959_v20 }
  0x91   :  { %3244 = vmatpush3.bf16.msra.mxu1 %v4143_v29 }
  0x92   :  { %3245 = vmatprep.subr.bf16.mxu1 %v3959_v20 }
  0x95   :  { %3246 = vmatpush3.bf16.msra.mxu1 %v4150_v30 }
  0x96   :  { %3247 = vmatprep.subr.bf16.mxu1 %v3959_v20 }
  0x99   :  { %3248 = vmatpush3.bf16.msra.mxu1 %v4156_v31 }
  0x9a   :  { %3249 = vmatprep.subr.bf16.mxu1 %v3959_v20 }
  0x9d   :  { %3250 = vmatpush3.bf16.msra.mxu1 %v4162_v32 }
  0x9e   :  { %3251 = vmatprep.subr.bf16.mxu1 %v3959_v20 }
  0xa1   :  { %3252 = vmatpush3.bf16.msra.mxu1 %v4168_v33 }
  0xa2   :  { %3257 = vmatprep.subr.bf16.mxu1 %v3959_v20 }
 0x127   :  { %v195_v41 = vpop.f32.mrb[0].mxu1 }
 0x128   :  { %v196_v42 = vadd.f32 %v195_v41, %v100_v39  ;;  %v197_v43 = vpop.f32.mrb[1].mxu1 }
 0x129   :  { %v198_v44 = vadd.f32 %v197_v43, %v104_v40  ;;  %v199_v45 = vpop.f32.mrb[2].mxu1 }
 0x12a   :  { %263 = vst [vmem:[#allocation2] sm:$0xff] %v196_v42  ;;  %v200_v46 = vadd.f32 %v199_v45, %v100_v39  ;;  %v201_v47 = vpop.f32.mrb[3].mxu1 }
 0x12b   :  { %264 = vst [vmem:[#allocation2 + $0x8] sm:$0xff] %v198_v44  ;;  %v202_v48 = vadd.f32 %v201_v47, %v104_v40 }
 0x12c   :  { %266 = vst [vmem:[#allocation2 + $0x18] sm:$0xff] %v200_v46 }
 0x12d   :  { %267 = vst [vmem:[#allocation2 + $0x20] sm:$0xff] %v202_v48 }
 0x12f   :  { %v205_v49 = vpop.f32.mrb[4].mxu1 }
 0x130   :  { %v206_v50 = vadd.f32 %v205_v49, %v100_v39  ;;  %v207_v51 = vpop.f32.mrb[5].mxu1 }
 0x131   :  { %v208_v53 = vadd.f32 %v207_v51, %v104_v40  ;;  %v209_v54 = vpop.f32.mrb[6].mxu1 }
 0x132   :  { %269 = vst [vmem:[#allocation2 + $0x30] sm:$0xff] %v206_v50  ;;  %v210_v55 = vadd.f32 %v209_v54, %v100_v39  ;;  %v211_v56 = vpop.f32.mrb[7].mxu1 }
 0x133   :  { %270 = vst [vmem:[#allocation2 + $0x38] sm:$0xff] %v208_v53  ;;  %v212_v57 = vadd.f32 %v211_v56, %v104_v40 }
 0x134   :  { %272 = vst [vmem:[#allocation2 + $0x48] sm:$0xff] %v210_v55 }
 0x135   :  { %273 = vst [vmem:[#allocation2 + $0x50] sm:$0xff] %v212_v57 }
 0x137   :  { %v3215_v61 = vpop.f32.mrb[8].mxu1 }
 0x138   :  { %v257_v63 = vadd.f32 %v3215_v61, %v108_v60  ;;  %v248_v1 = vpop.f32.mrb[9].mxu1 }
 0x139   :  { %v249_v3 = vadd.f32 %v248_v1, %v108_v60  ;;  %v3216_v5 = vpop.f32.mrb[10].mxu1 }
 0x13a   :  { %271 = vst [vmem:[#allocation2 + $0x40] sm:$0xff] %v257_v63  ;;  %v260_v7 = vadd.f32 %v3216_v5, %v108_v60  ;;  %v251_v9 = vpop.f32.mrb[11].mxu1 }
 0x13b   :  { %265 = vst [vmem:[#allocation2 + $0x10] sm:$0xff] %v249_v3  ;;  %v252_v10 = vadd.f32 %v251_v9, %v108_v60 }
 0x13c   :  { %274 = vst [vmem:[#allocation2 + $0x58] sm:$0xff] %v260_v7 }
 0x13d   :  { %268 = vst [vmem:[#allocation2 + $0x28] sm:$0xff] %v252_v10 }
 0x13f   :  { %v470_v17 = vpop.f32.mrb[0].mxu0 }
 0x140   :  { %v531_v34 = vrot.slane %v470_v17, %v4203_v14  ;;  %v472_v36 = vpop.f32.mrb[1].mxu0 }
 0x141   :  { %v4206_v37 = vld [vmem:[#allocation2 + $0x30] ss:$8 sm:$0x7]  ;;  %v600_v38 = vrot.slane %v472_v36, %v4203_v14  ;;  %v474_v39 = vpop.f32.mrb[2].mxu0 }
 0x142   :  { %v4209_v40 = vld [vmem:[#allocation2] ss:$8 sm:$0x7]  ;;  %v532_v41 = vcombine.high %v531_v34, %v531_v34  ;;  %v539_v42 = vrot.slane %v531_v34, %v4203_v14  ;;  %v475_v43 = vpop.f32.mrb[3].mxu0  ;;  %v587_v52 = vrot.slane %v4206_v37, 1 }
 0x143   :  { %v4212_v44 = vld [vmem:[#allocation2 + $0x48] ss:$8 sm:$0x7]  ;;  %v585_v35 = vrot.slane %v4209_v40, 1  ;;  %v601_v45 = vcombine.high %v600_v38, %v600_v38  ;;  %v608_v46 = vrot.slane %v600_v38, %v4203_v14 }
 0x144   :  { %v4216_v47 = vld [vmem:[#allocation2 + $0x18] ss:$8 sm:$0x7]  ;;  %v546_v48 = vrot.slane %v532_v41, %v4203_v14  ;;  %v547_v49 = vcombine.high %v539_v42, %v539_v42  ;;  %v553_v50 = vadd.f32 %v539_v42, %v4209_v40  ;;  %v588_v53 = vrot.slane %v4212_v44, 1 }
 0x145   :  { %v586_v51 = vrot.slane %v4216_v47, 1  ;;  %v615_v54 = vrot.slane %v601_v45, %v4203_v14  ;;  %v616_v59 = vcombine.high %v608_v46, %v608_v46  ;;  %v622_v61 = vadd.f32 %v608_v46, %v585_v35  ;;  %v4230_v35 = vld [vmem:[%s4930_s4] ss:$0 sm:$0xff] }
 0x146   :  { %v548_v55 = vcombine.high %v546_v48, %v546_v48  ;;  %v554_v56 = vadd.f32 %v546_v48, %v4216_v47  ;;  %v555_v57 = vadd.f32 %v547_v49, %v4206_v37  ;;  %v3049_v58 = vmul.f32 -1.442695, %v553_v50 }
 0x147   :  { %v617_v60 = vcombine.high %v615_v54, %v615_v54  ;;  %v623_v62 = vadd.f32 %v615_v54, %v586_v51  ;;  %v624_v5 = vadd.f32 %v616_v59, %v587_v52  ;;  %v3053_v10 = vmul.f32 -1.442695, %v622_v61 }
 0x148   :  { %v556_v63 = vadd.f32 %v548_v55, %v4212_v44  ;;  %3462 = vpow2.f32 %v3049_v58  ;;  %v3050_v1 = vmul.f32 -1.442695, %v554_v56  ;;  %v3051_v3 = vmul.f32 -1.442695, %v555_v57 }
 0x149   :  { %v625_v9 = vadd.f32 %v617_v60, %v588_v53  ;;  %v3054_v17 = vmul.f32 -1.442695, %v623_v62  ;;  %v3055_v34 = vmul.f32 -1.442695, %v624_v5 }
 0x14a   :  { %3464 = vpow2.f32 %v3050_v1  ;;  %v3052_v7 = vmul.f32 -1.442695, %v556_v63 }
 0x14b   :  { %3466 = vpow2.f32 %v3051_v3  ;;  %v3056_v36 = vmul.f32 -1.442695, %v625_v9  ;;  %v690_v9 = vrot.slane %v4209_v40, 2 }
 0x14c   :  { %3468 = vpow2.f32 %v3052_v7 }
 0x14d   :  { %3470 = vpow2.f32 %v3053_v10 }
 0x14e   :  { %3472 = vpow2.f32 %v3054_v17 }
 0x14f   :  { %3474 = vpow2.f32 %v3055_v34 }
 0x150   :  { %3476 = vpow2.f32 %v3056_v36 }
 0x152   :  { %v3463_v38 = vpop.eup %3462 }
 0x153   :  { %v569_v39 = vadd.f32 1.0, %v3463_v38  ;;  %v691_v38 = vrot.slane %v4216_v47, 2 }
 0x154   :  { %v3465_v41 = vpop.eup %3464 }
 0x155   :  { %v3467_v42 = vpop.eup %3466  ;;  %v570_v43 = vadd.f32 1.0, %v3465_v41  ;;  %3478 = vrcp.f32 %v569_v39 }
 0x156   :  { %v3469_v45 = vpop.eup %3468  ;;  %v571_v46 = vadd.f32 1.0, %v3467_v42 }
 0x157   :  { %v572_v48 = vadd.f32 1.0, %v3469_v45  ;;  %3480 = vrcp.f32 %v570_v43  ;;  %v511_v49 = vpop.f32.mrb[12].mxu1  ;;  %v3471_v52 = vpop.eup %3470  ;;  %v692_v43 = vrot.slane %v4206_v37, 2 }
 0x158   :  { %3482 = vrcp.f32 %v571_v46  ;;  %v656_v50 = vadd.f32 %v4230_v35, %v511_v49  ;;  %v3235_v51 = vpop.f32.mrb[13].mxu1  ;;  %v3473_v54 = vpop.eup %3472  ;;  %v638_v59 = vadd.f32 1.0, %v3471_v52  ;;  %v693_v46 = vrot.slane %v4212_v44, 2 }
 0x159   :  { %3484 = vrcp.f32 %v572_v48  ;;  %v514_v53 = vpop.f32.mrb[14].mxu1  ;;  %v3475_v57 = vpop.eup %3474  ;;  %v639_v62 = vadd.f32 1.0, %v3473_v54 }
 0x15a   :  { %v664_v55 = vrot.slane %v656_v50, %v4203_v14  ;;  %v3236_v56 = vpop.f32.mrb[15].mxu1  ;;  %v3477_v58 = vpop.eup %3476  ;;  %v640_v63 = vadd.f32 1.0, %v3475_v57  ;;  %3486 = vrcp.f32 %v638_v59 }
 0x15b   :  { %v641_v5 = vadd.f32 1.0, %v3477_v58  ;;  %3488 = vrcp.f32 %v639_v62 }
 0x15c   :  { %v665_v60 = vcombine.high %v664_v55, %v664_v55  ;;  %v672_v61 = vrot.slane %v664_v55, %v4203_v14  ;;  %3490 = vrcp.f32 %v640_v63 }
 0x15d   :  { %3492 = vrcp.f32 %v641_v5 }
 0x15e   :  { %v679_v1 = vrot.slane %v665_v60, %v4203_v14  ;;  %v680_v7 = vcombine.high %v672_v61, %v672_v61 }
 0x15f   :  { %v3479_v3 = vpop.eup %3478 }
 0x160   :  { %v681_v10 = vcombine.high %v679_v1, %v679_v1  ;;  %v686_v17 = vmul.f32 %v3479_v3, %v672_v61 }
 0x161   :  { %v3481_v34 = vpop.eup %3480 }
 0x162   :  { %v3483_v36 = vpop.eup %3482  ;;  %v687_v39 = vmul.f32 %v3481_v34, %v679_v1  ;;  %v698_v41 = vadd.f32 %v690_v9, %v686_v17 }
 0x163   :  { %v3485_v42 = vpop.eup %3484  ;;  %v688_v45 = vmul.f32 %v3483_v36, %v680_v7 }
 0x164   :  { %v689_v48 = vmul.f32 %v3485_v42, %v681_v10  ;;  %v699_v40 = vadd.f32 %v691_v38, %v687_v39  ;;  %3494 = vtanh.f32 %v698_v41  ;;  %v3487_v51 = vpop.eup %3486 }
 0x165   :  { %v700_v49 = vadd.f32 %v692_v43, %v688_v45  ;;  %v3489_v47 = vpop.eup %3488  ;;  %v706_v54 = vsub.f32 1.0, %v3487_v51  ;;  %v714_v37 = vmul.f32 0.0, %v3487_v51 }
 0x166   :  { %v701_v50 = vadd.f32 %v693_v46, %v689_v48  ;;  %3496 = vtanh.f32 %v699_v40  ;;  %v3491_v52 = vpop.eup %3490  ;;  %v707_v56 = vsub.f32 1.0, %v3489_v47  ;;  %v715_v60 = vmul.f32 0.0, %v3489_v47 }
 0x167   :  { %3498 = vtanh.f32 %v700_v49  ;;  %v3493_v53 = vpop.eup %3492  ;;  %v708_v59 = vsub.f32 1.0, %v3491_v52  ;;  %v716_v3 = vmul.f32 0.0, %v3491_v52 }
 0x168   :  { %3500 = vtanh.f32 %v701_v50  ;;  %v709_v62 = vsub.f32 1.0, %v3493_v53  ;;  %v717_v9 = vmul.f32 0.0, %v3493_v53  ;;  %v4304_v53 = vld [vmem:[#allocation2 + $0x31] ss:$8 sm:$0x7] }
 0x16e   :  { %v3495_v55 = vpop.eup %3494 }
 0x16f   :  { %v710_v57 = vmul.f32 %v3495_v55, %v706_v54 }
 0x170   :  { %v3497_v58 = vpop.eup %3496 }
 0x171   :  { %v3499_v44 = vpop.eup %3498  ;;  %v711_v61 = vmul.f32 %v3497_v58, %v707_v56  ;;  %v4240_v63 = vadd.f32 %v714_v37, %v710_v57  ;;  %v4308_v58 = vld [vmem:[#allocation2 + $0x49] ss:$8 sm:$0x7] }
 0x172   :  { %v3501_v1 = vpop.eup %3500  ;;  %v712_v5 = vmul.f32 %v3499_v44, %v708_v59 }
 0x173   :  { %v713_v7 = vmul.f32 %v3501_v1, %v709_v62  ;;  %v4242_v10 = vadd.f32 %v715_v60, %v711_v61  ;;  %722 = vst [vmem:[#allocation3] sm:$0x1] %v4240_v63  ;;  %v726_v36 = vpack.c.bf16 %v4240_v63, %v4240_v63  ;;  %v901_v1 = vrot.slane %v4304_v53, 1 }
 0x174   :  { %v4245_v17 = vadd.f32 %v716_v3, %v712_v5 }
 0x175   :  { %v4247_v34 = vadd.f32 %v717_v9, %v713_v7  ;;  %723 = vst [vmem:[#allocation3 + $0x8] sm:$0x1] %v4242_v10  ;;  %v727_v38 = vpack.c.bf16 %v4242_v10, %v4242_v10  ;;  %v734_v45 = vunpack.c.l.b16 %v726_v36 }
 0x176   :  { %724 = vst [vmem:[#allocation3 + $0x10] sm:$0x1] %v4245_v17  ;;  %v728_v39 = vpack.c.bf16 %v4245_v17, %v4245_v17 }
 0x177   :  { %725 = vst [vmem:[#allocation3 + $0x18] sm:$0x1] %v4247_v34  ;;  %v729_v41 = vpack.c.bf16 %v4247_v34, %v4247_v34  ;;  %v735_v42 = vunpack.c.l.b16 %v727_v38 }
 0x178   :  { %v736_v43 = vunpack.c.l.b16 %v728_v39  ;;  %v902_v39 = vrot.slane %v4308_v58, 1 }
 0x179   :  { %v737_v46 = vunpack.c.l.b16 %v729_v41  ;;  %v738_v48 = vrot.slane %v735_v42, 7 }
 0x17a   :  { %v741_v40 = vrot.slane %v736_v43, 6 }
 0x17b   :  { %v740_v49 = vsel %vm739_vm2, %v738_v48, %v734_v45  ;;  %v744_v50 = vrot.slane %v737_v46, 5 }
 0x17c   :  { %v743_v51 = vsel %vm742_vm3, %v741_v40, %v740_v49 }
 0x17d   :  { %v746_v47 = vsel %vm745_vm4, %v744_v50, %v743_v51 }
 0x17e   :  { %v747_v52 = vpack.c.b16 %v746_v47, %v746_v47 }
 0x180   :  { %782 = vmatmul.mubr.bf16.vlgmr.msra.gmra.mrb[4].mxu0 %v747_v52  ;;  %3254 = vmatmul.mubr.bf16.vlgmr.msra.gmra.mrb[16].mxu1 %v747_v52 }
 0x181   :  { %1055 = vmatpush1.bf16.msra.mxu0 %v4076_v4  ;;  %3258 = vmatpush3.bf16.msra.mxu1 %v4116_v23 }
 0x182   :  { %1056 = vmatprep.subr.bf16.mxu0 %v4080_v6  ;;  %3259 = vmatprep.subr.bf16.mxu1 %v3959_v20 }
 0x183   :  { %1086 = vmatprep.mubr.bf16.mxu0 %v3958_v0  ;;  %3273 = vmatprep.mubr.msk.bf16.mxu1 %vm3960_vm1, %v3959_v20 }
 0x185   :  { %1057 = vmatpush1.bf16.msra.mxu0 %v4082_v8  ;;  %3260 = vmatpush3.bf16.msra.mxu1 %v4124_v26  ;;  %v4298_v8 = vld [vmem:[#allocation2 + $0x1] ss:$8 sm:$0x7] }
 0x186   :  { %1058 = vmatprep.subr.bf16.mxu0 %v4086_v11  ;;  %3261 = vmatprep.subr.bf16.mxu1 %v3959_v20  ;;  %v899_v61 = vrot.slane %v4298_v8, 1 }
 0x189   :  { %1059 = vmatpush1.bf16.msra.mxu0 %v4088_v12  ;;  %3262 = vmatpush3.bf16.msra.mxu1 %v4137_v28 }
 0x18a   :  { %1060 = vmatprep.subr.bf16.mxu0 %v4090_v13  ;;  %3263 = vmatprep.subr.bf16.mxu1 %v3959_v20 }
 0x18d   :  { %1061 = vmatpush1.bf16.msra.mxu0 %v4095_v15  ;;  %3264 = vmatpush3.bf16.msra.mxu1 %v4143_v29  ;;  %v4301_v15 = vld [vmem:[#allocation2 + $0x19] ss:$8 sm:$0x7] }
 0x18e   :  { %1062 = vmatprep.subr.bf16.mxu0 %v4099_v16  ;;  %3265 = vmatprep.subr.bf16.mxu1 %v3959_v20  ;;  %v900_v62 = vrot.slane %v4301_v15, 1 }
 0x191   :  { %1063 = vmatpush1.bf16.msra.mxu0 %v4102_v18  ;;  %3266 = vmatpush3.bf16.msra.mxu1 %v4150_v30 }
 0x192   :  { %1064 = vmatprep.subr.bf16.mxu0 %v4105_v19  ;;  %3267 = vmatprep.subr.bf16.mxu1 %v3959_v20 }
 0x195   :  { %1065 = vmatpush1.bf16.msra.mxu0 %v4110_v21  ;;  %3268 = vmatpush3.bf16.msra.mxu1 %v4156_v31 }
 0x196   :  { %1066 = vmatprep.subr.bf16.mxu0 %v4114_v22  ;;  %3269 = vmatprep.subr.bf16.mxu1 %v3959_v20 }
 0x199   :  { %1067 = vmatpush1.bf16.msra.mxu0 %v4119_v24  ;;  %3270 = vmatpush3.bf16.msra.mxu1 %v4162_v32 }
 0x19a   :  { %1068 = vmatprep.subr.bf16.mxu0 %v4122_v25  ;;  %3271 = vmatprep.subr.bf16.mxu1 %v3959_v20 }
 0x19d   :  { %1069 = vmatpush1.bf16.msra.mxu0 %v4126_v27  ;;  %3272 = vmatpush3.bf16.msra.mxu1 %v4168_v33 }
 0x19e   :  { %1359 = vmatprep.subr.bf16.mxu0 %v4074_v2  ;;  %3277 = vmatprep.subr.bf16.mxu1 %v3959_v20 }
 0x253   :  { %v783_v4 = vpop.f32.mrb[4].mxu0  ;;  %v824_v6 = vpop.f32.mrb[16].mxu1 }
 0x254   :  { %v845_v11 = vrot.slane %v783_v4, %v4203_v14  ;;  %v785_v12 = vpop.f32.mrb[5].mxu0  ;;  %v3255_v13 = vpop.f32.mrb[17].mxu1 }
 0x255   :  { %v914_v16 = vrot.slane %v785_v12, %v4203_v14  ;;  %v787_v18 = vpop.f32.mrb[6].mxu0  ;;  %v827_v19 = vpop.f32.mrb[18].mxu1  ;;  %v964_v12 = vadd.f32 %v4230_v35, %v824_v6 }
 0x256   :  { %v846_v54 = vcombine.high %v845_v11, %v845_v11  ;;  %v853_v2 = vrot.slane %v845_v11, %v4203_v14  ;;  %v788_v55 = vpop.f32.mrb[7].mxu0  ;;  %v3256_v56 = vpop.f32.mrb[19].mxu1 }
 0x257   :  { %v915_v37 = vcombine.high %v914_v16, %v914_v16  ;;  %v922_v57 = vrot.slane %v914_v16, %v4203_v14  ;;  %v972_v55 = vrot.slane %v964_v12, %v4203_v14 }
 0x258   :  { %v860_v59 = vrot.slane %v846_v54, %v4203_v14  ;;  %v861_v44 = vcombine.high %v853_v2, %v853_v2  ;;  %v867_v60 = vadd.f32 %v853_v2, %v4298_v8 }
 0x259   :  { %v929_v3 = vrot.slane %v915_v37, %v4203_v14  ;;  %v930_v5 = vcombine.high %v922_v57, %v922_v57  ;;  %v936_v42 = vadd.f32 %v922_v57, %v899_v61  ;;  %v980_v61 = vrot.slane %v972_v55, %v4203_v14 }
 0x25a   :  { %v862_v7 = vcombine.high %v860_v59, %v860_v59  ;;  %v868_v9 = vadd.f32 %v860_v59, %v4301_v15  ;;  %v869_v36 = vadd.f32 %v861_v44, %v4304_v53  ;;  %v3058_v38 = vmul.f32 -1.442695, %v867_v60 }
 0x25b   :  { %v931_v41 = vcombine.high %v929_v3, %v929_v3  ;;  %v937_v43 = vadd.f32 %v929_v3, %v900_v62  ;;  %v938_v40 = vadd.f32 %v930_v5, %v901_v1  ;;  %v3062_v51 = vmul.f32 -1.442695, %v936_v42 }
 0x25c   :  { %v870_v45 = vadd.f32 %v862_v7, %v4308_v58  ;;  %3502 = vpow2.f32 %v3058_v38  ;;  %v3059_v46 = vmul.f32 -1.442695, %v868_v9  ;;  %v3060_v48 = vmul.f32 -1.442695, %v869_v36 }
 0x25d   :  { %v939_v50 = vadd.f32 %v931_v41, %v902_v39  ;;  %v3063_v47 = vmul.f32 -1.442695, %v937_v43  ;;  %v3064_v52 = vmul.f32 -1.442695, %v938_v40  ;;  %v973_v59 = vcombine.high %v972_v55, %v972_v55 }
 0x25e   :  { %3504 = vpow2.f32 %v3059_v46  ;;  %v3061_v49 = vmul.f32 -1.442695, %v870_v45  ;;  %v998_v9 = vrot.slane %v4298_v8, 2  ;;  %v999_v39 = vrot.slane %v4301_v15, 2 }
 0x25f   :  { %3506 = vpow2.f32 %v3060_v48  ;;  %v3065_v4 = vmul.f32 -1.442695, %v939_v50  ;;  %v987_v1 = vrot.slane %v973_v59, %v4203_v14  ;;  %v988_v41 = vcombine.high %v980_v61, %v980_v61 }
 0x260   :  { %3508 = vpow2.f32 %v3061_v49  ;;  %v1000_v40 = vrot.slane %v4304_v53, 2  ;;  %v1001_v50 = vrot.slane %v4308_v58, 2 }
 0x261   :  { %3510 = vpow2.f32 %v3062_v51  ;;  %v989_v43 = vcombine.high %v987_v1, %v987_v1 }
 0x262   :  { %3512 = vpow2.f32 %v3063_v47 }
 0x263   :  { %3514 = vpow2.f32 %v3064_v52 }
 0x264   :  { %3516 = vpow2.f32 %v3065_v4 }
 0x266   :  { %v3503_v11 = vpop.eup %3502 }
 0x267   :  { %v883_v13 = vadd.f32 1.0, %v3503_v11 }
 0x268   :  { %v3505_v16 = vpop.eup %3504 }
 0x269   :  { %v3507_v18 = vpop.eup %3506  ;;  %v884_v19 = vadd.f32 1.0, %v3505_v16  ;;  %3518 = vrcp.f32 %v883_v13 }
 0x26a   :  { %v3509_v54 = vpop.eup %3508  ;;  %v885_v2 = vadd.f32 1.0, %v3507_v18 }
 0x26b   :  { %v886_v56 = vadd.f32 1.0, %v3509_v54  ;;  %3520 = vrcp.f32 %v884_v19  ;;  %v3511_v37 = vpop.eup %3510 }
 0x26c   :  { %3522 = vrcp.f32 %v885_v2  ;;  %v3513_v57 = vpop.eup %3512  ;;  %v952_v6 = vadd.f32 1.0, %v3511_v37 }
 0x26d   :  { %3524 = vrcp.f32 %v886_v56  ;;  %v3515_v44 = vpop.eup %3514  ;;  %v953_v62 = vadd.f32 1.0, %v3513_v57 }
 0x26e   :  { %v3517_v60 = vpop.eup %3516  ;;  %v954_v3 = vadd.f32 1.0, %v3515_v44  ;;  %3526 = vrcp.f32 %v952_v6 }
 0x26f   :  { %v955_v7 = vadd.f32 1.0, %v3517_v60  ;;  %3528 = vrcp.f32 %v953_v62 }
 0x270   :  { %3530 = vrcp.f32 %v954_v3 }
 0x271   :  { %3532 = vrcp.f32 %v955_v7 }
 0x273   :  { %v3519_v5 = vpop.eup %3518 }
 0x274   :  { %v994_v36 = vmul.f32 %v3519_v5, %v980_v61 }
 0x275   :  { %v3521_v38 = vpop.eup %3520 }
 0x276   :  { %v3523_v42 = vpop.eup %3522  ;;  %v995_v45 = vmul.f32 %v3521_v38, %v987_v1  ;;  %v1006_v46 = vadd.f32 %v998_v9, %v994_v36 }
 0x277   :  { %v3525_v48 = vpop.eup %3524  ;;  %v996_v49 = vmul.f32 %v3523_v42, %v988_v41 }
 0x278   :  { %v997_v8 = vmul.f32 %v3525_v48, %v989_v43  ;;  %v1007_v51 = vadd.f32 %v999_v39, %v995_v45  ;;  %3534 = vtanh.f32 %v1006_v46  ;;  %v3527_v15 = vpop.eup %3526  ;;  %v4355_v48 = vld [vmem:[#allocation9] ss:$12 sps:$4 sm:$0xff]  }
 0x279   :  { %v1008_v47 = vadd.f32 %v1000_v40, %v996_v49  ;;  %v3529_v4 = vpop.eup %3528  ;;  %v1014_v13 = vsub.f32 1.0, %v3527_v15  ;;  %v1022_v19 = vmul.f32 %v3527_v15, %v4240_v63  ;;  %v4359_v40 = vld [vmem:[#allocation9 + $0x1c] ss:$12 sps:$4 sm:$0xff]   ;;  %v4366_v49 = vld [vmem:[#allocation9 + $0x18] ss:$12 sps:$4 sm:$0xff]  }
 0x27a   :  { %v1009_v52 = vadd.f32 %v1001_v50, %v997_v8  ;;  %3536 = vtanh.f32 %v1007_v51  ;;  %v3531_v11 = vpop.eup %3530  ;;  %v1015_v18 = vsub.f32 1.0, %v3529_v4  ;;  %v1023_v56 = vmul.f32 %v3529_v4, %v4242_v10  ;;  %v4370_v50 = vld [vmem:[#allocation9 + $0x34] ss:$12 sps:$4 sm:$0xff]   ;;  %v4378_v8 = vld [vmem:[#allocation9 + $0x4c] ss:$12 sps:$4 sm:$0xff]  }
 0x27b   :  { %3538 = vtanh.f32 %v1008_v47  ;;  %v3533_v12 = vpop.eup %3532  ;;  %v1016_v58 = vsub.f32 1.0, %v3531_v11  ;;  %v1024_v44 = vmul.f32 %v3531_v11, %v4245_v17  ;;  %v4382_v51 = vld [vmem:[#allocation9 + $0x48] ss:$12 sps:$4 sm:$0xff]   ;;  %v4390_v47 = vld [vmem:[#allocation9 + $0x60] ss:$12 sps:$4 sm:$0xff]  }
 0x27c   :  { %3540 = vtanh.f32 %v1009_v52  ;;  %v1017_v37 = vsub.f32 1.0, %v3533_v12  ;;  %v1025_v61 = vmul.f32 %v3533_v12, %v4247_v34  ;;  %v4418_v15 = vld [vmem:[#allocation2 + $0x32] ss:$8 sm:$0x7] }
 0x282   :  { %v3535_v16 = vpop.eup %3534 }
 0x283   :  { %v1018_v53 = vmul.f32 %v3535_v16, %v1014_v13 }
 0x284   :  { %v3537_v54 = vpop.eup %3536 }
 0x285   :  { %v3539_v2 = vpop.eup %3538  ;;  %v1019_v55 = vmul.f32 %v3537_v54, %v1015_v18  ;;  %v4330_v57 = vadd.f32 %v1022_v19, %v1018_v53  ;;  %v4422_v53 = vld [vmem:[#allocation2 + $0x4a] ss:$8 sm:$0x7] }
 0x286   :  { %v3541_v59 = vpop.eup %3540  ;;  %v1020_v60 = vmul.f32 %v3539_v2, %v1016_v58 }
 0x287   :  { %v1021_v6 = vmul.f32 %v3541_v59, %v1017_v37  ;;  %v4334_v62 = vadd.f32 %v1023_v56, %v1019_v55  ;;  %1030 = vst [vmem:[#allocation3 + $0x1] sm:$0x1] %v4330_v57  ;;  %v1034_v10 = vpack.c.bf16 %v4330_v57, %v4330_v57  ;;  %v1206_v56 = vrot.slane %v4418_v15, 1 }
 0x288   :  { %v4337_v63 = vadd.f32 %v1024_v44, %v1020_v60 }
 0x289   :  { %v4339_v1 = vadd.f32 %v1025_v61, %v1021_v6  ;;  %1031 = vst [vmem:[#allocation3 + $0x9] sm:$0x1] %v4334_v62  ;;  %v1035_v17 = vpack.c.bf16 %v4334_v62, %v4334_v62  ;;  %v1042_v9 = vunpack.c.l.b16 %v1034_v10  ;;  %v1207_v10 = vrot.slane %v4422_v53, 1 }
 0x28a   :  { %1032 = vst [vmem:[#allocation3 + $0x11] sm:$0x1] %v4337_v63  ;;  %v1036_v34 = vpack.c.bf16 %v4337_v63, %v4337_v63 }
 0x28b   :  { %1033 = vst [vmem:[#allocation3 + $0x19] sm:$0x1] %v4339_v1  ;;  %v1037_v3 = vpack.c.bf16 %v4339_v1, %v4339_v1  ;;  %v1043_v5 = vunpack.c.l.b16 %v1035_v17 }
 0x28c   :  { %v1044_v7 = vunpack.c.l.b16 %v1036_v34 }
 0x28d   :  { %v1045_v36 = vunpack.c.l.b16 %v1037_v3  ;;  %v1046_v38 = vrot.slane %v1043_v5, 7 }
 0x28e   :  { %v1048_v39 = vrot.slane %v1044_v7, 6 }
 0x28f   :  { %v1047_v41 = vsel %vm739_vm2, %v1046_v38, %v1042_v9  ;;  %v1050_v42 = vrot.slane %v1045_v36, 5 }
 0x290   :  { %v1049_v43 = vsel %vm742_vm3, %v1048_v39, %v1047_v41 }
 0x291   :  { %v1051_v45 = vsel %vm745_vm4, %v1050_v42, %v1049_v43 }
 0x292   :  { %v1052_v46 = vpack.c.b16 %v1051_v45, %v1051_v45 }
 0x294   :  { %1087 = vmatmul.mubr.bf16.vlgmr.msra.gmra.mrb[8].mxu0 %v1052_v46  ;;  %3274 = vmatmul.mubr.bf16.vlgmr.msra.gmra.mrb[20].mxu1 %v1052_v46 }
 0x295   :  { %1360 = vmatpush1.bf16.msra.mxu0 %v4355_v48  ;;  %3278 = vmatpush3.bf16.msra.mxu1 %v4116_v23  ;;  %v4374_v23 = vld [vmem:[#allocation9 + $0x30] ss:$12 sps:$4 sm:$0xff]  }
 0x296   :  { %1361 = vmatprep.subr.bf16.mxu0 %v4359_v40  ;;  %3279 = vmatprep.subr.bf16.mxu1 %v3959_v20 }
 0x297   :  { %1391 = vmatprep.mubr.bf16.mxu0 %v3958_v0  ;;  %3293 = vmatprep.mubr.msk.bf16.mxu1 %vm3960_vm1, %v3959_v20 }
 0x299   :  { %1362 = vmatpush1.bf16.msra.mxu0 %v4366_v49  ;;  %3280 = vmatpush3.bf16.msra.mxu1 %v4124_v26  ;;  %v4386_v26 = vld [vmem:[#allocation9 + $0x64] ss:$12 sps:$4 sm:$0xff]  }
 0x29a   :  { %1363 = vmatprep.subr.bf16.mxu0 %v4370_v50  ;;  %3281 = vmatprep.subr.bf16.mxu1 %v3959_v20 }
 0x29d   :  { %1364 = vmatpush1.bf16.msra.mxu0 %v4374_v23  ;;  %3282 = vmatpush3.bf16.msra.mxu1 %v4137_v28  ;;  %v4394_v28 = vld [vmem:[#allocation9 + $0x7c] ss:$12 sps:$4 sm:$0xff]  }
 0x29e   :  { %1365 = vmatprep.subr.bf16.mxu0 %v4378_v8  ;;  %3283 = vmatprep.subr.bf16.mxu1 %v3959_v20 }
 0x2a1   :  { %1366 = vmatpush1.bf16.msra.mxu0 %v4382_v51  ;;  %3284 = vmatpush3.bf16.msra.mxu1 %v4143_v29  ;;  %v4408_v29 = vld [vmem:[#allocation9 + $0x4] ss:$12 sps:$4 sm:$0xff]  }
 0x2a2   :  { %1367 = vmatprep.subr.bf16.mxu0 %v4386_v26  ;;  %3285 = vmatprep.subr.bf16.mxu1 %v3959_v20 }
 0x2a5   :  { %1368 = vmatpush1.bf16.msra.mxu0 %v4390_v47  ;;  %3286 = vmatpush3.bf16.msra.mxu1 %v4150_v30  ;;  %v4412_v30 = vld [vmem:[#allocation2 + $0x2] ss:$8 sm:$0x7] }
 0x2a6   :  { %1369 = vmatprep.subr.bf16.mxu0 %v4394_v28  ;;  %3287 = vmatprep.subr.bf16.mxu1 %v3959_v20  ;;  %v1204_v2 = vrot.slane %v4412_v30, 1 }
 0x2a9   :  { %1370 = vmatpush1.bf16.msra.mxu0 %v4110_v21  ;;  %3288 = vmatpush3.bf16.msra.mxu1 %v4156_v31 }
 0x2aa   :  { %1371 = vmatprep.subr.bf16.mxu0 %v4114_v22  ;;  %3289 = vmatprep.subr.bf16.mxu1 %v3959_v20 }
 0x2ad   :  { %1372 = vmatpush1.bf16.msra.mxu0 %v4119_v24  ;;  %3290 = vmatpush3.bf16.msra.mxu1 %v4162_v32  ;;  %v4415_v32 = vld [vmem:[#allocation2 + $0x1a] ss:$8 sm:$0x7] }
 0x2ae   :  { %1373 = vmatprep.subr.bf16.mxu0 %v4122_v25  ;;  %3291 = vmatprep.subr.bf16.mxu1 %v3959_v20  ;;  %v1205_v55 = vrot.slane %v4415_v32, 1 }
 0x2b1   :  { %1374 = vmatpush1.bf16.msra.mxu0 %v4126_v27  ;;  %3292 = vmatpush3.bf16.msra.mxu1 %v4168_v33 }
 0x2b2   :  { %1664 = vmatprep.subr.bf16.mxu0 %v4408_v29  ;;  %3297 = vmatprep.subr.bf16.mxu1 %v3959_v20 }
 0x367   :  { %v1088_v21 = vpop.f32.mrb[8].mxu0  ;;  %v1129_v22 = vpop.f32.mrb[20].mxu1 }
 0x368   :  { %v1150_v24 = vrot.slane %v1088_v21, %v4203_v14  ;;  %v1090_v31 = vpop.f32.mrb[9].mxu0  ;;  %v3275_v25 = vpop.f32.mrb[21].mxu1  ;;  %v1269_v21 = vadd.f32 %v4230_v35, %v1129_v22 }
 0x369   :  { %v1219_v27 = vrot.slane %v1090_v31, %v4203_v14  ;;  %v1092_v52 = vpop.f32.mrb[10].mxu0  ;;  %v1132_v33 = vpop.f32.mrb[22].mxu1 }
 0x36a   :  { %v1151_v4 = vcombine.high %v1150_v24, %v1150_v24  ;;  %v1158_v11 = vrot.slane %v1150_v24, %v4203_v14  ;;  %v1093_v12 = vpop.f32.mrb[11].mxu0  ;;  %v3276_v13 = vpop.f32.mrb[23].mxu1 }
 0x36b   :  { %v1220_v16 = vcombine.high %v1219_v27, %v1219_v27  ;;  %v1227_v18 = vrot.slane %v1219_v27, %v4203_v14 }
 0x36c   :  { %v1165_v19 = vrot.slane %v1151_v4, %v4203_v14  ;;  %v1166_v54 = vcombine.high %v1158_v11, %v1158_v11  ;;  %v1172_v58 = vadd.f32 %v1158_v11, %v4412_v30  ;;  %v1277_v4 = vrot.slane %v1269_v21, %v4203_v14 }
 0x36d   :  { %v1234_v37 = vrot.slane %v1220_v16, %v4203_v14  ;;  %v1235_v59 = vcombine.high %v1227_v18, %v1227_v18  ;;  %v1241_v34 = vadd.f32 %v1227_v18, %v1204_v2 }
 0x36e   :  { %v1167_v44 = vcombine.high %v1165_v19, %v1165_v19  ;;  %v1173_v60 = vadd.f32 %v1165_v19, %v4415_v32  ;;  %v1174_v6 = vadd.f32 %v1166_v54, %v4418_v15  ;;  %v3066_v61 = vmul.f32 -1.442695, %v1172_v58 }
 0x36f   :  { %v1236_v17 = vcombine.high %v1234_v37, %v1234_v37  ;;  %v1242_v3 = vadd.f32 %v1234_v37, %v1205_v55  ;;  %v1243_v36 = vadd.f32 %v1235_v59, %v1206_v56  ;;  %v3070_v41 = vmul.f32 -1.442695, %v1241_v34 }
 0x370   :  { %v1175_v5 = vadd.f32 %v1167_v44, %v4422_v53  ;;  %3542 = vpow2.f32 %v3066_v61  ;;  %v3067_v7 = vmul.f32 -1.442695, %v1173_v60  ;;  %v3068_v9 = vmul.f32 -1.442695, %v1174_v6 }
 0x371   :  { %v1244_v39 = vadd.f32 %v1236_v17, %v1207_v10  ;;  %v3071_v42 = vmul.f32 -1.442695, %v1242_v3  ;;  %v3072_v43 = vmul.f32 -1.442695, %v1243_v36  ;;  %v1278_v16 = vcombine.high %v1277_v4, %v1277_v4 }
 0x372   :  { %3544 = vpow2.f32 %v3067_v7  ;;  %v3069_v38 = vmul.f32 -1.442695, %v1175_v5  ;;  %v1285_v22 = vrot.slane %v1277_v4, %v4203_v14  ;;  %v1303_v37 = vrot.slane %v4412_v30, 2 }
 0x373   :  { %3546 = vpow2.f32 %v3068_v9  ;;  %v3073_v45 = vmul.f32 -1.442695, %v1244_v39  ;;  %v1292_v58 = vrot.slane %v1278_v16, %v4203_v14  ;;  %v1304_v60 = vrot.slane %v4415_v32, 2 }
 0x374   :  { %3548 = vpow2.f32 %v3069_v38  ;;  %v1293_v6 = vcombine.high %v1285_v22, %v1285_v22  ;;  %v1305_v5 = vrot.slane %v4418_v15, 2  ;;  %v1306_v9 = vrot.slane %v4422_v53, 2 }
 0x375   :  { %3550 = vpow2.f32 %v3070_v41  ;;  %v1294_v10 = vcombine.high %v1292_v58, %v1292_v58 }
 0x376   :  { %3552 = vpow2.f32 %v3071_v42 }
 0x377   :  { %3554 = vpow2.f32 %v3072_v43 }
 0x378   :  { %3556 = vpow2.f32 %v3073_v45 }
 0x37a   :  { %v3543_v46 = vpop.eup %3542 }
 0x37b   :  { %v1188_v24 = vadd.f32 1.0, %v3543_v46 }
 0x37c   :  { %v3545_v31 = vpop.eup %3544 }
 0x37d   :  { %v3547_v25 = vpop.eup %3546  ;;  %v1189_v27 = vadd.f32 1.0, %v3545_v31  ;;  %3558 = vrcp.f32 %v1188_v24 }
 0x37e   :  { %v3549_v52 = vpop.eup %3548  ;;  %v1190_v33 = vadd.f32 1.0, %v3547_v25 }
 0x37f   :  { %v1191_v11 = vadd.f32 1.0, %v3549_v52  ;;  %3560 = vrcp.f32 %v1189_v27  ;;  %v3551_v12 = vpop.eup %3550 }
 0x380   :  { %3562 = vrcp.f32 %v1190_v33  ;;  %v3553_v13 = vpop.eup %3552  ;;  %v1257_v35 = vadd.f32 1.0, %v3551_v12 }
 0x381   :  { %3564 = vrcp.f32 %v1191_v11  ;;  %v3555_v18 = vpop.eup %3554  ;;  %v1258_v54 = vadd.f32 1.0, %v3553_v13 }
 0x382   :  { %v3557_v19 = vpop.eup %3556  ;;  %v1259_v2 = vadd.f32 1.0, %v3555_v18  ;;  %3566 = vrcp.f32 %v1257_v35 }
 0x383   :  { %v1260_v56 = vadd.f32 1.0, %v3557_v19  ;;  %3568 = vrcp.f32 %v1258_v54 }
 0x384   :  { %3570 = vrcp.f32 %v1259_v2 }
 0x385   :  { %3572 = vrcp.f32 %v1260_v56 }
 0x387   :  { %v3559_v55 = vpop.eup %3558 }
 0x388   :  { %v1299_v59 = vmul.f32 %v3559_v55, %v1285_v22 }
 0x389   :  { %v3561_v44 = vpop.eup %3560 }
 0x38a   :  { %v3563_v61 = vpop.eup %3562  ;;  %v1300_v17 = vmul.f32 %v3561_v44, %v1292_v58  ;;  %v1311_v34 = vadd.f32 %v1303_v37, %v1299_v59 }
 0x38b   :  { %v3565_v3 = vpop.eup %3564  ;;  %v1301_v7 = vmul.f32 %v3563_v61, %v1293_v6 }
 0x38c   :  { %v1302_v30 = vmul.f32 %v3565_v3, %v1294_v10  ;;  %v1312_v36 = vadd.f32 %v1304_v60, %v1300_v17  ;;  %3574 = vtanh.f32 %v1311_v34  ;;  %v3567_v32 = vpop.eup %3566  ;;  %v4470_v10 = vld [vmem:[#allocation9 + $0x8] ss:$12 sps:$4 sm:$0xff]   ;;  %v4479_v17 = vld [vmem:[#allocation9 + $0x20] ss:$12 sps:$4 sm:$0xff]   ;;  %v4485_v34 = vld [vmem:[#allocation9 + $0x38] ss:$12 sps:$4 sm:$0xff]  }
 0x38d   :  { %v1313_v38 = vadd.f32 %v1305_v5, %v1301_v7  ;;  %v3569_v41 = vpop.eup %3568  ;;  %v1319_v45 = vsub.f32 1.0, %v3567_v32  ;;  %v1327_v24 = vmul.f32 %v3567_v32, %v4330_v57  ;;  %v4491_v3 = vld [vmem:[#allocation9 + $0x50] ss:$12 sps:$4 sm:$0xff]   ;;  %v4497_v5 = vld [vmem:[#allocation9 + $0x68] ss:$12 sps:$4 sm:$0xff]  }
 0x38e   :  { %v1314_v39 = vadd.f32 %v1306_v9, %v1302_v30  ;;  %3576 = vtanh.f32 %v1312_v36  ;;  %v3571_v42 = vpop.eup %3570  ;;  %v1320_v21 = vsub.f32 1.0, %v3569_v41  ;;  %v1328_v52 = vmul.f32 %v3569_v41, %v4334_v62  ;;  %v4502_v7 = vld [vmem:[#allocation9 + $0x78] ss:$12 sps:$4 sm:$0xff]   ;;  %v4505_v9 = vld [vmem:[#allocation9 + $0x80] ss:$12 sps:$4 sm:$0xff]  }
 0x38f   :  { %3578 = vtanh.f32 %v1313_v38  ;;  %v3573_v43 = vpop.eup %3572  ;;  %v1321_v53 = vsub.f32 1.0, %v3571_v42  ;;  %v1329_v12 = vmul.f32 %v3571_v42, %v4337_v63  ;;  %v4508_v30 = vld [vmem:[#allocation9 + $0x94] ss:$12 sps:$4 sm:$0xff]   ;;  %v4512_v36 = vld [vmem:[#allocation9 + $0x90] ss:$12 sps:$4 sm:$0xff]  }
 0x390   :  { %3580 = vtanh.f32 %v1314_v39  ;;  %v1322_v33 = vsub.f32 1.0, %v3573_v43  ;;  %v1330_v18 = vmul.f32 %v3573_v43, %v4339_v1  ;;  %v4515_v38 = vld [vmem:[#allocation9 + $0x98] ss:$12 sps:$4 sm:$0xff]   ;;  %v4522_v32 = vld [vmem:[#allocation9 + $0xa8] ss:$12 sps:$4 sm:$0xff]  }
 0x391   :  { %v4518_v39 = vld [vmem:[#allocation9 + $0xac] ss:$12 sps:$4 sm:$0xff]   ;;  %v4525_v41 = vld [vmem:[#allocation9 + $0xb0] ss:$12 sps:$4 sm:$0xff]  }
 0x396   :  { %v3575_v46 = vpop.eup %3574 }
 0x397   :  { %v1323_v15 = vmul.f32 %v3575_v46, %v1319_v45  ;;  %v4530_v45 = vld [vmem:[#allocation2 + $0x3] ss:$8 sm:$0x7] }
 0x398   :  { %v3577_v31 = vpop.eup %3576 }
 0x399   :  { %v3579_v25 = vpop.eup %3578  ;;  %v1324_v27 = vmul.f32 %v3577_v31, %v1320_v21  ;;  %v4444_v4 = vadd.f32 %v1327_v24, %v1323_v15  ;;  %v4533_v24 = vld [vmem:[#allocation2 + $0x1b] ss:$8 sm:$0x7] }
 0x39a   :  { %v3581_v11 = vpop.eup %3580  ;;  %v1325_v13 = vmul.f32 %v3579_v25, %v1321_v53 }
 0x39b   :  { %v1326_v16 = vmul.f32 %v3581_v11, %v1322_v33  ;;  %v4448_v19 = vadd.f32 %v1328_v52, %v1324_v27  ;;  %1335 = vst [vmem:[#allocation3 + $0x2] sm:$0x1] %v4444_v4  ;;  %v1339_v62 = vpack.c.bf16 %v4444_v4, %v4444_v4  ;;  %v4536_v27 = vld [vmem:[#allocation2 + $0x33] ss:$8 sm:$0x7] }
 0x39c   :  { %v4451_v57 = vadd.f32 %v1329_v12, %v1325_v13 }
 0x39d   :  { %v4453_v35 = vadd.f32 %v1330_v18, %v1326_v16  ;;  %1336 = vst [vmem:[#allocation3 + $0xa] sm:$0x1] %v4448_v19  ;;  %v1340_v63 = vpack.c.bf16 %v4448_v19, %v4448_v19  ;;  %v1347_v2 = vunpack.c.l.b16 %v1339_v62  ;;  %v4540_v18 = vld [vmem:[#allocation2 + $0x4b] ss:$8 sm:$0x7] }
 0x39e   :  { %1337 = vst [vmem:[#allocation3 + $0x12] sm:$0x1] %v4451_v57  ;;  %v1341_v1 = vpack.c.bf16 %v4451_v57, %v4451_v57 }
 0x39f   :  { %1338 = vst [vmem:[#allocation3 + $0x1a] sm:$0x1] %v4453_v35  ;;  %v1342_v22 = vpack.c.bf16 %v4453_v35, %v4453_v35  ;;  %v1348_v54 = vunpack.c.l.b16 %v1340_v63 }
 0x3a0   :  { %v1349_v58 = vunpack.c.l.b16 %v1341_v1 }
 0x3a1   :  { %v1350_v55 = vunpack.c.l.b16 %v1342_v22  ;;  %v1351_v56 = vrot.slane %v1348_v54, 7  ;;  %v1509_v22 = vrot.slane %v4530_v45, 1  ;;  %v1510_v54 = vrot.slane %v4533_v24, 1 }
 0x3a2   :  { %v1353_v37 = vrot.slane %v1349_v58, 6  ;;  %v1511_v58 = vrot.slane %v4536_v27, 1 }
 0x3a3   :  { %v1352_v59 = vsel %vm739_vm2, %v1351_v56, %v1347_v2  ;;  %v1355_v44 = vrot.slane %v1350_v55, 5 }
 0x3a4   :  { %v1354_v60 = vsel %vm742_vm3, %v1353_v37, %v1352_v59 }
 0x3a5   :  { %v1356_v6 = vsel %vm745_vm4, %v1355_v44, %v1354_v60  ;;  %v1512_v60 = vrot.slane %v4540_v18, 1 }
 0x3a6   :  { %v1357_v61 = vpack.c.b16 %v1356_v6, %v1356_v6 }
 0x3a8   :  { %1392 = vmatmul.mubr.bf16.vlgmr.msra.gmra.mrb[12].mxu0 %v1357_v61  ;;  %3294 = vmatmul.mubr.bf16.vlgmr.msra.gmra.mrb[24].mxu1 %v1357_v61 }
 0x3a9   :  { %1665 = vmatpush1.bf16.msra.mxu0 %v4355_v48  ;;  %3298 = vmatpush3.bf16.msra.mxu1 %v4470_v10 }
 0x3aa   :  { %1666 = vmatprep.subr.bf16.mxu0 %v4359_v40  ;;  %3299 = vmatprep.subr.bf16.mxu1 %v3959_v20 }
 0x3ab   :  { %1696 = vmatprep.mubr.bf16.mxu0 %v3958_v0  ;;  %3313 = vmatprep.mubr.msk.bf16.mxu1 %vm3960_vm1, %v3959_v20 }
 0x3ad   :  { %1667 = vmatpush1.bf16.msra.mxu0 %v4366_v49  ;;  %3300 = vmatpush3.bf16.msra.mxu1 %v4479_v17 }
 0x3ae   :  { %1668 = vmatprep.subr.bf16.mxu0 %v4370_v50  ;;  %3301 = vmatprep.subr.bf16.mxu1 %v3959_v20 }
 0x3b1   :  { %1669 = vmatpush1.bf16.msra.mxu0 %v4374_v23  ;;  %3302 = vmatpush3.bf16.msra.mxu1 %v4485_v34 }
 0x3b2   :  { %1670 = vmatprep.subr.bf16.mxu0 %v4378_v8  ;;  %3303 = vmatprep.subr.bf16.mxu1 %v3959_v20 }
 0x3b5   :  { %1671 = vmatpush1.bf16.msra.mxu0 %v4382_v51  ;;  %3304 = vmatpush3.bf16.msra.mxu1 %v4491_v3 }
 0x3b6   :  { %1672 = vmatprep.subr.bf16.mxu0 %v4386_v26  ;;  %3305 = vmatprep.subr.bf16.mxu1 %v3959_v20 }
 0x3b9   :  { %1673 = vmatpush1.bf16.msra.mxu0 %v4390_v47  ;;  %3306 = vmatpush3.bf16.msra.mxu1 %v4497_v5 }
 0x3ba   :  { %1674 = vmatprep.subr.bf16.mxu0 %v4394_v28  ;;  %3307 = vmatprep.subr.bf16.mxu1 %v3959_v20 }
 0x3bd   :  { %1675 = vmatpush1.bf16.msra.mxu0 %v4502_v7  ;;  %3308 = vmatpush3.bf16.msra.mxu1 %v4505_v9 }
 0x3be   :  { %1676 = vmatprep.subr.bf16.mxu0 %v4508_v30  ;;  %3309 = vmatprep.subr.bf16.mxu1 %v3959_v20 }
 0x3c1   :  { %1677 = vmatpush1.bf16.msra.mxu0 %v4512_v36  ;;  %3310 = vmatpush3.bf16.msra.mxu1 %v4515_v38 }
 0x3c2   :  { %1678 = vmatprep.subr.bf16.mxu0 %v4518_v39  ;;  %3311 = vmatprep.subr.bf16.mxu1 %v3959_v20 }
 0x3c5   :  { %1679 = vmatpush1.bf16.msra.mxu0 %v4522_v32  ;;  %3312 = vmatpush3.bf16.msra.mxu1 %v4525_v41 }
 0x3c6   :  { %1969 = vmatprep.subr.bf16.mxu0 %v4408_v29  ;;  %3317 = vmatprep.subr.bf16.mxu1 %v3959_v20 }
 0x47b   :  { %v1393_v42 = vpop.f32.mrb[12].mxu0  ;;  %v1434_v43 = vpop.f32.mrb[24].mxu1 }
 0x47c   :  { %v1455_v46 = vrot.slane %v1393_v42, %v4203_v14  ;;  %v1395_v21 = vpop.f32.mrb[13].mxu0  ;;  %v3295_v15 = vpop.f32.mrb[25].mxu1 }
 0x47d   :  { %v1524_v31 = vrot.slane %v1395_v21, %v4203_v14  ;;  %v1397_v53 = vpop.f32.mrb[14].mxu0  ;;  %v1437_v25 = vpop.f32.mrb[26].mxu1 }
 0x47e   :  { %v1456_v52 = vcombine.high %v1455_v46, %v1455_v46  ;;  %v1463_v33 = vrot.slane %v1455_v46, %v4203_v14  ;;  %v1398_v11 = vpop.f32.mrb[15].mxu0  ;;  %v3296_v12 = vpop.f32.mrb[27].mxu1 }
 0x47f   :  { %v1525_v13 = vcombine.high %v1524_v31, %v1524_v31  ;;  %v1532_v16 = vrot.slane %v1524_v31, %v4203_v14 }
 0x480   :  { %v1470_v62 = vrot.slane %v1456_v52, %v4203_v14  ;;  %v1471_v63 = vcombine.high %v1463_v33, %v1463_v33  ;;  %v1477_v1 = vadd.f32 %v1463_v33, %v4530_v45 }
 0x481   :  { %v1539_v2 = vrot.slane %v1525_v13, %v4203_v14  ;;  %v1540_v55 = vcombine.high %v1532_v16, %v1532_v16  ;;  %v1546_v61 = vadd.f32 %v1532_v16, %v1509_v22  ;;  %v4555_v16 = vld [vmem:[%s4930_s4] ss:$0 sm:$0xff] }
 0x482   :  { %v1472_v56 = vcombine.high %v1470_v62, %v1470_v62  ;;  %v1478_v37 = vadd.f32 %v1470_v62, %v4533_v24  ;;  %v1479_v59 = vadd.f32 %v1471_v63, %v4536_v27  ;;  %v3074_v44 = vmul.f32 -1.442695, %v1477_v1 }
 0x483   :  { %v1541_v6 = vcombine.high %v1539_v2, %v1539_v2  ;;  %v1547_v42 = vadd.f32 %v1539_v2, %v1510_v54  ;;  %v1548_v31 = vadd.f32 %v1540_v55, %v1511_v58  ;;  %v3078_v52 = vmul.f32 -1.442695, %v1546_v61 }
 0x484   :  { %v1480_v46 = vadd.f32 %v1472_v56, %v4540_v18  ;;  %3582 = vpow2.f32 %v3074_v44  ;;  %v3075_v21 = vmul.f32 -1.442695, %v1478_v37  ;;  %v3076_v15 = vmul.f32 -1.442695, %v1479_v59 }
 0x485   :  { %v1549_v25 = vadd.f32 %v1541_v6, %v1512_v60  ;;  %v3079_v33 = vmul.f32 -1.442695, %v1547_v42  ;;  %v3080_v11 = vmul.f32 -1.442695, %v1548_v31  ;;  %v1574_v62 = vadd.f32 %v4555_v16, %v1434_v43 }
 0x486   :  { %3584 = vpow2.f32 %v3075_v21  ;;  %v3077_v53 = vmul.f32 -1.442695, %v1480_v46 }
 0x487   :  { %3586 = vpow2.f32 %v3076_v15  ;;  %v3081_v12 = vmul.f32 -1.442695, %v1549_v25  ;;  %v1582_v55 = vrot.slane %v1574_v62, %v4203_v14 }
 0x488   :  { %3588 = vpow2.f32 %v3077_v53  ;;  %v1608_v53 = vrot.slane %v4530_v45, 2 }
 0x489   :  { %3590 = vpow2.f32 %v3078_v52  ;;  %v1583_v44 = vcombine.high %v1582_v55, %v1582_v55  ;;  %v1590_v61 = vrot.slane %v1582_v55, %v4203_v14 }
 0x48a   :  { %3592 = vpow2.f32 %v3079_v33  ;;  %v1609_v33 = vrot.slane %v4533_v24, 2 }
 0x48b   :  { %3594 = vpow2.f32 %v3080_v11  ;;  %v1597_v46 = vrot.slane %v1583_v44, %v4203_v14  ;;  %v1598_v11 = vcombine.high %v1590_v61, %v1590_v61 }
 0x48c   :  { %3596 = vpow2.f32 %v3081_v12 }
 0x48e   :  { %v3583_v13 = vpop.eup %3582 }
 0x48f   :  { %v1493_v63 = vadd.f32 1.0, %v3583_v13  ;;  %v1599_v13 = vcombine.high %v1597_v46, %v1597_v46 }
 0x490   :  { %v3585_v1 = vpop.eup %3584 }
 0x491   :  { %v3587_v22 = vpop.eup %3586  ;;  %v1494_v54 = vadd.f32 1.0, %v3585_v1  ;;  %3598 = vrcp.f32 %v1493_v63 }
 0x492   :  { %v3589_v58 = vpop.eup %3588  ;;  %v1495_v2 = vadd.f32 1.0, %v3587_v22  ;;  %v1610_v22 = vrot.slane %v4536_v27, 2 }
 0x493   :  { %v1496_v56 = vadd.f32 1.0, %v3589_v58  ;;  %3600 = vrcp.f32 %v1494_v54  ;;  %v3591_v37 = vpop.eup %3590  ;;  %v1611_v58 = vrot.slane %v4540_v18, 2 }
 0x494   :  { %3602 = vrcp.f32 %v1495_v2  ;;  %v3593_v59 = vpop.eup %3592  ;;  %v1562_v43 = vadd.f32 1.0, %v3591_v37 }
 0x495   :  { %3604 = vrcp.f32 %v1496_v56  ;;  %v3595_v60 = vpop.eup %3594  ;;  %v1563_v42 = vadd.f32 1.0, %v3593_v59 }
 0x496   :  { %v3597_v6 = vpop.eup %3596  ;;  %v1564_v21 = vadd.f32 1.0, %v3595_v60  ;;  %3606 = vrcp.f32 %v1562_v43 }
 0x497   :  { %v1565_v31 = vadd.f32 1.0, %v3597_v6  ;;  %3608 = vrcp.f32 %v1563_v42 }
 0x498   :  { %3610 = vrcp.f32 %v1564_v21 }
 0x499   :  { %3612 = vrcp.f32 %v1565_v31 }
 0x49b   :  { %v3599_v15 = vpop.eup %3598 }
 0x49c   :  { %v1604_v25 = vmul.f32 %v3599_v15, %v1590_v61 }
 0x49d   :  { %v3601_v52 = vpop.eup %3600 }
 0x49e   :  { %v3603_v12 = vpop.eup %3602  ;;  %v1605_v62 = vmul.f32 %v3601_v52, %v1597_v46  ;;  %v1616_v63 = vadd.f32 %v1608_v53, %v1604_v25 }
 0x49f   :  { %v3605_v1 = vpop.eup %3604  ;;  %v1606_v54 = vmul.f32 %v3603_v12, %v1598_v11 }
 0x4a0   :  { %v1607_v45 = vmul.f32 %v3605_v1, %v1599_v13  ;;  %v1617_v2 = vadd.f32 %v1609_v33, %v1605_v62  ;;  %3614 = vtanh.f32 %v1616_v63  ;;  %v3607_v24 = vpop.eup %3606 }
 0x4a1   :  { %v1618_v55 = vadd.f32 %v1610_v22, %v1606_v54  ;;  %v3609_v37 = vpop.eup %3608  ;;  %v1624_v60 = vsub.f32 1.0, %v3607_v24  ;;  %v1632_v61 = vmul.f32 %v3607_v24, %v4444_v4 }
 0x4a2   :  { %v1619_v56 = vadd.f32 %v1611_v58, %v1607_v45  ;;  %3616 = vtanh.f32 %v1617_v2  ;;  %v3611_v59 = vpop.eup %3610  ;;  %v1625_v43 = vsub.f32 1.0, %v3609_v37  ;;  %v1633_v15 = vmul.f32 %v3609_v37, %v4448_v19 }
 0x4a3   :  { %3618 = vtanh.f32 %v1618_v55  ;;  %v3613_v44 = vpop.eup %3612  ;;  %v1626_v18 = vsub.f32 1.0, %v3611_v59  ;;  %v1634_v52 = vmul.f32 %v3611_v59, %v4451_v57 }
 0x4a4   :  { %3620 = vtanh.f32 %v1619_v56  ;;  %v1627_v31 = vsub.f32 1.0, %v3613_v44  ;;  %v1635_v12 = vmul.f32 %v3613_v44, %v4453_v35  ;;  %v4633_v44 = vld [vmem:[#allocation2 + $0x34] ss:$8 sm:$0x7] }
 0x4aa   :  { %v3615_v6 = vpop.eup %3614 }
 0x4ab   :  { %v1628_v27 = vmul.f32 %v3615_v6, %v1624_v60 }
 0x4ac   :  { %v3617_v42 = vpop.eup %3616 }
 0x4ad   :  { %v3619_v46 = vpop.eup %3618  ;;  %v1629_v21 = vmul.f32 %v3617_v42, %v1625_v43  ;;  %v4567_v53 = vadd.f32 %v1632_v61, %v1628_v27  ;;  %v4637_v42 = vld [vmem:[#allocation2 + $0x4c] ss:$8 sm:$0x7] }
 0x4ae   :  { %v3621_v25 = vpop.eup %3620  ;;  %v1630_v33 = vmul.f32 %v3619_v46, %v1626_v18 }
 0x4af   :  { %v1631_v11 = vmul.f32 %v3621_v25, %v1627_v31  ;;  %v4571_v13 = vadd.f32 %v1633_v15, %v1629_v21  ;;  %1640 = vst [vmem:[#allocation3 + $0x3] sm:$0x1] %v4567_v53  ;;  %v1644_v19 = vpack.c.bf16 %v4567_v53, %v4567_v53  ;;  %v1816_v25 = vrot.slane %v4633_v44, 1 }
 0x4b0   :  { %v4574_v4 = vadd.f32 %v1634_v52, %v1630_v33 }
 0x4b1   :  { %v4576_v62 = vadd.f32 %v1635_v12, %v1631_v11  ;;  %1641 = vst [vmem:[#allocation3 + $0xb] sm:$0x1] %v4571_v13  ;;  %v1645_v57 = vpack.c.bf16 %v4571_v13, %v4571_v13  ;;  %v1652_v54 = vunpack.c.l.b16 %v1644_v19 }
 0x4b2   :  { %1642 = vst [vmem:[#allocation3 + $0x13] sm:$0x1] %v4574_v4  ;;  %v1646_v35 = vpack.c.bf16 %v4574_v4, %v4574_v4 }
 0x4b3   :  { %1643 = vst [vmem:[#allocation3 + $0x1b] sm:$0x1] %v4576_v62  ;;  %v1647_v63 = vpack.c.bf16 %v4576_v62, %v4576_v62  ;;  %v1653_v1 = vunpack.c.l.b16 %v1645_v57 }
 0x4b4   :  { %v1654_v22 = vunpack.c.l.b16 %v1646_v35  ;;  %v1817_v35 = vrot.slane %v4637_v42, 1 }
 0x4b5   :  { %v1655_v58 = vunpack.c.l.b16 %v1647_v63  ;;  %v1656_v45 = vrot.slane %v1653_v1, 7 }
 0x4b6   :  { %v1658_v2 = vrot.slane %v1654_v22, 6 }
 0x4b7   :  { %v1657_v55 = vsel %vm739_vm2, %v1656_v45, %v1652_v54  ;;  %v1660_v56 = vrot.slane %v1655_v58, 5 }
 0x4b8   :  { %v1659_v24 = vsel %vm742_vm3, %v1658_v2, %v1657_v55 }
 0x4b9   :  { %v1661_v37 = vsel %vm745_vm4, %v1660_v56, %v1659_v24 }
 0x4ba   :  { %v1662_v59 = vpack.c.b16 %v1661_v37, %v1661_v37 }
 0x4bc   :  { %1697 = vmatmul.mubr.bf16.vlgmr.msra.gmra.mrb[16].mxu0 %v1662_v59  ;;  %3314 = vmatmul.mubr.bf16.vlgmr.msra.gmra.mrb[28].mxu1 %v1662_v59 }
 0x4bd   :  { %1970 = vmatpush1.bf16.msra.mxu0 %v4355_v48  ;;  %3318 = vmatpush3.bf16.msra.mxu1 %v4470_v10 }
 0x4be   :  { %1971 = vmatprep.subr.bf16.mxu0 %v4359_v40  ;;  %3319 = vmatprep.subr.bf16.mxu1 %v3959_v20 }
 0x4bf   :  { %2001 = vmatprep.mubr.bf16.mxu0 %v3958_v0  ;;  %3333 = vmatprep.mubr.msk.bf16.mxu1 %vm3960_vm1, %v3959_v20 }
 0x4c1   :  { %1972 = vmatpush1.bf16.msra.mxu0 %v4366_v49  ;;  %3320 = vmatpush3.bf16.msra.mxu1 %v4479_v17  ;;  %v4627_v49 = vld [vmem:[#allocation2 + $0x4] ss:$8 sm:$0x7] }
 0x4c2   :  { %1973 = vmatprep.subr.bf16.mxu0 %v4370_v50  ;;  %3321 = vmatprep.subr.bf16.mxu1 %v3959_v20  ;;  %v1814_v15 = vrot.slane %v4627_v49, 1 }
 0x4c5   :  { %1974 = vmatpush1.bf16.msra.mxu0 %v4374_v23  ;;  %3322 = vmatpush3.bf16.msra.mxu1 %v4485_v34 }
 0x4c6   :  { %1975 = vmatprep.subr.bf16.mxu0 %v4378_v8  ;;  %3323 = vmatprep.subr.bf16.mxu1 %v3959_v20 }
 0x4c9   :  { %1976 = vmatpush1.bf16.msra.mxu0 %v4382_v51  ;;  %3324 = vmatpush3.bf16.msra.mxu1 %v4491_v3  ;;  %v4630_v51 = vld [vmem:[#allocation2 + $0x1c] ss:$8 sm:$0x7] }
 0x4ca   :  { %1977 = vmatprep.subr.bf16.mxu0 %v4386_v26  ;;  %3325 = vmatprep.subr.bf16.mxu1 %v3959_v20  ;;  %v1815_v31 = vrot.slane %v4630_v51, 1 }
 0x4cd   :  { %1978 = vmatpush1.bf16.msra.mxu0 %v4390_v47  ;;  %3326 = vmatpush3.bf16.msra.mxu1 %v4497_v5 }
 0x4ce   :  { %1979 = vmatprep.subr.bf16.mxu0 %v4394_v28  ;;  %3327 = vmatprep.subr.bf16.mxu1 %v3959_v20 }
 0x4d1   :  { %1980 = vmatpush1.bf16.msra.mxu0 %v4502_v7  ;;  %3328 = vmatpush3.bf16.msra.mxu1 %v4505_v9 }
 0x4d2   :  { %1981 = vmatprep.subr.bf16.mxu0 %v4508_v30  ;;  %3329 = vmatprep.subr.bf16.mxu1 %v3959_v20 }
 0x4d5   :  { %1982 = vmatpush1.bf16.msra.mxu0 %v4512_v36  ;;  %3330 = vmatpush3.bf16.msra.mxu1 %v4515_v38 }
 0x4d6   :  { %1983 = vmatprep.subr.bf16.mxu0 %v4518_v39  ;;  %3331 = vmatprep.subr.bf16.mxu1 %v3959_v20 }
 0x4d9   :  { %1984 = vmatpush1.bf16.msra.mxu0 %v4522_v32  ;;  %3332 = vmatpush3.bf16.msra.mxu1 %v4525_v41 }
 0x4da   :  { %2274 = vmatprep.subr.bf16.mxu0 %v4408_v29  ;;  %3337 = vmatprep.subr.bf16.mxu1 %v3959_v20 }
 0x58f   :  { %v1698_v48 = vpop.f32.mrb[16].mxu0  ;;  %v1739_v40 = vpop.f32.mrb[28].mxu1 }
 0x590   :  { %v1760_v50 = vrot.slane %v1698_v48, %v4203_v14  ;;  %v1700_v23 = vpop.f32.mrb[17].mxu0  ;;  %v3315_v8 = vpop.f32.mrb[29].mxu1 }
 0x591   :  { %v1829_v26 = vrot.slane %v1700_v23, %v4203_v14  ;;  %v1702_v47 = vpop.f32.mrb[18].mxu0  ;;  %v1742_v28 = vpop.f32.mrb[30].mxu1  ;;  %v1879_v23 = vadd.f32 %v4555_v16, %v1739_v40 }
 0x592   :  { %v1761_v60 = vcombine.high %v1760_v50, %v1760_v50  ;;  %v1768_v29 = vrot.slane %v1760_v50, %v4203_v14  ;;  %v1703_v6 = vpop.f32.mrb[19].mxu0  ;;  %v3316_v43 = vpop.f32.mrb[31].mxu1 }
 0x593   :  { %v1830_v27 = vcombine.high %v1829_v26, %v1829_v26  ;;  %v1837_v61 = vrot.slane %v1829_v26, %v4203_v14  ;;  %v1887_v6 = vrot.slane %v1879_v23, %v4203_v14 }
 0x594   :  { %v1775_v18 = vrot.slane %v1761_v60, %v4203_v14  ;;  %v1776_v46 = vcombine.high %v1768_v29, %v1768_v29  ;;  %v1782_v21 = vadd.f32 %v1768_v29, %v4627_v49 }
 0x595   :  { %v1844_v52 = vrot.slane %v1830_v27, %v4203_v14  ;;  %v1845_v33 = vcombine.high %v1837_v61, %v1837_v61  ;;  %v1851_v1 = vadd.f32 %v1837_v61, %v1814_v15  ;;  %v1895_v15 = vrot.slane %v1887_v6, %v4203_v14 }
 0x596   :  { %v1777_v11 = vcombine.high %v1775_v18, %v1775_v18  ;;  %v1783_v12 = vadd.f32 %v1775_v18, %v4630_v51  ;;  %v1784_v19 = vadd.f32 %v1776_v46, %v4633_v44  ;;  %v3082_v57 = vmul.f32 -1.442695, %v1782_v21 }
 0x597   :  { %v1846_v63 = vcombine.high %v1844_v52, %v1844_v52  ;;  %v1852_v22 = vadd.f32 %v1844_v52, %v1815_v31  ;;  %v1853_v2 = vadd.f32 %v1845_v33, %v1816_v25  ;;  %v3086_v24 = vmul.f32 -1.442695, %v1851_v1 }
 0x598   :  { %v1785_v54 = vadd.f32 %v1777_v11, %v4637_v42  ;;  %3622 = vpow2.f32 %v3082_v57  ;;  %v3083_v58 = vmul.f32 -1.442695, %v1783_v12  ;;  %v3084_v45 = vmul.f32 -1.442695, %v1784_v19 }
 0x599   :  { %v1854_v56 = vadd.f32 %v1846_v63, %v1817_v35  ;;  %v3087_v37 = vmul.f32 -1.442695, %v1852_v22  ;;  %v3088_v59 = vmul.f32 -1.442695, %v1853_v2  ;;  %v1888_v18 = vcombine.high %v1887_v6, %v1887_v6 }
 0x59a   :  { %3624 = vpow2.f32 %v3083_v58  ;;  %v3085_v55 = vmul.f32 -1.442695, %v1785_v54  ;;  %v1913_v12 = vrot.slane %v4627_v49, 2  ;;  %v1914_v35 = vrot.slane %v4630_v51, 2 }
 0x59b   :  { %3626 = vpow2.f32 %v3084_v45  ;;  %v3089_v48 = vmul.f32 -1.442695, %v1854_v56  ;;  %v1902_v25 = vrot.slane %v1888_v18, %v4203_v14  ;;  %v1903_v63 = vcombine.high %v1895_v15, %v1895_v15 }
 0x59c   :  { %3628 = vpow2.f32 %v3085_v55  ;;  %v1915_v2 = vrot.slane %v4633_v44, 2  ;;  %v1916_v56 = vrot.slane %v4637_v42, 2 }
 0x59d   :  { %3630 = vpow2.f32 %v3086_v24  ;;  %v1904_v22 = vcombine.high %v1902_v25, %v1902_v25 }
 0x59e   :  { %3632 = vpow2.f32 %v3087_v37 }
 0x59f   :  { %3634 = vpow2.f32 %v3088_v59 }
 0x5a0   :  { %3636 = vpow2.f32 %v3089_v48 }
 0x5a2   :  { %v3623_v50 = vpop.eup %3622 }
 0x5a3   :  { %v1798_v8 = vadd.f32 1.0, %v3623_v50 }
 0x5a4   :  { %v3625_v26 = vpop.eup %3624 }
 0x5a5   :  { %v3627_v47 = vpop.eup %3626  ;;  %v1799_v28 = vadd.f32 1.0, %v3625_v26  ;;  %3638 = vrcp.f32 %v1798_v8 }
 0x5a6   :  { %v3629_v60 = vpop.eup %3628  ;;  %v1800_v29 = vadd.f32 1.0, %v3627_v47 }
 0x5a7   :  { %v1801_v43 = vadd.f32 1.0, %v3629_v60  ;;  %3640 = vrcp.f32 %v1799_v28  ;;  %v3631_v27 = vpop.eup %3630 }
 0x5a8   :  { %3642 = vrcp.f32 %v1800_v29  ;;  %v3633_v61 = vpop.eup %3632  ;;  %v1867_v40 = vadd.f32 1.0, %v3631_v27 }
 0x5a9   :  { %3644 = vrcp.f32 %v1801_v43  ;;  %v3635_v46 = vpop.eup %3634  ;;  %v1868_v31 = vadd.f32 1.0, %v3633_v61 }
 0x5aa   :  { %v3637_v21 = vpop.eup %3636  ;;  %v1869_v52 = vadd.f32 1.0, %v3635_v46  ;;  %3646 = vrcp.f32 %v1867_v40 }
 0x5ab   :  { %v1870_v11 = vadd.f32 1.0, %v3637_v21  ;;  %3648 = vrcp.f32 %v1868_v31 }
 0x5ac   :  { %3650 = vrcp.f32 %v1869_v52 }
 0x5ad   :  { %3652 = vrcp.f32 %v1870_v11 }
 0x5af   :  { %v3639_v33 = vpop.eup %3638 }
 0x5b0   :  { %v1909_v19 = vmul.f32 %v3639_v33, %v1895_v15 }
 0x5b1   :  { %v3641_v57 = vpop.eup %3640 }
 0x5b2   :  { %v3643_v1 = vpop.eup %3642  ;;  %v1910_v54 = vmul.f32 %v3641_v57, %v1902_v25  ;;  %v1921_v58 = vadd.f32 %v1913_v12, %v1909_v19 }
 0x5b3   :  { %v3645_v45 = vpop.eup %3644  ;;  %v1911_v55 = vmul.f32 %v3643_v1, %v1903_v63 }
 0x5b4   :  { %v1912_v49 = vmul.f32 %v3645_v45, %v1904_v22  ;;  %v1922_v24 = vadd.f32 %v1914_v35, %v1910_v54  ;;  %3654 = vtanh.f32 %v1921_v58  ;;  %v3647_v51 = vpop.eup %3646  ;;  %v4684_v45 = vld [vmem:[#allocation9] ss:$12 sps:$4 sm:$0xff]  }
 0x5b5   :  { %v1923_v37 = vadd.f32 %v1915_v2, %v1911_v55  ;;  %v3649_v48 = vpop.eup %3648  ;;  %v1929_v8 = vsub.f32 1.0, %v3647_v51  ;;  %v1937_v28 = vmul.f32 %v3647_v51, %v4567_v53  ;;  %v4688_v2 = vld [vmem:[#allocation9 + $0x1c] ss:$12 sps:$4 sm:$0xff]   ;;  %v4695_v55 = vld [vmem:[#allocation9 + $0x18] ss:$12 sps:$4 sm:$0xff]  }
 0x5b6   :  { %v1924_v59 = vadd.f32 %v1916_v56, %v1912_v49  ;;  %3656 = vtanh.f32 %v1922_v24  ;;  %v3651_v50 = vpop.eup %3650  ;;  %v1930_v47 = vsub.f32 1.0, %v3649_v48  ;;  %v1938_v43 = vmul.f32 %v3649_v48, %v4571_v13  ;;  %v4699_v56 = vld [vmem:[#allocation9 + $0x34] ss:$12 sps:$4 sm:$0xff]   ;;  %v4707_v49 = vld [vmem:[#allocation9 + $0x4c] ss:$12 sps:$4 sm:$0xff]  }
 0x5b7   :  { %3658 = vtanh.f32 %v1923_v37  ;;  %v3653_v23 = vpop.eup %3652  ;;  %v1931_v42 = vsub.f32 1.0, %v3651_v50  ;;  %v1939_v46 = vmul.f32 %v3651_v50, %v4574_v4  ;;  %v4711_v24 = vld [vmem:[#allocation9 + $0x48] ss:$12 sps:$4 sm:$0xff]   ;;  %v4719_v37 = vld [vmem:[#allocation9 + $0x60] ss:$12 sps:$4 sm:$0xff]  }
 0x5b8   :  { %3660 = vtanh.f32 %v1924_v59  ;;  %v1932_v27 = vsub.f32 1.0, %v3653_v23  ;;  %v1940_v15 = vmul.f32 %v3653_v23, %v4576_v62  ;;  %v4741_v59 = vld [vmem:[#allocation2 + $0x1d] ss:$8 sm:$0x7] }
 0x5b9   :  { %v4744_v48 = vld [vmem:[#allocation2 + $0x35] ss:$8 sm:$0x7] }
 0x5be   :  { %v3655_v26 = vpop.eup %3654 }
 0x5bf   :  { %v1933_v44 = vmul.f32 %v3655_v26, %v1929_v8 }
 0x5c0   :  { %v3657_v60 = vpop.eup %3656 }
 0x5c1   :  { %v3659_v29 = vpop.eup %3658  ;;  %v1934_v6 = vmul.f32 %v3657_v60, %v1930_v47  ;;  %v4659_v61 = vadd.f32 %v1937_v28, %v1933_v44  ;;  %v4748_v44 = vld [vmem:[#allocation2 + $0x4d] ss:$8 sm:$0x7] }
 0x5c2   :  { %v3661_v18 = vpop.eup %3660  ;;  %v1935_v21 = vmul.f32 %v3659_v29, %v1931_v42 }
 0x5c3   :  { %v1936_v40 = vmul.f32 %v3661_v18, %v1932_v27  ;;  %v4663_v31 = vadd.f32 %v1938_v43, %v1934_v6  ;;  %1945 = vst [vmem:[#allocation3 + $0x4] sm:$0x1] %v4659_v61  ;;  %v1949_v13 = vpack.c.bf16 %v4659_v61, %v4659_v61  ;;  %v2120_v6 = vrot.slane %v4741_v59, 1 }
 0x5c4   :  { %v4666_v53 = vadd.f32 %v1939_v46, %v1935_v21  ;;  %v2121_v43 = vrot.slane %v4744_v48, 1 }
 0x5c5   :  { %v4668_v25 = vadd.f32 %v1940_v15, %v1936_v40  ;;  %1946 = vst [vmem:[#allocation3 + $0xc] sm:$0x1] %v4663_v31  ;;  %v1950_v4 = vpack.c.bf16 %v4663_v31, %v4663_v31  ;;  %v1957_v12 = vunpack.c.l.b16 %v1949_v13  ;;  %v2122_v13 = vrot.slane %v4748_v44, 1 }
 0x5c6   :  { %1947 = vst [vmem:[#allocation3 + $0x14] sm:$0x1] %v4666_v53  ;;  %v1951_v62 = vpack.c.bf16 %v4666_v53, %v4666_v53 }
 0x5c7   :  { %1948 = vst [vmem:[#allocation3 + $0x1c] sm:$0x1] %v4668_v25  ;;  %v1952_v52 = vpack.c.bf16 %v4668_v25, %v4668_v25  ;;  %v1958_v33 = vunpack.c.l.b16 %v1950_v4 }
 0x5c8   :  { %v1959_v11 = vunpack.c.l.b16 %v1951_v62 }
 0x5c9   :  { %v1960_v19 = vunpack.c.l.b16 %v1952_v52  ;;  %v1961_v57 = vrot.slane %v1958_v33, 7 }
 0x5ca   :  { %v1963_v35 = vrot.slane %v1959_v11, 6 }
 0x5cb   :  { %v1962_v63 = vsel %vm739_vm2, %v1961_v57, %v1957_v12  ;;  %v1965_v1 = vrot.slane %v1960_v19, 5 }
 0x5cc   :  { %v1964_v22 = vsel %vm742_vm3, %v1963_v35, %v1962_v63 }
 0x5cd   :  { %v1966_v54 = vsel %vm745_vm4, %v1965_v1, %v1964_v22 }
 0x5ce   :  { %v1967_v58 = vpack.c.b16 %v1966_v54, %v1966_v54 }
 0x5d0   :  { %2002 = vmatmul.mubr.bf16.vlgmr.msra.gmra.mrb[20].mxu0 %v1967_v58  ;;  %3334 = vmatmul.mubr.bf16.vlgmr.msra.gmra.mrb[32].mxu1 %v1967_v58 }
 0x5d1   :  { %2275 = vmatpush1.bf16.msra.mxu0 %v4684_v45  ;;  %3338 = vmatpush3.bf16.msra.mxu1 %v4470_v10  ;;  %v4703_v10 = vld [vmem:[#allocation9 + $0x30] ss:$12 sps:$4 sm:$0xff]  }
 0x5d2   :  { %2276 = vmatprep.subr.bf16.mxu0 %v4688_v2  ;;  %3339 = vmatprep.subr.bf16.mxu1 %v3959_v20 }
 0x5d3   :  { %2306 = vmatprep.mubr.bf16.mxu0 %v3958_v0  ;;  %3353 = vmatprep.mubr.msk.bf16.mxu1 %vm3960_vm1, %v3959_v20 }
 0x5d5   :  { %2277 = vmatpush1.bf16.msra.mxu0 %v4695_v55  ;;  %3340 = vmatpush3.bf16.msra.mxu1 %v4479_v17  ;;  %v4715_v17 = vld [vmem:[#allocation9 + $0x64] ss:$12 sps:$4 sm:$0xff]  }
 0x5d6   :  { %2278 = vmatprep.subr.bf16.mxu0 %v4699_v56  ;;  %3341 = vmatprep.subr.bf16.mxu1 %v3959_v20 }
 0x5d9   :  { %2279 = vmatpush1.bf16.msra.mxu0 %v4703_v10  ;;  %3342 = vmatpush3.bf16.msra.mxu1 %v4485_v34  ;;  %v4723_v34 = vld [vmem:[#allocation9 + $0x7c] ss:$12 sps:$4 sm:$0xff]  }
 0x5da   :  { %2280 = vmatprep.subr.bf16.mxu0 %v4707_v49  ;;  %3343 = vmatprep.subr.bf16.mxu1 %v3959_v20 }
 0x5dd   :  { %2281 = vmatpush1.bf16.msra.mxu0 %v4711_v24  ;;  %3344 = vmatpush3.bf16.msra.mxu1 %v4491_v3  ;;  %v3817_v3 = vld [vmem:[#allocation9 + $0x4] ss:$12 sps:$4 sm:$0xff]  }
 0x5de   :  { %2282 = vmatprep.subr.bf16.mxu0 %v4715_v17  ;;  %3345 = vmatprep.subr.bf16.mxu1 %v3959_v20 }
 0x5e1   :  { %2283 = vmatpush1.bf16.msra.mxu0 %v4719_v37  ;;  %3346 = vmatpush3.bf16.msra.mxu1 %v4497_v5 }
 0x5e2   :  { %2284 = vmatprep.subr.bf16.mxu0 %v4723_v34  ;;  %3347 = vmatprep.subr.bf16.mxu1 %v3959_v20 }
 0x5e5   :  { %2285 = vmatpush1.bf16.msra.mxu0 %v4502_v7  ;;  %3348 = vmatpush3.bf16.msra.mxu1 %v4505_v9  ;;  %v4738_v9 = vld [vmem:[#allocation2 + $0x5] ss:$8 sm:$0x7] }
 0x5e6   :  { %2286 = vmatprep.subr.bf16.mxu0 %v4508_v30  ;;  %3349 = vmatprep.subr.bf16.mxu1 %v3959_v20  ;;  %v2119_v29 = vrot.slane %v4738_v9, 1 }
 0x5e9   :  { %2287 = vmatpush1.bf16.msra.mxu0 %v4512_v36  ;;  %3350 = vmatpush3.bf16.msra.mxu1 %v4515_v38 }
 0x5ea   :  { %2288 = vmatprep.subr.bf16.mxu0 %v4518_v39  ;;  %3351 = vmatprep.subr.bf16.mxu1 %v3959_v20 }
 0x5ed   :  { %2289 = vmatpush1.bf16.msra.mxu0 %v4522_v32  ;;  %3352 = vmatpush3.bf16.msra.mxu1 %v4525_v41 }
 0x5ee   :  { %2579 = vmatprep.subr.bf16.mxu0 %v3817_v3  ;;  %3357 = vmatprep.subr.bf16.mxu1 %v3959_v20 }
 0x6a3   :  { %v2003_v5 = vpop.f32.mrb[20].mxu0  ;;  %v2044_v7 = vpop.f32.mrb[32].mxu1 }
 0x6a4   :  { %v2065_v30 = vrot.slane %v2003_v5, %v4203_v14  ;;  %v2005_v36 = vpop.f32.mrb[21].mxu0  ;;  %v3335_v38 = vpop.f32.mrb[33].mxu1  ;;  %v2184_v3 = vadd.f32 %v4555_v16, %v2044_v7 }
 0x6a5   :  { %v2134_v39 = vrot.slane %v2005_v36, %v4203_v14  ;;  %v2007_v51 = vpop.f32.mrb[22].mxu0  ;;  %v2047_v32 = vpop.f32.mrb[34].mxu1 }
 0x6a6   :  { %v2066_v41 = vcombine.high %v2065_v30, %v2065_v30  ;;  %v2073_v50 = vrot.slane %v2065_v30, %v4203_v14  ;;  %v2008_v23 = vpop.f32.mrb[23].mxu0  ;;  %v3336_v8 = vpop.f32.mrb[35].mxu1  ;;  %v2192_v32 = vrot.slane %v2184_v3, %v4203_v14 }
 0x6a7   :  { %v2135_v26 = vcombine.high %v2134_v39, %v2134_v39  ;;  %v2142_v47 = vrot.slane %v2134_v39, %v4203_v14 }
 0x6a8   :  { %v2080_v28 = vrot.slane %v2066_v41, %v4203_v14  ;;  %v2081_v60 = vcombine.high %v2073_v50, %v2073_v50  ;;  %v2087_v42 = vadd.f32 %v2073_v50, %v4738_v9  ;;  %v2193_v8 = vcombine.high %v2192_v32, %v2192_v32 }
 0x6a9   :  { %v2149_v27 = vrot.slane %v2135_v26, %v4203_v14  ;;  %v2150_v18 = vcombine.high %v2142_v47, %v2142_v47  ;;  %v2156_v62 = vadd.f32 %v2142_v47, %v2119_v29  ;;  %v2200_v7 = vrot.slane %v2192_v32, %v4203_v14 }
 0x6aa   :  { %v2082_v46 = vcombine.high %v2080_v28, %v2080_v28  ;;  %v2088_v21 = vadd.f32 %v2080_v28, %v4741_v59  ;;  %v2089_v40 = vadd.f32 %v2081_v60, %v4744_v48  ;;  %v3090_v15 = vmul.f32 -1.442695, %v2087_v42 }
 0x6ab   :  { %v2151_v4 = vcombine.high %v2149_v27, %v2149_v27  ;;  %v2157_v52 = vadd.f32 %v2149_v27, %v2120_v6  ;;  %v2158_v19 = vadd.f32 %v2150_v18, %v2121_v43  ;;  %v3094_v63 = vmul.f32 -1.442695, %v2156_v62 }
 0x6ac   :  { %v2090_v33 = vadd.f32 %v2082_v46, %v4748_v44  ;;  %3662 = vpow2.f32 %v3090_v15  ;;  %v3091_v11 = vmul.f32 -1.442695, %v2088_v21  ;;  %v3092_v12 = vmul.f32 -1.442695, %v2089_v40 }
 0x6ad   :  { %v2159_v35 = vadd.f32 %v2151_v4, %v2122_v13  ;;  %v3095_v1 = vmul.f32 -1.442695, %v2157_v52  ;;  %v3096_v22 = vmul.f32 -1.442695, %v2158_v19  ;;  %v2207_v60 = vrot.slane %v2193_v8, %v4203_v14 }
 0x6ae   :  { %3664 = vpow2.f32 %v3091_v11  ;;  %v3093_v57 = vmul.f32 -1.442695, %v2090_v33  ;;  %v2218_v43 = vrot.slane %v4738_v9, 2  ;;  %v2219_v46 = vrot.slane %v4741_v59, 2 }
 0x6af   :  { %3666 = vpow2.f32 %v3092_v12  ;;  %v3097_v54 = vmul.f32 -1.442695, %v2159_v35  ;;  %v2208_v21 = vcombine.high %v2200_v7, %v2200_v7  ;;  %v2209_v15 = vcombine.high %v2207_v60, %v2207_v60 }
 0x6b0   :  { %3668 = vpow2.f32 %v3093_v57  ;;  %v2220_v52 = vrot.slane %v4744_v48, 2  ;;  %v2221_v11 = vrot.slane %v4748_v44, 2 }
 0x6b1   :  { %3670 = vpow2.f32 %v3094_v63 }
 0x6b2   :  { %3672 = vpow2.f32 %v3095_v1 }
 0x6b3   :  { %3674 = vpow2.f32 %v3096_v22 }
 0x6b4   :  { %3676 = vpow2.f32 %v3097_v54 }
 0x6b6   :  { %v3663_v58 = vpop.eup %3662 }
 0x6b7   :  { %v2103_v5 = vadd.f32 1.0, %v3663_v58 }
 0x6b8   :  { %v3665_v30 = vpop.eup %3664 }
 0x6b9   :  { %v3667_v36 = vpop.eup %3666  ;;  %v2104_v38 = vadd.f32 1.0, %v3665_v30  ;;  %3678 = vrcp.f32 %v2103_v5 }
 0x6ba   :  { %v3669_v39 = vpop.eup %3668  ;;  %v2105_v51 = vadd.f32 1.0, %v3667_v36 }
 0x6bb   :  { %v2106_v41 = vadd.f32 1.0, %v3669_v39  ;;  %3680 = vrcp.f32 %v2104_v38  ;;  %v3671_v50 = vpop.eup %3670 }
 0x6bc   :  { %3682 = vrcp.f32 %v2105_v51  ;;  %v3673_v23 = vpop.eup %3672  ;;  %v2172_v16 = vadd.f32 1.0, %v3671_v50 }
 0x6bd   :  { %3684 = vrcp.f32 %v2106_v41  ;;  %v3675_v26 = vpop.eup %3674  ;;  %v2173_v28 = vadd.f32 1.0, %v3673_v23 }
 0x6be   :  { %v3677_v47 = vpop.eup %3676  ;;  %v2174_v42 = vadd.f32 1.0, %v3675_v26  ;;  %3686 = vrcp.f32 %v2172_v16 }
 0x6bf   :  { %v2175_v6 = vadd.f32 1.0, %v3677_v47  ;;  %3688 = vrcp.f32 %v2173_v28 }
 0x6c0   :  { %3690 = vrcp.f32 %v2174_v42 }
 0x6c1   :  { %3692 = vrcp.f32 %v2175_v6 }
 0x6c3   :  { %v3679_v29 = vpop.eup %3678 }
 0x6c4   :  { %v2214_v27 = vmul.f32 %v3679_v29, %v2200_v7 }
 0x6c5   :  { %v3681_v18 = vpop.eup %3680 }
 0x6c6   :  { %v3683_v40 = vpop.eup %3682  ;;  %v2215_v13 = vmul.f32 %v3681_v18, %v2207_v60  ;;  %v2226_v4 = vadd.f32 %v2218_v43, %v2214_v27 }
 0x6c7   :  { %v3685_v62 = vpop.eup %3684  ;;  %v2216_v33 = vmul.f32 %v3683_v40, %v2208_v21  ;;  %v3818_v40 = vld [vmem:[#allocation9 + $0x8] ss:$12 sps:$4 sm:$0xff]  }
 0x6c8   :  { %v2217_v9 = vmul.f32 %v3685_v62, %v2209_v15  ;;  %v2227_v12 = vadd.f32 %v2219_v46, %v2215_v13  ;;  %3694 = vtanh.f32 %v2226_v4  ;;  %v3687_v59 = vpop.eup %3686  ;;  %v3819_v15 = vld [vmem:[#allocation9 + $0x20] ss:$12 sps:$4 sm:$0xff]  }
 0x6c9   :  { %v2228_v19 = vadd.f32 %v2220_v52, %v2216_v33  ;;  %v3689_v35 = vpop.eup %3688  ;;  %v2234_v22 = vsub.f32 1.0, %v3687_v59  ;;  %v2242_v3 = vmul.f32 %v3687_v59, %v4659_v61  ;;  %v4815_v62 = vld [vmem:[#allocation2 + $0x6] ss:$8 sm:$0x7] }
 0x6ca   :  { %v2229_v57 = vadd.f32 %v2221_v11, %v2217_v9  ;;  %3696 = vtanh.f32 %v2227_v12  ;;  %v3691_v63 = vpop.eup %3690  ;;  %v2235_v58 = vsub.f32 1.0, %v3689_v35  ;;  %v2243_v38 = vmul.f32 %v3689_v35, %v4663_v31  ;;  %v4818_v9 = vld [vmem:[#allocation2 + $0x1e] ss:$8 sm:$0x7] }
 0x6cb   :  { %3698 = vtanh.f32 %v2228_v19  ;;  %v3693_v1 = vpop.eup %3692  ;;  %v2236_v44 = vsub.f32 1.0, %v3691_v63  ;;  %v2244_v41 = vmul.f32 %v3691_v63, %v4666_v53  ;;  %v4821_v59 = vld [vmem:[#allocation2 + $0x36] ss:$8 sm:$0x7] }
 0x6cc   :  { %3700 = vtanh.f32 %v2229_v57  ;;  %v2237_v39 = vsub.f32 1.0, %v3693_v1  ;;  %v2245_v8 = vmul.f32 %v3693_v1, %v4668_v25 }
 0x6d2   :  { %v3695_v54 = vpop.eup %3694 }
 0x6d3   :  { %v2238_v48 = vmul.f32 %v3695_v54, %v2234_v22 }
 0x6d4   :  { %v3697_v5 = vpop.eup %3696 }
 0x6d5   :  { %v3699_v30 = vpop.eup %3698  ;;  %v2239_v36 = vmul.f32 %v3697_v5, %v2235_v58  ;;  %v4770_v51 = vadd.f32 %v2242_v3, %v2238_v48  ;;  %v4825_v58 = vld [vmem:[#allocation2 + $0x4e] ss:$8 sm:$0x7] }
 0x6d6   :  { %v3701_v32 = vpop.eup %3700  ;;  %v2240_v50 = vmul.f32 %v3699_v30, %v2236_v44  ;;  %v2424_v44 = vrot.slane %v4815_v62, 1  ;;  %v2425_v30 = vrot.slane %v4818_v9, 1 }
 0x6d7   :  { %v2241_v23 = vmul.f32 %v3701_v32, %v2237_v39  ;;  %v4774_v26 = vadd.f32 %v2243_v38, %v2239_v36  ;;  %2250 = vst [vmem:[#allocation3 + $0x5] sm:$0x1] %v4770_v51  ;;  %v2254_v31 = vpack.c.bf16 %v4770_v51, %v4770_v51  ;;  %v2426_v36 = vrot.slane %v4821_v59, 1 }
 0x6d8   :  { %v4777_v61 = vadd.f32 %v2244_v41, %v2240_v50 }
 0x6d9   :  { %v4779_v47 = vadd.f32 %v2245_v8, %v2241_v23  ;;  %2251 = vst [vmem:[#allocation3 + $0xd] sm:$0x1] %v4774_v26  ;;  %v2255_v53 = vpack.c.bf16 %v4774_v26, %v4774_v26  ;;  %v2262_v60 = vunpack.c.l.b16 %v2254_v31  ;;  %v2427_v8 = vrot.slane %v4825_v58, 1 }
 0x6da   :  { %2252 = vst [vmem:[#allocation3 + $0x15] sm:$0x1] %v4777_v61  ;;  %v2256_v25 = vpack.c.bf16 %v4777_v61, %v4777_v61 }
 0x6db   :  { %2253 = vst [vmem:[#allocation3 + $0x1d] sm:$0x1] %v4779_v47  ;;  %v2257_v16 = vpack.c.bf16 %v4779_v47, %v4779_v47  ;;  %v2263_v7 = vunpack.c.l.b16 %v2255_v53 }
 0x6dc   :  { %v2264_v28 = vunpack.c.l.b16 %v2256_v25 }
 0x6dd   :  { %v2265_v42 = vunpack.c.l.b16 %v2257_v16  ;;  %v2266_v29 = vrot.slane %v2263_v7, 7 }
 0x6de   :  { %v2268_v6 = vrot.slane %v2264_v28, 6 }
 0x6df   :  { %v2267_v43 = vsel %vm739_vm2, %v2266_v29, %v2262_v60  ;;  %v2270_v27 = vrot.slane %v2265_v42, 5 }
 0x6e0   :  { %v2269_v18 = vsel %vm742_vm3, %v2268_v6, %v2267_v43 }
 0x6e1   :  { %v2271_v46 = vsel %vm745_vm4, %v2270_v27, %v2269_v18 }
 0x6e2   :  { %v2272_v21 = vpack.c.b16 %v2271_v46, %v2271_v46 }
 0x6e4   :  { %2307 = vmatmul.mubr.bf16.vlgmr.msra.gmra.mrb[24].mxu0 %v2272_v21  ;;  %3354 = vmatmul.mubr.bf16.vlgmr.msra.gmra.mrb[36].mxu1 %v2272_v21  ;;  %v4840_v21 = vld [vmem:[%s4930_s4] ss:$0 sm:$0xff] }
 0x6e5   :  { %2580 = vmatpush1.bf16.msra.mxu0 %v4684_v45  ;;  %3358 = vmatpush3.bf16.msra.mxu1 %v3818_v40  ;;  %v3820_v45 = vld [vmem:[#allocation9 + $0x38] ss:$12 sps:$4 sm:$0xff]  }
 0x6e6   :  { %2581 = vmatprep.subr.bf16.mxu0 %v4688_v2  ;;  %3359 = vmatprep.subr.bf16.mxu1 %v3959_v20  ;;  %v3822_v2 = vld [vmem:[#allocation9 + $0x68] ss:$12 sps:$4 sm:$0xff]  }
 0x6e7   :  { %2611 = vmatprep.mubr.bf16.mxu0 %v3958_v0  ;;  %3373 = vmatprep.mubr.msk.bf16.mxu1 %vm3960_vm1, %v3959_v20  ;;  %v3821_v0 = vld [vmem:[#allocation9 + $0x50] ss:$12 sps:$4 sm:$0xff]  }
 0x6e9   :  { %2582 = vmatpush1.bf16.msra.mxu0 %v4695_v55  ;;  %3360 = vmatpush3.bf16.msra.mxu1 %v3819_v15  ;;  %v3823_v55 = vld [vmem:[#allocation9 + $0x78] ss:$12 sps:$4 sm:$0xff]  }
 0x6ea   :  { %2583 = vmatprep.subr.bf16.mxu0 %v4699_v56  ;;  %3361 = vmatprep.subr.bf16.mxu1 %v3959_v20  ;;  %v3824_v56 = vld [vmem:[#allocation9 + $0x80] ss:$12 sps:$4 sm:$0xff]  }
 0x6ed   :  { %2584 = vmatpush1.bf16.msra.mxu0 %v4703_v10  ;;  %3362 = vmatpush3.bf16.msra.mxu1 %v3820_v45  ;;  %v3825_v10 = vld [vmem:[#allocation9 + $0x94] ss:$12 sps:$4 sm:$0xff]  }
 0x6ee   :  { %2585 = vmatprep.subr.bf16.mxu0 %v4707_v49  ;;  %3363 = vmatprep.subr.bf16.mxu1 %v3959_v20  ;;  %v3826_v49 = vld [vmem:[#allocation9 + $0x90] ss:$12 sps:$4 sm:$0xff]  }
 0x6f1   :  { %2586 = vmatpush1.bf16.msra.mxu0 %v4711_v24  ;;  %3364 = vmatpush3.bf16.msra.mxu1 %v3821_v0  ;;  %v3827_v24 = vld [vmem:[#allocation9 + $0x98] ss:$12 sps:$4 sm:$0xff]  }
 0x6f2   :  { %2587 = vmatprep.subr.bf16.mxu0 %v4715_v17  ;;  %3365 = vmatprep.subr.bf16.mxu1 %v3959_v20  ;;  %v3828_v17 = vld [vmem:[#allocation9 + $0xac] ss:$12 sps:$4 sm:$0xff]  }
 0x6f5   :  { %2588 = vmatpush1.bf16.msra.mxu0 %v4719_v37  ;;  %3366 = vmatpush3.bf16.msra.mxu1 %v3822_v2  ;;  %v3829_v37 = vld [vmem:[#allocation9 + $0xa8] ss:$12 sps:$4 sm:$0xff]  }
 0x6f6   :  { %2589 = vmatprep.subr.bf16.mxu0 %v4723_v34  ;;  %3367 = vmatprep.subr.bf16.mxu1 %v3959_v20  ;;  %v3830_v34 = vld [vmem:[#allocation9 + $0xb0] ss:$12 sps:$4 sm:$0xff]  }
 0x6f9   :  { %2590 = vmatpush1.bf16.msra.mxu0 %v3823_v55  ;;  %3368 = vmatpush3.bf16.msra.mxu1 %v3824_v56 }
 0x6fa   :  { %2591 = vmatprep.subr.bf16.mxu0 %v3825_v10  ;;  %3369 = vmatprep.subr.bf16.mxu1 %v3959_v20 }
 0x6fd   :  { %2592 = vmatpush1.bf16.msra.mxu0 %v3826_v49  ;;  %3370 = vmatpush3.bf16.msra.mxu1 %v3827_v24 }
 0x6fe   :  { %2593 = vmatprep.subr.bf16.mxu0 %v3828_v17  ;;  %3371 = vmatprep.subr.bf16.mxu1 %v3959_v20 }
 0x701   :  { %2594 = vmatpush1.bf16.msra.mxu0 %v3829_v37  ;;  %3372 = vmatpush3.bf16.msra.mxu1 %v3830_v34 }
 0x7b7   :  { %v2308_v13 = vpop.f32.mrb[24].mxu0  ;;  %v2349_v4 = vpop.f32.mrb[36].mxu1 }
 0x7b8   :  { %v2370_v52 = vrot.slane %v2308_v13, %v4203_v14  ;;  %v2310_v33 = vpop.f32.mrb[25].mxu0  ;;  %v3355_v11 = vpop.f32.mrb[37].mxu1  ;;  %v2489_v40 = vadd.f32 %v4840_v21, %v2349_v4 }
 0x7b9   :  { %v2439_v12 = vrot.slane %v2310_v33, %v4203_v14  ;;  %v2312_v19 = vpop.f32.mrb[26].mxu0  ;;  %v2352_v57 = vpop.f32.mrb[38].mxu1 }
 0x7ba   :  { %v2371_v20 = vcombine.high %v2370_v52, %v2370_v52  ;;  %v2378_v35 = vrot.slane %v2370_v52, %v4203_v14  ;;  %v2313_v63 = vpop.f32.mrb[27].mxu0  ;;  %v3356_v1 = vpop.f32.mrb[39].mxu1  ;;  %v2497_v10 = vrot.slane %v2489_v40, %v4203_v14 }
 0x7bb   :  { %v2440_v22 = vcombine.high %v2439_v12, %v2439_v12  ;;  %v2447_v54 = vrot.slane %v2439_v12, %v4203_v14  ;;  %v2524_v1 = vrot.slane %v4818_v9, 2 }
 0x7bc   :  { %v2385_v48 = vrot.slane %v2371_v20, %v4203_v14  ;;  %v2386_v3 = vcombine.high %v2378_v35, %v2378_v35  ;;  %v2392_v5 = vadd.f32 %v2378_v35, %v4815_v62  ;;  %v2498_v37 = vcombine.high %v2497_v10, %v2497_v10 }
 0x7bd   :  { %v2454_v38 = vrot.slane %v2440_v22, %v4203_v14  ;;  %v2455_v39 = vcombine.high %v2447_v54, %v2447_v54  ;;  %v2461_v53 = vadd.f32 %v2447_v54, %v2424_v44  ;;  %v2505_v52 = vrot.slane %v2497_v10, %v4203_v14 }
 0x7be   :  { %v2387_v32 = vcombine.high %v2385_v48, %v2385_v48  ;;  %v2393_v41 = vadd.f32 %v2385_v48, %v4818_v9  ;;  %v2394_v50 = vadd.f32 %v2386_v3, %v4821_v59  ;;  %v3098_v23 = vmul.f32 -1.442695, %v2392_v5 }
 0x7bf   :  { %v2456_v31 = vcombine.high %v2454_v38, %v2454_v38  ;;  %v2462_v25 = vadd.f32 %v2454_v38, %v2425_v30  ;;  %v2463_v60 = vadd.f32 %v2455_v39, %v2426_v36  ;;  %v3102_v6 = vmul.f32 -1.442695, %v2461_v53 }
 0x7c0   :  { %v2395_v16 = vadd.f32 %v2387_v32, %v4825_v58  ;;  %3702 = vpow2.f32 %v3098_v23  ;;  %v3099_v7 = vmul.f32 -1.442695, %v2393_v41  ;;  %v3100_v28 = vmul.f32 -1.442695, %v2394_v50 }
 0x7c1   :  { %v2464_v29 = vadd.f32 %v2456_v31, %v2427_v8  ;;  %v3103_v43 = vmul.f32 -1.442695, %v2462_v25  ;;  %v3104_v27 = vmul.f32 -1.442695, %v2463_v60  ;;  %v2512_v11 = vrot.slane %v2498_v37, %v4203_v14 }
 0x7c2   :  { %3704 = vpow2.f32 %v3099_v7  ;;  %v3101_v42 = vmul.f32 -1.442695, %v2395_v16  ;;  %v2523_v20 = vrot.slane %v4815_v62, 2  ;;  %v2513_v22 = vcombine.high %v2505_v52, %v2505_v52 }
 0x7c3   :  { %3706 = vpow2.f32 %v3100_v28  ;;  %v3105_v18 = vmul.f32 -1.442695, %v2464_v29  ;;  %v2514_v48 = vcombine.high %v2512_v11, %v2512_v11  ;;  %v2525_v30 = vrot.slane %v4821_v59, 2 }
 0x7c4   :  { %3708 = vpow2.f32 %v3101_v42  ;;  %v2526_v38 = vrot.slane %v4825_v58, 2 }
 0x7c5   :  { %3710 = vpow2.f32 %v3102_v6 }
 0x7c6   :  { %3712 = vpow2.f32 %v3103_v43 }
 0x7c7   :  { %3714 = vpow2.f32 %v3104_v27 }
 0x7c8   :  { %3716 = vpow2.f32 %v3105_v18 }
 0x7ca   :  { %v3703_v46 = vpop.eup %3702 }
 0x7cb   :  { %v2408_v15 = vadd.f32 1.0, %v3703_v46 }
 0x7cc   :  { %v3705_v45 = vpop.eup %3704 }
 0x7cd   :  { %v3707_v0 = vpop.eup %3706  ;;  %v2409_v2 = vadd.f32 1.0, %v3705_v45  ;;  %3718 = vrcp.f32 %v2408_v15 }
 0x7ce   :  { %v3709_v55 = vpop.eup %3708  ;;  %v2410_v56 = vadd.f32 1.0, %v3707_v0 }
 0x7cf   :  { %v2411_v49 = vadd.f32 1.0, %v3709_v55  ;;  %3720 = vrcp.f32 %v2409_v2  ;;  %v3711_v24 = vpop.eup %3710 }
 0x7d0   :  { %3722 = vrcp.f32 %v2410_v56  ;;  %v3713_v17 = vpop.eup %3712  ;;  %v2477_v4 = vadd.f32 1.0, %v3711_v24 }
 0x7d1   :  { %3724 = vrcp.f32 %v2411_v49  ;;  %v3715_v34 = vpop.eup %3714  ;;  %v2478_v33 = vadd.f32 1.0, %v3713_v17 }
 0x7d2   :  { %v3717_v13 = vpop.eup %3716  ;;  %v2479_v12 = vadd.f32 1.0, %v3715_v34  ;;  %3726 = vrcp.f32 %v2477_v4 }
 0x7d3   :  { %v2480_v57 = vadd.f32 1.0, %v3717_v13  ;;  %3728 = vrcp.f32 %v2478_v33  ;;  %v3455_v33 = vld [vmem:[#allocation10 + $0x8] sm:$0xff]  }
 0x7d4   :  { %3730 = vrcp.f32 %v2479_v12  ;;  %v3457_v12 = vld [vmem:[#allocation10 + $0x18] sm:$0xff]  }
 0x7d5   :  { %3732 = vrcp.f32 %v2480_v57  ;;  %v3459_v57 = vld [vmem:[#allocation10 + $0x28] sm:$0xff]  }
 0x7d7   :  { %v3719_v19 = vpop.eup %3718 }
 0x7d8   :  { %v2519_v35 = vmul.f32 %v3719_v19, %v2505_v52  ;;  %v3454_v52 = vld [vmem:[#allocation10] sm:$0xff]  }
 0x7d9   :  { %v3721_v63 = vpop.eup %3720  ;;  %3377 = vmatprep.subr.bf16.mxu0 %v3454_v52  ;;  %v3458_v19 = vld [vmem:[#allocation10 + $0x20] sm:$0xff]  }
 0x7da   :  { %v3723_v54 = vpop.eup %3722  ;;  %v2520_v3 = vmul.f32 %v3721_v63, %v2512_v11  ;;  %v2531_v5 = vadd.f32 %v2523_v20, %v2519_v35  ;;  %v3456_v11 = vld [vmem:[#allocation10 + $0x10] sm:$0xff]   ;;  %v3461_v35 = vld [vmem:[#allocation10 + $0x38] sm:$0xff]  }
 0x7db   :  { %v3725_v44 = vpop.eup %3724  ;;  %v2521_v36 = vmul.f32 %v3723_v54, %v2513_v22  ;;  %v3460_v20 = vld [vmem:[#allocation10 + $0x30] sm:$0xff]  }
 0x7dc   :  { %v2522_v62 = vmul.f32 %v3725_v44, %v2514_v48  ;;  %v2532_v39 = vadd.f32 %v2524_v1, %v2520_v3  ;;  %3734 = vtanh.f32 %v2531_v5  ;;  %v3727_v9 = vpop.eup %3726  ;;  %v4877_v22 = vld [vmem:[#allocation2 + $0x7] ss:$8 sm:$0x7] }
 0x7dd   :  { %v2533_v32 = vadd.f32 %v2525_v30, %v2521_v36  ;;  %v3729_v50 = vpop.eup %3728  ;;  %v2539_v31 = vsub.f32 1.0, %v3727_v9  ;;  %v2547_v16 = vmul.f32 %v3727_v9, %v4770_v51  ;;  %v4880_v5 = vld [vmem:[#allocation2 + $0x1f] ss:$8 sm:$0x7] }
 0x7de   :  { %v2534_v41 = vadd.f32 %v2526_v38, %v2522_v62  ;;  %3736 = vtanh.f32 %v2532_v39  ;;  %v3731_v23 = vpop.eup %3730  ;;  %v2540_v25 = vsub.f32 1.0, %v3729_v50  ;;  %v2548_v42 = vmul.f32 %v3729_v50, %v4774_v26  ;;  %v4883_v38 = vld [vmem:[#allocation2 + $0x37] ss:$8 sm:$0x7] }
 0x7df   :  { %3738 = vtanh.f32 %v2533_v32  ;;  %v3733_v8 = vpop.eup %3732  ;;  %v2541_v58 = vsub.f32 1.0, %v3731_v23  ;;  %v2549_v27 = vmul.f32 %v3731_v23, %v4777_v61  ;;  %v4887_v23 = vld [vmem:[#allocation2 + $0x4f] ss:$8 sm:$0x7] }
 0x7e0   :  { %3740 = vtanh.f32 %v2534_v41  ;;  %v2542_v29 = vsub.f32 1.0, %v3733_v8  ;;  %v2550_v40 = vmul.f32 %v3733_v8, %v4779_v47 }
 0x7e6   :  { %v3735_v53 = vpop.eup %3734 }
 0x7e7   :  { %v2543_v59 = vmul.f32 %v3735_v53, %v2539_v31 }
 0x7e8   :  { %v3737_v7 = vpop.eup %3736 }
 0x7e9   :  { %v3739_v28 = vpop.eup %3738  ;;  %v2544_v60 = vmul.f32 %v3737_v7, %v2540_v25  ;;  %v4852_v6 = vadd.f32 %v2547_v16, %v2543_v59  ;;  %v2729_v25 = vrot.slane %v4877_v22, 1  ;;  %v2730_v59 = vrot.slane %v4880_v5, 1 }
 0x7ea   :  { %v3741_v43 = vpop.eup %3740  ;;  %v2545_v18 = vmul.f32 %v3739_v28, %v2541_v58  ;;  %v2731_v16 = vrot.slane %v4883_v38, 1 }
 0x7eb   :  { %v2546_v46 = vmul.f32 %v3741_v43, %v2542_v29  ;;  %v4856_v15 = vadd.f32 %v2548_v42, %v2544_v60  ;;  %2555 = vst [vmem:[#allocation3 + $0x6] sm:$0x1] %v4852_v6  ;;  %v2559_v26 = vpack.c.bf16 %v4852_v6, %v4852_v6  ;;  %v2732_v43 = vrot.slane %v4887_v23, 1 }
 0x7ec   :  { %v4859_v51 = vadd.f32 %v2549_v27, %v2545_v18 }
 0x7ed   :  { %v4861_v45 = vadd.f32 %v2550_v40, %v2546_v46  ;;  %2556 = vst [vmem:[#allocation3 + $0xe] sm:$0x1] %v4856_v15  ;;  %v2560_v61 = vpack.c.bf16 %v4856_v15, %v4856_v15  ;;  %v2567_v56 = vunpack.c.l.b16 %v2559_v26 }
 0x7ee   :  { %2557 = vst [vmem:[#allocation3 + $0x16] sm:$0x1] %v4859_v51  ;;  %v2561_v47 = vpack.c.bf16 %v4859_v51, %v4859_v51 }
 0x7ef   :  { %2558 = vst [vmem:[#allocation3 + $0x1e] sm:$0x1] %v4861_v45  ;;  %v2562_v0 = vpack.c.bf16 %v4861_v45, %v4861_v45  ;;  %v2568_v2 = vunpack.c.l.b16 %v2560_v61 }
 0x7f0   :  { %v2569_v55 = vunpack.c.l.b16 %v2561_v47 }
 0x7f1   :  { %v2570_v10 = vunpack.c.l.b16 %v2562_v0  ;;  %v2571_v49 = vrot.slane %v2568_v2, 7 }
 0x7f2   :  { %v2573_v24 = vrot.slane %v2569_v55, 6 }
 0x7f3   :  { %v2572_v17 = vsel %vm739_vm2, %v2571_v49, %v2567_v56  ;;  %v2575_v37 = vrot.slane %v2570_v10, 5 }
 0x7f4   :  { %v2574_v34 = vsel %vm742_vm3, %v2573_v24, %v2572_v17 }
 0x7f5   :  { %v2576_v13 = vsel %vm745_vm4, %v2575_v37, %v2574_v34 }
 0x7f6   :  { %v2577_v4 = vpack.c.b16 %v2576_v13, %v2576_v13 }
 0x7f8   :  { %2612 = vmatmul.mubr.bf16.vlgmr.msra.gmra.mrb[28].mxu0 %v2577_v4  ;;  %3374 = vmatmul.mubr.bf16.vlgmr.msra.gmra.mrb[40].mxu1 %v2577_v4 }
 0x7f9   :  { %3378 = vmatpush3.bf16.msra.mxu0 %v3454_v52 }
 0x7fa   :  { %3379 = vmatprep.subr.bf16.mxu0 %v3455_v33 }
 0x7fd   :  { %3380 = vmatpush3.bf16.msra.mxu0 %v3455_v33 }
 0x7fe   :  { %3381 = vmatprep.subr.bf16.mxu0 %v3456_v11 }
 0x801   :  { %3382 = vmatpush3.bf16.msra.mxu0 %v3456_v11 }
 0x802   :  { %3383 = vmatprep.subr.bf16.mxu0 %v3457_v12 }
 0x805   :  { %3384 = vmatpush3.bf16.msra.mxu0 %v3457_v12 }
 0x806   :  { %3385 = vmatprep.subr.bf16.mxu0 %v3458_v19 }
 0x809   :  { %3386 = vmatpush3.bf16.msra.mxu0 %v3458_v19 }
 0x80a   :  { %3387 = vmatprep.subr.bf16.mxu0 %v3459_v57 }
 0x80d   :  { %3388 = vmatpush3.bf16.msra.mxu0 %v3459_v57 }
 0x80e   :  { %3389 = vmatprep.subr.bf16.mxu0 %v3460_v20 }
 0x811   :  { %3390 = vmatpush3.bf16.msra.mxu0 %v3460_v20 }
 0x812   :  { %3391 = vmatprep.subr.bf16.mxu0 %v3461_v35 }
 0x815   :  { %3392 = vmatpush3.bf16.msra.mxu0 %v3461_v35 }
 0x8cb   :  { %v2613_v63 = vpop.f32.mrb[28].mxu0  ;;  %v2654_v1 = vpop.f32.mrb[40].mxu1 }
 0x8cc   :  { %v2675_v54 = vrot.slane %v2613_v63, %v4203_v14  ;;  %v2615_v48 = vpop.f32.mrb[29].mxu0  ;;  %v3375_v3 = vpop.f32.mrb[41].mxu1  ;;  %v2794_v17 = vadd.f32 %v4840_v21, %v2654_v1 }
 0x8cd   :  { %v2744_v44 = vrot.slane %v2615_v48, %v4203_v14  ;;  %v2617_v30 = vpop.f32.mrb[30].mxu0  ;;  %v2657_v36 = vpop.f32.mrb[42].mxu1 }
 0x8ce   :  { %v2676_v62 = vcombine.high %v2675_v54, %v2675_v54  ;;  %v2683_v39 = vrot.slane %v2675_v54, %v4203_v14  ;;  %v2618_v32 = vpop.f32.mrb[31].mxu0  ;;  %v3376_v41 = vpop.f32.mrb[43].mxu1  ;;  %v2802_v11 = vrot.slane %v2794_v17, %v4203_v14  ;;  %v2828_v36 = vrot.slane %v4877_v22, 2 }
 0x8cf   :  { %v2745_v9 = vcombine.high %v2744_v44, %v2744_v44  ;;  %v2752_v50 = vrot.slane %v2744_v44, %v4203_v14  ;;  %v2829_v32 = vrot.slane %v4880_v5, 2 }
 0x8d0   :  { %v2690_v8 = vrot.slane %v2676_v62, %v4203_v14  ;;  %v2691_v31 = vcombine.high %v2683_v39, %v2683_v39  ;;  %v2697_v53 = vadd.f32 %v2683_v39, %v4877_v22  ;;  %v2803_v20 = vcombine.high %v2802_v11, %v2802_v11 }
 0x8d1   :  { %v2759_v7 = vrot.slane %v2745_v9, %v4203_v14  ;;  %v2760_v58 = vcombine.high %v2752_v50, %v2752_v50  ;;  %v2766_v18 = vadd.f32 %v2752_v50, %v2729_v25  ;;  %v2810_v1 = vrot.slane %v2802_v11, %v4203_v14 }
 0x8d2   :  { %v2692_v28 = vcombine.high %v2690_v8, %v2690_v8  ;;  %v2698_v60 = vadd.f32 %v2690_v8, %v4880_v5  ;;  %v2699_v42 = vadd.f32 %v2691_v31, %v4883_v38  ;;  %v3106_v29 = vmul.f32 -1.442695, %v2697_v53 }
 0x8d3   :  { %v2761_v27 = vcombine.high %v2759_v7, %v2759_v7  ;;  %v2767_v46 = vadd.f32 %v2759_v7, %v2730_v59  ;;  %v2768_v47 = vadd.f32 %v2760_v58, %v2731_v16  ;;  %v3110_v55 = vmul.f32 -1.442695, %v2766_v18 }
 0x8d4   :  { %v2700_v40 = vadd.f32 %v2692_v28, %v4887_v23  ;;  %3742 = vpow2.f32 %v3106_v29  ;;  %v3107_v26 = vmul.f32 -1.442695, %v2698_v60  ;;  %v3108_v61 = vmul.f32 -1.442695, %v2699_v42 }
 0x8d5   :  { %v2769_v2 = vadd.f32 %v2761_v27, %v2732_v43  ;;  %v3111_v56 = vmul.f32 -1.442695, %v2767_v46  ;;  %v3112_v10 = vmul.f32 -1.442695, %v2768_v47  ;;  %v2817_v48 = vrot.slane %v2803_v20, %v4203_v14 }
 0x8d6   :  { %3744 = vpow2.f32 %v3107_v26  ;;  %v3109_v0 = vmul.f32 -1.442695, %v2700_v40  ;;  %v2818_v41 = vcombine.high %v2810_v1, %v2810_v1  ;;  %v2830_v14 = vrot.slane %v4883_v38, 2 }
 0x8d7   :  { %3746 = vpow2.f32 %v3108_v61  ;;  %v3113_v49 = vmul.f32 -1.442695, %v2769_v2  ;;  %v2819_v50 = vcombine.high %v2817_v48, %v2817_v48  ;;  %v2831_v59 = vrot.slane %v4887_v23, 2 }
 0x8d8   :  { %3748 = vpow2.f32 %v3109_v0 }
 0x8d9   :  { %3750 = vpow2.f32 %v3110_v55 }
 0x8da   :  { %3752 = vpow2.f32 %v3111_v56 }
 0x8db   :  { %3754 = vpow2.f32 %v3112_v10 }
 0x8dc   :  { %3756 = vpow2.f32 %v3113_v49 }
 0x8de   :  { %v3743_v24 = vpop.eup %3742 }
 0x8df   :  { %v2713_v37 = vadd.f32 1.0, %v3743_v24 }
 0x8e0   :  { %v3745_v34 = vpop.eup %3744 }
 0x8e1   :  { %v3747_v13 = vpop.eup %3746  ;;  %v2714_v4 = vadd.f32 1.0, %v3745_v34  ;;  %3758 = vrcp.f32 %v2713_v37 }
 0x8e2   :  { %v3749_v52 = vpop.eup %3748  ;;  %v2715_v33 = vadd.f32 1.0, %v3747_v13 }
 0x8e3   :  { %v2716_v12 = vadd.f32 1.0, %v3749_v52  ;;  %3760 = vrcp.f32 %v2714_v4  ;;  %v3751_v19 = vpop.eup %3750 }
 0x8e4   :  { %3762 = vrcp.f32 %v2715_v33  ;;  %v3753_v57 = vpop.eup %3752  ;;  %v2782_v21 = vadd.f32 1.0, %v3751_v19 }
 0x8e5   :  { %3764 = vrcp.f32 %v2716_v12  ;;  %v3755_v35 = vpop.eup %3754  ;;  %v2783_v54 = vadd.f32 1.0, %v3753_v57 }
 0x8e6   :  { %v3757_v63 = vpop.eup %3756  ;;  %v2784_v3 = vadd.f32 1.0, %v3755_v35  ;;  %3766 = vrcp.f32 %v2782_v21 }
 0x8e7   :  { %v2785_v30 = vadd.f32 1.0, %v3757_v63  ;;  %3768 = vrcp.f32 %v2783_v54 }
 0x8e8   :  { %3770 = vrcp.f32 %v2784_v3 }
 0x8e9   :  { %3772 = vrcp.f32 %v2785_v30 }
 0x8eb   :  { %v3759_v44 = vpop.eup %3758 }
 0x8ec   :  { %v2824_v62 = vmul.f32 %v3759_v44, %v2810_v1 }
 0x8ed   :  { %v3761_v39 = vpop.eup %3760 }
 0x8ee   :  { %v3763_v9 = vpop.eup %3762  ;;  %v2825_v8 = vmul.f32 %v3761_v39, %v2817_v48  ;;  %v2836_v31 = vadd.f32 %v2828_v36, %v2824_v62 }
 0x8ef   :  { %v3765_v53 = vpop.eup %3764  ;;  %v2826_v25 = vmul.f32 %v3763_v9, %v2818_v41 }
 0x8f0   :  { %v2827_v22 = vmul.f32 %v3765_v53, %v2819_v50  ;;  %v2837_v16 = vadd.f32 %v2829_v32, %v2825_v8  ;;  %3774 = vtanh.f32 %v2836_v31  ;;  %v3767_v5 = vpop.eup %3766 }
 0x8f1   :  { %v2838_v7 = vadd.f32 %v2830_v14, %v2826_v25  ;;  %v3769_v28 = vpop.eup %3768  ;;  %v2844_v29 = vsub.f32 1.0, %v3767_v5  ;;  %v2852_v18 = vmul.f32 %v3767_v5, %v4852_v6 }
 0x8f2   :  { %v2839_v58 = vadd.f32 %v2831_v59, %v2827_v22  ;;  %3776 = vtanh.f32 %v2837_v16  ;;  %v3771_v60 = vpop.eup %3770  ;;  %v2845_v27 = vsub.f32 1.0, %v3769_v28  ;;  %v2853_v47 = vmul.f32 %v3769_v28, %v4856_v15 }
 0x8f3   :  { %3778 = vtanh.f32 %v2838_v7  ;;  %v3773_v42 = vpop.eup %3772  ;;  %v2846_v23 = vsub.f32 1.0, %v3771_v60  ;;  %v2854_v56 = vmul.f32 %v3771_v60, %v4859_v51  ;;  %v3114_v51 = vld [vmem:[%s4932_s6] ss:$0 sm:$0xff] }
 0x8f4   :  { %3780 = vtanh.f32 %v2839_v58  ;;  %v2847_v26 = vsub.f32 1.0, %v3773_v42  ;;  %v2855_v49 = vmul.f32 %v3773_v42, %v4861_v45 }
 0x8fa   :  { %v3775_v43 = vpop.eup %3774 }
 0x8fb   :  { %v2848_v38 = vmul.f32 %v3775_v43, %v2844_v29 }
 0x8fc   :  { %v3777_v46 = vpop.eup %3776 }
 0x8fd   :  { %v3779_v40 = vpop.eup %3778  ;;  %v2849_v61 = vmul.f32 %v3777_v46, %v2845_v27  ;;  %v2856_v0 = vadd.f32 %v2852_v18, %v2848_v38 }
 0x8fe   :  { %v3781_v2 = vpop.eup %3780  ;;  %v2850_v55 = vmul.f32 %v3779_v40, %v2846_v23 }
 0x8ff   :  { %v2851_v10 = vmul.f32 %v3781_v2, %v2847_v26  ;;  %v2857_v24 = vadd.f32 %v2853_v47, %v2849_v61  ;;  %2860 = vst [vmem:[#allocation3 + $0x7] sm:$0x1] %v2856_v0 }
 0x900   :  { %v2858_v17 = vadd.f32 %v2854_v56, %v2850_v55 }
 0x901   :  { %v2859_v37 = vadd.f32 %v2855_v49, %v2851_v10  ;;  %2861 = vst [vmem:[#allocation3 + $0xf] sm:$0x1] %v2857_v24 }
 0x902   :  { %2862 = vst [vmem:[#allocation3 + $0x17] sm:$0x1] %v2858_v17 }
 0x903   :  { %2863 = vst [vmem:[#allocation3 + $0x1f] sm:$0x1] %v2859_v37 }
 0x906   :  { %v2864_v6 = vld [vmem:[#allocation3] sm:$0xff] }
 0x908   :  { %v2865_v34 = vld [vmem:[#allocation3 + $0x8] sm:$0xff] }
 0x909   :  { %v2868_v13 = vpack.c.bf16 %v2865_v34, %v2864_v6  ;;  %v2866_v4 = vld [vmem:[#allocation3 + $0x10] sm:$0xff] }
 0x90a   :  { %v2867_v15 = vld [vmem:[#allocation3 + $0x18] sm:$0xff] }
 0x90b   :  { %3393 = vmatprep.mubr.bf16.mxu0 %v2868_v13  ;;  %v2869_v52 = vpack.c.bf16 %v2867_v15, %v2866_v4 }
 0x90d   :  { %3394 = vmatmul.mubr.bf16.vlgmr.msra.gmra.mrb[32].mxu0 %v2869_v52 }
 0x9e0   :  { %v3395_v45 = vpop.f32.mrb[32].mxu0 }
 0x9e1   :  { %v2984_v33 = vadd.f32 %v3395_v45, %v3114_v51  ;;  %v2975_v11 = vpop.f32.mrb[33].mxu0 }
 0x9e2   :  { %v2976_v12 = vadd.f32 %v3114_v51, %v2975_v11  ;;  %v3396_v19 = vpop.f32.mrb[34].mxu0 }
 0x9e3   :  { %2992 = vst [vmem:[#allocation12 + $0x10] sm:$0xff] %v2984_v33  ;;  %v2987_v57 = vadd.f32 %v3396_v19, %v3114_v51  ;;  %v2978_v20 = vpop.f32.mrb[35].mxu0 }
 0x9e4   :  { %2990 = vst [vmem:[#allocation12] sm:$0xff] %v2976_v12  ;;  %v2979_v35 = vadd.f32 %v3114_v51, %v2978_v20 }
 0x9e5   :  { %2993 = vst [vmem:[#allocation12 + $0x18] sm:$0xff] %v2987_v57 }
 0x9e6   :  { %2991 = vst [vmem:[#allocation12 + $0x8] sm:$0xff] %v2979_v35 }
 0x9e7   :  { %3931 = shalt.err (!%p3928_p8)
}
 0x9e8   :  { %s3932_s17 = scalar_lea.hbm %s4933_s7, 512 }
 0x9e9   :  { %p3933_p9 = scmp.ne.s32.totalorder %s4933_s7, %s3932_s17  ;;  %p3936_p10 = scmp.lt.u32.totalorder %s3932_s17, %s4933_s7 }
 0x9eb   :  { %p3938_p11 = pnand %p3936_p10, %p3933_p9 }
 0x9ed   :  { %3941 = shalt.err (!%p3938_p11)
}
 0x9ee   :  { %s3963_s20 = smov 128   ;;  %s3964_s21 = smov 8  }
 0x9ef   :  { %3005 = dma.vmem_to_hbm [thread:$0]  %s3000_s13, 512, %s4933_s7, [#allocation6], %s3963_s20, %s3963_s20, %s3964_s21  }
 0x9f0   :  { %3948 = dma.done.wait [#allocation6], 512  }
 0x9f1   :  { %3949 = vsyncadd [#allocation6], 4294966784 }
 0x9f2   :  { %3009 = vsyncpa [#allocation5], 1 }
 0x9f3   :  { %3010 = vsyncpa [#allocation8], 1 }
 0x9f4   :  { %3011 = vsyncpa [#allocation11], 1 }
 0x9f5   :  { %3012 = vsyncpa [#allocation6], 1 }

</bundles_post_ra>
